<compile_context>
chip_gen: v7x
topology: tpu7x:2x2x1
jax: 0.10.0
libtpu: 0.0.40
codegen_flags: <defaults>
</compile_context>

<pallas_src>
import jax
import jax.numpy as jnp
from jax import lax
from jax.experimental import pallas as pl
from jax.experimental.pallas import tpu as pltpu

FEAT = 256      # descriptor / feat_dim of segment_loss
H2_PAD = 128    # 64-wide hidden layer padded to a full lane width
LANE = 128


def _round_up(x, m):
    return ((x + m - 1) // m) * m


# -----------------------------------------------------------------------------
# Fused kernel factory (closes over static minibatch structure)
# -----------------------------------------------------------------------------
def _make_fused_kernel(n_pos, n_trip, loss_margin, triplet_margin=0.5):
    p_lo = 1            # positives start (num_anchor == 1, as in the original)
    n_lo = 1 + n_pos    # negatives start

    def kernel(x_ref, tgt_ref, wm_ref, bm_ref, w1_ref, b1_ref, w2_ref, b2_ref,
               w3_ref, b3_ref, total_ref, trip_ref, cls_ref,
               anchor_scr, dist_scr, nll_acc, cnt_acc):
        i = pl.program_id(0)
        tile_n = x_ref.shape[0]
        c_pad = b3_ref.shape[1]

        # ---- backbone: pred = x @ Wm + bm  (bf16 operands, f32 accumulation) ----
        pred = jnp.dot(x_ref[...], wm_ref[...],
                       preferred_element_type=jnp.float32) + bm_ref[...]

        @pl.when(i == 0)
        def _init():
            nll_acc[...] = jnp.zeros_like(nll_acc)
            cnt_acc[...] = jnp.zeros_like(cnt_acc)
            # Anchor is row 0 of the first tile; keep its descriptor resident.
            anchor_scr[...] = jnp.broadcast_to(pred[0:1, :], anchor_scr.shape)

        # ---- triplet bookkeeping: only the distance-to-anchor column persists ----
        a = anchor_scr[0:1, :]
        diff = pred - a
        dist = jnp.sqrt(jnp.sum(diff * diff, axis=1, keepdims=True) + 1e-12)
        row0 = pl.multiple_of(i * tile_n, tile_n)
        dist_scr[pl.ds(row0, tile_n), :] = dist

        # ---- segment_loss classifier: 256 -> 256 ReLU -> 64(pad128) ReLU -> C(pad128)
        h1 = jnp.maximum(
            jnp.dot(pred.astype(jnp.bfloat16), w1_ref[...],
                    preferred_element_type=jnp.float32) + b1_ref[...], 0.0)
        h2 = jnp.maximum(
            jnp.dot(h1.astype(jnp.bfloat16), w2_ref[...],
                    preferred_element_type=jnp.float32) + b2_ref[...], 0.0)
        logits = jnp.dot(h2.astype(jnp.bfloat16), w3_ref[...],
                         preferred_element_type=jnp.float32) + b3_ref[...]

        # log_softmax over lanes; padded class lanes carry a -1e30 bias -> exp == 0
        m = jnp.max(logits, axis=1, keepdims=True)
        lse = jnp.log(jnp.sum(jnp.exp(logits - m), axis=1, keepdims=True)) + m
        logp = logits - lse

        # In-kernel one-hot * (target > -1) validity mask (padded rows carry -1).
        tgt = tgt_ref[...]                                     # (tile_n, 1) int32
        cls_id = lax.broadcasted_iota(jnp.int32, (tile_n, c_pad), 1)
        oh = jnp.where((cls_id == tgt) & (tgt >= 0), 1.0, 0.0).astype(jnp.float32)

        # Vector accumulation: fold sublane groups with plain VPU adds; the single
        # reduce-to-scalar happens only in the finalize step.
        nll_acc[...] += ((-logp) * oh).reshape(tile_n // 8, 8, c_pad).sum(axis=0)
        cnt_acc[...] += oh.reshape(tile_n // 8, 8, c_pad).sum(axis=0)

        # ---- last tile: triplet loss from resident distances + combine ----
        @pl.when(i == pl.num_programs(0) - 1)
        def _finalize():
            dp = dist_scr[p_lo:p_lo + n_trip, :]       # positives' dist  [T, 1]
            dn = dist_scr[n_lo:n_lo + n_trip, :]       # negatives' dist  [T, 1]
            trip = jnp.mean(jnp.maximum(dp - dn + triplet_margin, 0.0))
            # mean-NLL over valid targets (NaN if none are valid, as in PyTorch)
            cls = jnp.sum(nll_acc[...]) / jnp.sum(cnt_acc[...])
            trip_ref[0] = trip
            cls_ref[0] = cls
            total_ref[0] = loss_margin * trip + (1.0 - loss_margin) * cls

    return kernel


# -----------------------------------------------------------------------------
# Host wrapper: padding / dtype prep + single fused pallas_call
# -----------------------------------------------------------------------------
def model_wrapper_loss(anchor, positives, negatives, target_class,
                       model_params, seg_params, loss_margin=0.5, n_classes=6):
    """Forward pass of ModelWrapperLoss (training branch) for one full minibatch.

    anchor: [1, d_in], positives: [P, d_in], negatives: [Q, d_in].
    target_class: [1+P+Q] int class ids in (anchor, positives, negatives) order;
                  entries == -1 are ignored by the segment loss.
    Returns (total_loss, info) with info['triplet_loss'] / info['class_loss'].
    """
    assert anchor.shape[0] == 1, "num_anchor must be 1 (as in the original module)"
    x = jnp.concatenate([anchor, positives, negatives], axis=0).astype(jnp.float32)
    n, d_in = x.shape
    n_pos, n_neg = positives.shape[0], negatives.shape[0]
    n_trip = min(n_pos, n_neg)
    assert n_trip >= 1, "need at least one positive and one negative"

    feat = FEAT
    c_pad = _round_up(max(n_classes, 1), LANE)
    h2_pad = H2_PAD

    # Row tiling: keep tiles >= 256 rows (full MXU height on v6e/v7x); a single
    # tile up to 1024 rows when the batch fits; 512-row tiles for large batches.
    n8 = _round_up(n, 8)
    if n8 <= 256:
        tile_n = 256
    elif n8 <= 1024:
        tile_n = n8
    else:
        tile_n = 512
    n_pad = _round_up(n8, tile_n)
    num_tiles = n_pad // tile_n

    # ---- host-side padding / dtype prep (tiny, done once) ----
    # Rows only; the feature dim stays at the true d_in (block last dim == array dim).
    x_p = jnp.pad(x, ((0, n_pad - n), (0, 0))).astype(jnp.bfloat16)
    tgt = jnp.pad(target_class.astype(jnp.int32), (0, n_pad - n),
                  constant_values=-1).reshape(n_pad, 1)

    wm = model_params["w"].astype(jnp.bfloat16)
    bm = model_params["b"].astype(jnp.float32)
    w1 = seg_params["w1"].astype(jnp.bfloat16)
    b1 = seg_params["b1"].astype(jnp.float32)
    w2 = jnp.pad(seg_params["w2"],
                 ((0, 0), (0, h2_pad - seg_params["w2"].shape[1]))).astype(jnp.bfloat16)
    b2 = jnp.pad(seg_params["b2"],
                 ((0, 0), (0, h2_pad - seg_params["b2"].shape[1]))).astype(jnp.float32)
    w3 = jnp.pad(seg_params["w3"],
                 ((0, h2_pad - seg_params["w3"].shape[0]),
                  (0, c_pad - n_classes))).astype(jnp.bfloat16)
    b3 = jnp.pad(seg_params["b3"], ((0, 0), (0, c_pad - n_classes)),
                 constant_values=-1e30).astype(jnp.float32)   # kill padded logits

    kernel = _make_fused_kernel(n_pos, n_trip, float(loss_margin))

    # Explicit scoped-VMEM budget: persistent scratch + double-buffered blocks +
    # weights + live intermediates, with headroom (default scoped limits are far
    # below physical VMEM on every generation).
    est = (n_pad * LANE * 4                                   # dist scratch (lane pad)
           + 8 * feat * 4 + 2 * 8 * c_pad * 4                 # anchor + accumulators
           + 2 * tile_n * _round_up(d_in, LANE) * 2           # x blocks (x2 buffers)
           + 2 * tile_n * LANE * 4                            # target blocks
           + 2 * (_round_up(d_in, 16) * feat + feat * feat
                  + feat * h2_pad + h2_pad * c_pad) * 2       # weights (x2 buffers)
           + 2 * 8 * (2 * feat + h2_pad + c_pad) * 4          # biases
           + tile_n * (2 * feat + h2_pad + c_pad) * 4)        # live intermediates
    vmem_bytes = int(max(32 << 20, min(2 * est + (8 << 20), 56 << 20)))

    total, trip, cls = pl.pallas_call(
        kernel,
        grid=(num_tiles,),
        in_specs=[
            pl.BlockSpec((tile_n, d_in), lambda i: (i, 0)),       # x (bf16, no pad)
            pl.BlockSpec((tile_n, 1), lambda i: (i, 0)),          # int32 targets
            pl.BlockSpec((d_in, feat), lambda i: (0, 0)),         # Wm
            pl.BlockSpec((1, feat), lambda i: (0, 0)),            # bm
            pl.BlockSpec((feat, feat), lambda i: (0, 0)),         # W1
            pl.BlockSpec((1, feat), lambda i: (0, 0)),            # b1
            pl.BlockSpec((feat, h2_pad), lambda i: (0, 0)),       # W2
            pl.BlockSpec((1, h2_pad), lambda i: (0, 0)),          # b2
            pl.BlockSpec((h2_pad, c_pad), lambda i: (0, 0)),      # W3
            pl.BlockSpec((1, c_pad), lambda i: (0, 0)),           # b3
        ],
        out_specs=(pl.BlockSpec(memory_space=pltpu.MemorySpace.SMEM),) * 3,
        out_shape=(jax.ShapeDtypeStruct((1,), jnp.float32),) * 3,
        scratch_shapes=[
            pltpu.VMEM((8, feat), jnp.float32),       # resident anchor descriptor
            pltpu.VMEM((n_pad, 1), jnp.float32),      # per-row distance to anchor
            pltpu.VMEM((8, c_pad), jnp.float32),      # NLL partial sums (vector)
            pltpu.VMEM((8, c_pad), jnp.float32),      # valid-target partial counts
        ],
        compiler_params=pltpu.CompilerParams(
            dimension_semantics=("arbitrary",),        # cross-tile scratch state
            vmem_limit_bytes=vmem_bytes),
    )(x_p, tgt, wm, bm, w1, b1, w2, b2, w3, b3)

    info = {"triplet_loss": trip[0], "class_loss": cls[0]}
    return total[0], info


# -----------------------------------------------------------------------------
# Deterministic parameter construction (PyTorch Linear-style init)
# -----------------------------------------------------------------------------
def init_params(key, d_in, feat_dim=256, n_classes=6):
    ks = jax.random.split(key, 8)

    def lin(kw, kb, fan_in, fan_out):
        scale = 1.0 / jnp.sqrt(jnp.float32(fan_in))
        w = jax.random.uniform(kw, (fan_in, fan_out), jnp.float32, -scale, scale)
        b = jax.random.uniform(kb, (1, fan_out), jnp.float32, -scale, scale)
        return w, b

    mw, mb = lin(ks[0], ks[1], d_in, feat_dim)       # synthesized backbone model
    w1, b1 = lin(ks[2], ks[3], feat_dim, 256)        # segment_loss classifier
    w2, b2 = lin(ks[4], ks[5], 256, 64)
    w3, b3 = lin(ks[6], ks[7], 64, n_classes)
    model_params = {"w": mw, "b": mb}
    seg_params = {"w1": w1, "b1": b1, "w2": w2, "b2": b2, "w3": w3, "b3": b3}
    return model_params, seg_params


if __name__ == "__main__":
    key = jax.random.PRNGKey(0)
    k_param, k_a, k_p, k_n = jax.random.split(key, 4)

    d_in, n_classes = 32, 6
    model_params, seg_params = init_params(k_param, d_in, feat_dim=256,
                                           n_classes=n_classes)

    # One minibatch in the original's pclt = cat(anchor, positive, neg) layout:
    # 1 anchor, 2 positives, 3 negatives  -> N = 6 rows, d_in = 32 features.
    anchor = jax.random.normal(k_a, (1, d_in), jnp.float32)
    positives = jax.random.normal(k_p, (2, d_in), jnp.float32)
    negatives = jax.random.normal(k_n, (3, d_in), jnp.float32)
    # Per-row class ids (row_labels) in the same a/p/n order; one -1 entry
    # exercises the target > -1 masking of segment_loss.
    target_class = jnp.array([0, 1, -1, 2, 3, 4], dtype=jnp.int32)

    total_loss, info = model_wrapper_loss(
        anchor, positives, negatives, target_class,
        model_params, seg_params, loss_margin=0.5, n_classes=n_classes)

    jax.block_until_ready(total_loss)
    jax.block_until_ready(info["class_loss"])
    jax.block_until_ready(info["triplet_loss"])
    print("KERNEL_OK")
</pallas_src>

<mosaic_0001>
module attributes {stable_mosaic.version = 11 : i64} {
  func.func @kernel(%arg0: i32, %arg1: memref<256x32xbf16, #tpu.memory_space<vmem>>, %arg2: memref<256x1xi32, #tpu.memory_space<vmem>>, %arg3: memref<32x256xbf16, #tpu.memory_space<vmem>>, %arg4: memref<1x256xf32, #tpu.memory_space<vmem>>, %arg5: memref<256x256xbf16, #tpu.memory_space<vmem>>, %arg6: memref<1x256xf32, #tpu.memory_space<vmem>>, %arg7: memref<256x128xbf16, #tpu.memory_space<vmem>>, %arg8: memref<1x128xf32, #tpu.memory_space<vmem>>, %arg9: memref<128x128xbf16, #tpu.memory_space<vmem>>, %arg10: memref<1x128xf32, #tpu.memory_space<vmem>>, %arg11: memref<1xf32, #tpu.memory_space<smem>>, %arg12: memref<1xf32, #tpu.memory_space<smem>>, %arg13: memref<1xf32, #tpu.memory_space<smem>>, %arg14: memref<8x256xf32, #tpu.memory_space<vmem>>, %arg15: memref<256x1xf32, #tpu.memory_space<vmem>>, %arg16: memref<8x128xf32, #tpu.memory_space<vmem>>, %arg17: memref<8x128xf32, #tpu.memory_space<vmem>>) attributes {dimension_semantics = [#tpu.dimension_semantics<arbitrary>], iteration_bounds = array<i64: 1>, scalar_prefetch = 0 : i64, scratch_operands = 4 : i64, tpu.core_type = #tpu.core_type<tc>, window_params = [{transform_indices = @transform_0, window_bounds = array<i64: 256, 32>}, {transform_indices = @transform_1, window_bounds = array<i64: 256, 1>}, {pipeline_mode = #tpu.pipeline_mode<synchronous>, transform_indices = @transform_2, window_bounds = array<i64: 32, 256>}, {pipeline_mode = #tpu.pipeline_mode<synchronous>, transform_indices = @transform_3, window_bounds = array<i64: 1, 256>}, {pipeline_mode = #tpu.pipeline_mode<synchronous>, transform_indices = @transform_4, window_bounds = array<i64: 256, 256>}, {pipeline_mode = #tpu.pipeline_mode<synchronous>, transform_indices = @transform_5, window_bounds = array<i64: 1, 256>}, {pipeline_mode = #tpu.pipeline_mode<synchronous>, transform_indices = @transform_6, window_bounds = array<i64: 256, 128>}, {pipeline_mode = #tpu.pipeline_mode<synchronous>, transform_indices = @transform_7, window_bounds = array<i64: 1, 128>}, {pipeline_mode = #tpu.pipeline_mode<synchronous>, transform_indices = @transform_8, window_bounds = array<i64: 128, 128>}, {pipeline_mode = #tpu.pipeline_mode<synchronous>, transform_indices = @transform_9, window_bounds = array<i64: 1, 128>}, {transform_indices = @transform_10, window_bounds = array<i64: 1>}, {transform_indices = @transform_11, window_bounds = array<i64: 1>}, {transform_indices = @transform_12, window_bounds = array<i64: 1>}]} {
    %c0 = arith.constant 0 : index
    %c0_0 = arith.constant 0 : index
    %0 = vector.load %arg1[%c0, %c0_0] : memref<256x32xbf16, #tpu.memory_space<vmem>>, vector<256x32xbf16>
    %c0_1 = arith.constant 0 : index
    %c0_2 = arith.constant 0 : index
    %1 = vector.load %arg3[%c0_1, %c0_2] : memref<32x256xbf16, #tpu.memory_space<vmem>>, vector<32x256xbf16>
    %cst = arith.constant dense<0.000000e+00> : vector<256x256xf32>
    %2 = tpu.matmul %0, %1, %cst {dimension_numbers = #tpu.dot_dimension_numbers<[1], [0], [0], [1], [0, 0, 1, 1], [], []>} : vector<256x32xbf16>, vector<32x256xbf16>, vector<256x256xf32> -> vector<256x256xf32>
    %c0_3 = arith.constant 0 : index
    %c0_4 = arith.constant 0 : index
    %3 = vector.load %arg4[%c0_3, %c0_4] : memref<1x256xf32, #tpu.memory_space<vmem>>, vector<1x256xf32>
    %4 = vector.broadcast %3 : vector<1x256xf32> to vector<256x256xf32>
    %5 = arith.addf %2, %4 : vector<256x256xf32>
    %c0_i32 = arith.constant 0 : i32
    %6 = arith.cmpi eq, %arg0, %c0_i32 : i32
    %7 = arith.extui %6 : i1 to i32
    %c0_i32_5 = arith.constant 0 : i32
    %8 = arith.cmpi ne, %7, %c0_i32_5 : i32
    scf.if %8 {
      %cst_48 = arith.constant 0.000000e+00 : f32
      %82 = vector.broadcast %cst_48 : f32 to vector<8x128xf32>
      %c0_49 = arith.constant 0 : index
      %c0_50 = arith.constant 0 : index
      %83 = vector.load %arg16[%c0_49, %c0_50] : memref<8x128xf32, #tpu.memory_space<vmem>>, vector<8x128xf32>
      tpu.vector_store %arg16[%c0_49, %c0_50], %82 {strides = array<i32>} : memref<8x128xf32, #tpu.memory_space<vmem>>, vector<8x128xf32>,
      %cst_51 = arith.constant 0.000000e+00 : f32
      %84 = vector.broadcast %cst_51 : f32 to vector<8x128xf32>
      %c0_52 = arith.constant 0 : index
      %c0_53 = arith.constant 0 : index
      %85 = vector.load %arg17[%c0_52, %c0_53] : memref<8x128xf32, #tpu.memory_space<vmem>>, vector<8x128xf32>
      tpu.vector_store %arg17[%c0_52, %c0_53], %84 {strides = array<i32>} : memref<8x128xf32, #tpu.memory_space<vmem>>, vector<8x128xf32>,
      %86 = vector.extract_strided_slice %5 {offsets = [0, 0], sizes = [1, 256], strides = [1, 1]} : vector<256x256xf32> to vector<1x256xf32>
      %87 = vector.shape_cast %86 : vector<1x256xf32> to vector<1x256xf32>
      %88 = vector.broadcast %87 : vector<1x256xf32> to vector<8x256xf32>
      %c0_54 = arith.constant 0 : index
      %c0_55 = arith.constant 0 : index
      %89 = vector.load %arg14[%c0_54, %c0_55] : memref<8x256xf32, #tpu.memory_space<vmem>>, vector<8x256xf32>
      tpu.vector_store %arg14[%c0_54, %c0_55], %88 {strides = array<i32>} : memref<8x256xf32, #tpu.memory_space<vmem>>, vector<8x256xf32>,
    } else {
    }
    %c0_6 = arith.constant 0 : index
    %c0_7 = arith.constant 0 : index
    %9 = vector.load %arg14[%c0_6, %c0_7] : memref<8x256xf32, #tpu.memory_space<vmem>>, vector<1x256xf32>
    %10 = vector.broadcast %9 : vector<1x256xf32> to vector<256x256xf32>
    %11 = arith.subf %5, %10 : vector<256x256xf32>
    %12 = arith.mulf %11, %11 : vector<256x256xf32>
    %cst_8 = arith.constant dense<0.000000e+00> : vector<256xf32>
    %13 = vector.multi_reduction <add>, %12, %cst_8 [1] : vector<256x256xf32> to vector<256xf32>
    %14 = vector.shape_cast %13 : vector<256xf32> to vector<256x1xf32>
    %cst_9 = arith.constant 9.99999996E-13 : f32
    %15 = vector.broadcast %cst_9 : f32 to vector<256x1xf32>
    %16 = arith.addf %14, %15 : vector<256x1xf32>
    %17 = math.sqrt %16 : vector<256x1xf32>
    %c256_i32 = arith.constant 256 : i32
    %18 = arith.muli %arg0, %c256_i32 : i32
    %19 = tpu.assume_multiple %18, 256 : i32
    %20 = arith.index_cast %19 : i32 to index
    %c0_10 = arith.constant 0 : index
    %21 = vector.load %arg15[%20, %c0_10] : memref<256x1xf32, #tpu.memory_space<vmem>>, vector<256x1xf32>
    tpu.vector_store %arg15[%20, %c0_10], %17 {strides = array<i32>} : memref<256x1xf32, #tpu.memory_space<vmem>>, vector<256x1xf32>,
    %22 = arith.truncf %5 : vector<256x256xf32> to vector<256x256xbf16>
    %c0_11 = arith.constant 0 : index
    %c0_12 = arith.constant 0 : index
    %23 = vector.load %arg5[%c0_11, %c0_12] : memref<256x256xbf16, #tpu.memory_space<vmem>>, vector<256x256xbf16>
    %cst_13 = arith.constant dense<0.000000e+00> : vector<256x256xf32>
    %24 = tpu.matmul %22, %23, %cst_13 {dimension_numbers = #tpu.dot_dimension_numbers<[1], [0], [0], [1], [0, 0, 1, 1], [], []>} : vector<256x256xbf16>, vector<256x256xbf16>, vector<256x256xf32> -> vector<256x256xf32>
    %c0_14 = arith.constant 0 : index
    %c0_15 = arith.constant 0 : index
    %25 = vector.load %arg6[%c0_14, %c0_15] : memref<1x256xf32, #tpu.memory_space<vmem>>, vector<1x256xf32>
    %26 = vector.broadcast %25 : vector<1x256xf32> to vector<256x256xf32>
    %27 = arith.addf %24, %26 : vector<256x256xf32>
    %cst_16 = arith.constant 0.000000e+00 : f32
    %28 = vector.broadcast %cst_16 : f32 to vector<256x256xf32>
    %29 = arith.maximumf %27, %28 : vector<256x256xf32>
    %30 = arith.truncf %29 : vector<256x256xf32> to vector<256x256xbf16>
    %c0_17 = arith.constant 0 : index
    %c0_18 = arith.constant 0 : index
    %31 = vector.load %arg7[%c0_17, %c0_18] : memref<256x128xbf16, #tpu.memory_space<vmem>>, vector<256x128xbf16>
    %cst_19 = arith.constant dense<0.000000e+00> : vector<256x128xf32>
    %32 = tpu.matmul %30, %31, %cst_19 {dimension_numbers = #tpu.dot_dimension_numbers<[1], [0], [0], [1], [0, 0, 1, 1], [], []>} : vector<256x256xbf16>, vector<256x128xbf16>, vector<256x128xf32> -> vector<256x128xf32>
    %c0_20 = arith.constant 0 : index
    %c0_21 = arith.constant 0 : index
    %33 = vector.load %arg8[%c0_20, %c0_21] : memref<1x128xf32, #tpu.memory_space<vmem>>, vector<1x128xf32>
    %34 = vector.broadcast %33 : vector<1x128xf32> to vector<256x128xf32>
    %35 = arith.addf %32, %34 : vector<256x128xf32>
    %cst_22 = arith.constant 0.000000e+00 : f32
    %36 = vector.broadcast %cst_22 : f32 to vector<256x128xf32>
    %37 = arith.maximumf %35, %36 : vector<256x128xf32>
    %38 = arith.truncf %37 : vector<256x128xf32> to vector<256x128xbf16>
    %c0_23 = arith.constant 0 : index
    %c0_24 = arith.constant 0 : index
    %39 = vector.load %arg9[%c0_23, %c0_24] : memref<128x128xbf16, #tpu.memory_space<vmem>>, vector<128x128xbf16>
    %cst_25 = arith.constant dense<0.000000e+00> : vector<256x128xf32>
    %40 = tpu.matmul %38, %39, %cst_25 {dimension_numbers = #tpu.dot_dimension_numbers<[1], [0], [0], [1], [0, 0, 1, 1], [], []>} : vector<256x128xbf16>, vector<128x128xbf16>, vector<256x128xf32> -> vector<256x128xf32>
    %c0_26 = arith.constant 0 : index
    %c0_27 = arith.constant 0 : index
    %41 = vector.load %arg10[%c0_26, %c0_27] : memref<1x128xf32, #tpu.memory_space<vmem>>, vector<1x128xf32>
    %42 = vector.broadcast %41 : vector<1x128xf32> to vector<256x128xf32>
    %43 = arith.addf %40, %42 : vector<256x128xf32>
    %cst_28 = arith.constant dense<0xFF800000> : vector<256xf32>
    %44 = vector.multi_reduction <maximumf>, %43, %cst_28 [1] : vector<256x128xf32> to vector<256xf32>
    %45 = vector.shape_cast %44 : vector<256xf32> to vector<256x1xf32>
    %46 = vector.broadcast %45 : vector<256x1xf32> to vector<256x128xf32>
    %47 = arith.subf %43, %46 : vector<256x128xf32>
    %48 = math.exp %47 : vector<256x128xf32>
    %cst_29 = arith.constant dense<0.000000e+00> : vector<256xf32>
    %49 = vector.multi_reduction <add>, %48, %cst_29 [1] : vector<256x128xf32> to vector<256xf32>
    %50 = vector.shape_cast %49 : vector<256xf32> to vector<256x1xf32>
    %51 = math.log %50 : vector<256x1xf32>
    %52 = arith.addf %51, %45 : vector<256x1xf32>
    %53 = vector.broadcast %52 : vector<256x1xf32> to vector<256x128xf32>
    %54 = arith.subf %43, %53 : vector<256x128xf32>
    %c0_30 = arith.constant 0 : index
    %c0_31 = arith.constant 0 : index
    %55 = vector.load %arg2[%c0_30, %c0_31] : memref<256x1xi32, #tpu.memory_space<vmem>>, vector<256x1xi32>
    %56 = tpu.iota {dimensions = array<i32: 1>} : vector<256x128xi32>
    %57 = vector.broadcast %55 : vector<256x1xi32> to vector<256x128xi32>
    %58 = arith.cmpi eq, %56, %57 : vector<256x128xi32>
    %c0_i32_32 = arith.constant 0 : i32
    %59 = vector.broadcast %c0_i32_32 : i32 to vector<256x1xi32>
    %60 = arith.cmpi sge, %55, %59 : vector<256x1xi32>
    %61 = vector.broadcast %60 : vector<256x1xi1> to vector<256x128xi1>
    %62 = arith.andi %58, %61 : vector<256x128xi1>
    %cst_33 = arith.constant 1.000000e+00 : f32
    %cst_34 = arith.constant 0.000000e+00 : f32
    %63 = vector.broadcast %cst_33 : f32 to vector<256x128xf32>
    %64 = vector.broadcast %cst_34 : f32 to vector<256x128xf32>
    %65 = arith.select %62, %63, %64 : vector<256x128xi1>, vector<256x128xf32>
    %c0_35 = arith.constant 0 : index
    %c0_36 = arith.constant 0 : index
    %66 = vector.load %arg16[%c0_35, %c0_36] : memref<8x128xf32, #tpu.memory_space<vmem>>, vector<8x128xf32>
    %cst_37 = arith.constant 0.000000e+00 : f32
    %67 = vector.broadcast %cst_37 : f32 to vector<256x128xf32>
    %68 = arith.subf %67, %54 : vector<256x128xf32>
    %69 = arith.mulf %68, %65 : vector<256x128xf32>
    %70 = vector.shape_cast %69 : vector<256x128xf32> to vector<32x8x128xf32>
    %cst_38 = arith.constant dense<0.000000e+00> : vector<8x128xf32>
    %71 = vector.multi_reduction <add>, %70, %cst_38 [0] : vector<32x8x128xf32> to vector<8x128xf32>
    %72 = arith.addf %66, %71 : vector<8x128xf32>
    %c0_39 = arith.constant 0 : index
    %c0_40 = arith.constant 0 : index
    %73 = vector.load %arg16[%c0_39, %c0_40] : memref<8x128xf32, #tpu.memory_space<vmem>>, vector<8x128xf32>
    tpu.vector_store %arg16[%c0_39, %c0_40], %72 {strides = array<i32>} : memref<8x128xf32, #tpu.memory_space<vmem>>, vector<8x128xf32>,
    %c0_41 = arith.constant 0 : index
    %c0_42 = arith.constant 0 : index
    %74 = vector.load %arg17[%c0_41, %c0_42] : memref<8x128xf32, #tpu.memory_space<vmem>>, vector<8x128xf32>
    %75 = vector.shape_cast %65 : vector<256x128xf32> to vector<32x8x128xf32>
    %cst_43 = arith.constant dense<0.000000e+00> : vector<8x128xf32>
    %76 = vector.multi_reduction <add>, %75, %cst_43 [0] : vector<32x8x128xf32> to vector<8x128xf32>
    %77 = arith.addf %74, %76 : vector<8x128xf32>
    %c0_44 = arith.constant 0 : index
    %c0_45 = arith.constant 0 : index
    %78 = vector.load %arg17[%c0_44, %c0_45] : memref<8x128xf32, #tpu.memory_space<vmem>>, vector<8x128xf32>
    tpu.vector_store %arg17[%c0_44, %c0_45], %77 {strides = array<i32>} : memref<8x128xf32, #tpu.memory_space<vmem>>, vector<8x128xf32>,
    %c0_i32_46 = arith.constant 0 : i32
    %79 = arith.cmpi eq, %arg0, %c0_i32_46 : i32
    %80 = arith.extui %79 : i1 to i32
    %c0_i32_47 = arith.constant 0 : i32
    %81 = arith.cmpi ne, %80, %c0_i32_47 : i32
    scf.if %81 {
      %c1 = arith.constant 1 : index
      %c0_48 = arith.constant 0 : index
      %82 = vector.load %arg15[%c1, %c0_48] : memref<256x1xf32, #tpu.memory_space<vmem>>, vector<2x1xf32>
      %c3 = arith.constant 3 : index
      %c0_49 = arith.constant 0 : index
      %83 = vector.load %arg15[%c3, %c0_49] : memref<256x1xf32, #tpu.memory_space<vmem>>, vector<2x1xf32>
      %84 = arith.subf %82, %83 : vector<2x1xf32>
      %cst_50 = arith.constant 5.000000e-01 : f32
      %85 = vector.broadcast %cst_50 : f32 to vector<2x1xf32>
      %86 = arith.addf %84, %85 : vector<2x1xf32>
      %cst_51 = arith.constant 0.000000e+00 : f32
      %87 = vector.broadcast %cst_51 : f32 to vector<2x1xf32>
      %88 = arith.maximumf %86, %87 : vector<2x1xf32>
      %89 = vector.shape_cast %88 : vector<2x1xf32> to vector<1x2x1xf32>
      %cst_52 = arith.constant dense<0.000000e+00> : vector<1xf32>
      %90 = vector.multi_reduction <add>, %89, %cst_52 [1, 2] : vector<1x2x1xf32> to vector<1xf32>
      %91 = vector.shape_cast %90 : vector<1xf32> to vector<1x1x1xf32>
      %92 = vector.extract %91[0, 0, 0] : f32 from vector<1x1x1xf32>
      %cst_53 = arith.constant 2.000000e+00 : f32
      %93 = arith.divf %92, %cst_53 : f32
      %c0_54 = arith.constant 0 : index
      %c0_55 = arith.constant 0 : index
      %94 = vector.load %arg16[%c0_54, %c0_55] : memref<8x128xf32, #tpu.memory_space<vmem>>, vector<8x128xf32>
      %95 = vector.shape_cast %94 : vector<8x128xf32> to vector<1x8x128xf32>
      %cst_56 = arith.constant dense<0.000000e+00> : vector<1xf32>
      %96 = vector.multi_reduction <add>, %95, %cst_56 [1, 2] : vector<1x8x128xf32> to vector<1xf32>
      %97 = vector.shape_cast %96 : vector<1xf32> to vector<1x1x1xf32>
      %98 = vector.extract %97[0, 0, 0] : f32 from vector<1x1x1xf32>
      %c0_57 = arith.constant 0 : index
      %c0_58 = arith.constant 0 : index
      %99 = vector.load %arg17[%c0_57, %c0_58] : memref<8x128xf32, #tpu.memory_space<vmem>>, vector<8x128xf32>
      %100 = vector.shape_cast %99 : vector<8x128xf32> to vector<1x8x128xf32>
      %cst_59 = arith.constant dense<0.000000e+00> : vector<1xf32>
      %101 = vector.multi_reduction <add>, %100, %cst_59 [1, 2] : vector<1x8x128xf32> to vector<1xf32>
      %102 = vector.shape_cast %101 : vector<1xf32> to vector<1x1x1xf32>
      %103 = vector.extract %102[0, 0, 0] : f32 from vector<1x1x1xf32>
      %104 = arith.divf %98, %103 : f32
      %c0_60 = arith.constant 0 : index
      %105 = memref.load %arg12[%c0_60] : memref<1xf32, #tpu.memory_space<smem>>
      memref.store %93, %arg12[%c0_60] : memref<1xf32, #tpu.memory_space<smem>>
      %c0_61 = arith.constant 0 : index
      %106 = memref.load %arg13[%c0_61] : memref<1xf32, #tpu.memory_space<smem>>
      memref.store %104, %arg13[%c0_61] : memref<1xf32, #tpu.memory_space<smem>>
      %cst_62 = arith.constant 5.000000e-01 : f32
      %107 = arith.mulf %cst_62, %93 : f32
      %cst_63 = arith.constant 5.000000e-01 : f32
      %108 = arith.mulf %cst_63, %104 : f32
      %109 = arith.addf %107, %108 : f32
      %c0_64 = arith.constant 0 : index
      %110 = memref.load %arg11[%c0_64] : memref<1xf32, #tpu.memory_space<smem>>
      memref.store %109, %arg11[%c0_64] : memref<1xf32, #tpu.memory_space<smem>>
    } else {
    }
    return
  }
  func.func @transform_0(%arg0: i32) -> (i32, i32) {
    %c0_i32 = arith.constant 0 : i32
    %c0_i32_0 = arith.constant 0 : i32
    return %arg0, %c0_i32 : i32, i32
  }
  func.func @transform_1(%arg0: i32) -> (i32, i32) {
    %c0_i32 = arith.constant 0 : i32
    %c0_i32_0 = arith.constant 0 : i32
    return %arg0, %c0_i32 : i32, i32
  }
  func.func @transform_2(%arg0: i32) -> (i32, i32) {
    %c0_i32 = arith.constant 0 : i32
    %c0_i32_0 = arith.constant 0 : i32
    %c0_i32_1 = arith.constant 0 : i32
    return %c0_i32, %c0_i32_0 : i32, i32
  }
  func.func @transform_3(%arg0: i32) -> (i32, i32) {
    %c0_i32 = arith.constant 0 : i32
    %c0_i32_0 = arith.constant 0 : i32
    %c0_i32_1 = arith.constant 0 : i32
    return %c0_i32, %c0_i32_0 : i32, i32
  }
  func.func @transform_4(%arg0: i32) -> (i32, i32) {
    %c0_i32 = arith.constant 0 : i32
    %c0_i32_0 = arith.constant 0 : i32
    %c0_i32_1 = arith.constant 0 : i32
    return %c0_i32, %c0_i32_0 : i32, i32
  }
  func.func @transform_5(%arg0: i32) -> (i32, i32) {
    %c0_i32 = arith.constant 0 : i32
    %c0_i32_0 = arith.constant 0 : i32
    %c0_i32_1 = arith.constant 0 : i32
    return %c0_i32, %c0_i32_0 : i32, i32
  }
  func.func @transform_6(%arg0: i32) -> (i32, i32) {
    %c0_i32 = arith.constant 0 : i32
    %c0_i32_0 = arith.constant 0 : i32
    %c0_i32_1 = arith.constant 0 : i32
    return %c0_i32, %c0_i32_0 : i32, i32
  }
  func.func @transform_7(%arg0: i32) -> (i32, i32) {
    %c0_i32 = arith.constant 0 : i32
    %c0_i32_0 = arith.constant 0 : i32
    %c0_i32_1 = arith.constant 0 : i32
    return %c0_i32, %c0_i32_0 : i32, i32
  }
  func.func @transform_8(%arg0: i32) -> (i32, i32) {
    %c0_i32 = arith.constant 0 : i32
    %c0_i32_0 = arith.constant 0 : i32
    %c0_i32_1 = arith.constant 0 : i32
    return %c0_i32, %c0_i32_0 : i32, i32
  }
  func.func @transform_9(%arg0: i32) -> (i32, i32) {
    %c0_i32 = arith.constant 0 : i32
    %c0_i32_0 = arith.constant 0 : i32
    %c0_i32_1 = arith.constant 0 : i32
    return %c0_i32, %c0_i32_0 : i32, i32
  }
  func.func @transform_10(%arg0: i32) -> i32 {
    %c0_i32 = arith.constant 0 : i32
    %c0_i32_0 = arith.constant 0 : i32
    return %c0_i32 : i32
  }
  func.func @transform_11(%arg0: i32) -> i32 {
    %c0_i32 = arith.constant 0 : i32
    %c0_i32_0 = arith.constant 0 : i32
    return %c0_i32 : i32
  }
  func.func @transform_12(%arg0: i32) -> i32 {
    %c0_i32 = arith.constant 0 : i32
    %c0_i32_0 = arith.constant 0 : i32
    return %c0_i32 : i32
  }
}

</mosaic_0001>

<bundles_post_ra>
// kernel: tpu_custom_call.1
= control target key start
LH: loop header
LB: loop body
LE: loop exit
PB: predicated region body
PF: predicated region fallthrough
CT: control target
= control target key end

     0   :  { %18 = vsyncpa [#allocation7], 0  ;;  %s5458_s0 = inlined_call_operand.vmem [shape: bf16[256,32], index: 0, kind: input, shape index: {}]   ;;  %s5459_s1 = inlined_call_operand.vmem [shape: s32[256,1], index: 1, kind: input, shape index: {}]   ;;  %s5460_s2 = inlined_call_operand.hbm [shape: bf16[32,256], index: 2, kind: input, shape index: {}]   ;;  %s5461_s3 = inlined_call_operand.hbm [shape: f32[1,256], index: 3, kind: input, shape index: {}]   ;;  %s5462_s4 = inlined_call_operand.vmem [shape: bf16[256,256], index: 4, kind: input, shape index: {}]   ;;  %s5463_s5 = inlined_call_operand.hbm [shape: f32[1,256], index: 5, kind: input, shape index: {}]   ;;  %s5464_s6 = inlined_call_operand.vmem [shape: bf16[256,128], index: 6, kind: input, shape index: {}]   ;;  %s5465_s7 = inlined_call_operand.hbm [shape: f32[1,128], index: 7, kind: input, shape index: {}]   ;;  %s5466_s8 = inlined_call_operand.vmem [shape: bf16[128,128], index: 8, kind: input, shape index: {}]   ;;  %s5467_s9 = inlined_call_operand.hbm [shape: f32[1,128], index: 9, kind: input, shape index: {}]   ;;  %s5468_s10 = inlined_call_operand.hbm [shape: f32[1], index: 10, kind: output, shape index: {0}]   ;;  %s5469_s11 = inlined_call_operand.hbm [shape: f32[1], index: 11, kind: output, shape index: {1}]   ;;  %s5470_s12 = inlined_call_operand.hbm [shape: f32[1], index: 12, kind: output, shape index: {2}]  }
   0x1   :  { %19 = vsyncpa [#allocation10], 0 }
   0x2   :  { %20 = vsyncpa [#allocation13], 0 }
   0x3   :  { %21 = vsyncpa [#allocation8], 0 }
   0x4   :  { %22 = vsyncpa [#allocation17], 0  ;;  %s3876_s21 = smov [#allocation9]   ;;  %s3877_s23 = smov [#allocation12]  }
   0x5   :  { %s45_s22 = sshll.u32 %s3876_s21, 4  ;;  %s69_s24 = sshll.u32 %s3877_s23, 4  ;;  %s46_s22 = int_to_ptr.vmem [resolvable:$true] %s45_s22  ;;  %s70_s24 = int_to_ptr.vmem [resolvable:$true] %s69_s24 }
   0x6   :  { %s3726_s27 = scalar_lea.hbm %s5461_s3, 32 }
   0x7   :  { %p3727_p0 = scmp.ne.s32.totalorder %s5461_s3, %s3726_s27  ;;  %p3730_p1 = scmp.lt.u32.totalorder %s3726_s27, %s5461_s3 }
   0x9   :  { %p3732_p2 = pnand %p3730_p1, %p3727_p0 }
   0xb   :  { %3735 = shalt.err (!%p3732_p2)
}
   0xc   :  { %s3736_s14 = scalar_lea.vmem %s46_s22, 32  ;;  %p3741_p4 = scmp.lt.s32.totalorder %s46_s22, %s46_s22 }
   0xd   :  { %p3737_p3 = scmp.ne.s32.totalorder %s46_s22, %s3736_s14  ;;  %p3742_p5 = scmp.lt.s32.totalorder %s3736_s14, %s3736_s14 }
   0xf   :  { %p3743_p6 = por %p3742_p5, %p3741_p4 }
  0x11   :  { %p3744_p7 = pnand %p3743_p6, %p3737_p3 }
  0x13   :  { %3747 = shalt.err (!%p3744_p7)
}
  0x14   :  { %48 = dma.hbm_to_vmem [thread:$0]  %s5461_s3, 32, %s46_s22, [#allocation10]  }
  0x15   :  { %s3748_s19 = scalar_lea.hbm %s5465_s7, 16 }
  0x16   :  { %p3749_p8 = scmp.ne.s32.totalorder %s5465_s7, %s3748_s19  ;;  %p3752_p9 = scmp.lt.u32.totalorder %s3748_s19, %s5465_s7 }
  0x18   :  { %p3754_p10 = pnand %p3752_p9, %p3749_p8 }
  0x1a   :  { %3757 = shalt.err (!%p3754_p10)
}
  0x1b   :  { %s3758_s26 = scalar_lea.vmem %s70_s24, 16  ;;  %s3762_s27 = scalar_lea.vmem %s70_s24, 32 }
  0x1c   :  { %p3759_p11 = scmp.ne.s32.totalorder %s70_s24, %s3758_s26  ;;  %p3763_p12 = scmp.lt.s32.totalorder %s70_s24, %s70_s24 }
  0x1d   :  { %p3764_p13 = scmp.lt.s32.totalorder %s3762_s27, %s3758_s26 }
  0x1f   :  { %p3765_p0 = por %p3764_p13, %p3763_p12 }
  0x21   :  { %p3766_p1 = pnand %p3765_p0, %p3759_p11 }
  0x23   :  { %3769 = shalt.err (!%p3766_p1)
}
  0x24   :  { %72 = dma.hbm_to_vmem [thread:$0]  %s5465_s7, 16, %s70_s24, [#allocation13]  }
  0x25   :  { %s3878_s28 = smov [#allocation6]   ;;  %s3770_s14 = scalar_lea.hbm %s5460_s2, 512 }
  0x26   :  { %s32_s29 = sshll.u32 %s3878_s28, 4  ;;  %p3771_p2 = scmp.ne.s32.totalorder %s5460_s2, %s3770_s14  ;;  %s33_s29 = int_to_ptr.vmem [resolvable:$true] %s32_s29 }
  0x27   :  { %p3774_p3 = scmp.lt.u32.totalorder %s3770_s14, %s5460_s2 }
  0x29   :  { %p3776_p4 = pnand %p3774_p3, %p3771_p2 }
  0x2b   :  { %3779 = shalt.err (!%p3776_p4)
}
  0x2c   :  { %s3780_s19 = scalar_lea.vmem %s33_s29, 512  ;;  %p3785_p6 = scmp.lt.s32.totalorder %s33_s29, %s33_s29 }
  0x2d   :  { %p3781_p5 = scmp.ne.s32.totalorder %s33_s29, %s3780_s19  ;;  %p3786_p7 = scmp.lt.s32.totalorder %s3780_s19, %s3780_s19 }
  0x2f   :  { %p3787_p8 = por %p3786_p7, %p3785_p6 }
  0x31   :  { %p3788_p9 = pnand %p3787_p8, %p3781_p5 }
  0x33   :  { %3791 = shalt.err (!%p3788_p9)
}
  0x34   :  { %s3879_s7 = smov 128   ;;  %s3880_s24 = smov 8  }
  0x35   :  { %38 = dma.hbm_to_vmem [thread:$0]  %s5460_s2, 512, %s33_s29, [#allocation7], %s3879_s7, %s3879_s7, %s3880_s24  }
  0x36   :  { %s3881_s23 = smov [#allocation11]   ;;  %s3882_s26 = smov [#allocation14]  }
  0x37   :  { %s57_s25 = sshll.u32 %s3881_s23, 4  ;;  %s81_s27 = sshll.u32 %s3882_s26, 4  ;;  %s58_s25 = int_to_ptr.vmem [resolvable:$true] %s57_s25  ;;  %s82_s27 = int_to_ptr.vmem [resolvable:$true] %s81_s27 }
  0x38   :  { %s3792_s28 = scalar_lea.hbm %s5463_s5, 32 }
  0x39   :  { %p3793_p10 = scmp.ne.s32.totalorder %s5463_s5, %s3792_s28  ;;  %p3796_p11 = scmp.lt.u32.totalorder %s3792_s28, %s5463_s5 }
  0x3b   :  { %p3798_p12 = pnand %p3796_p11, %p3793_p10 }
  0x3d   :  { %3801 = shalt.err (!%p3798_p12)
}
  0x3e   :  { %s3802_s2 = scalar_lea.vmem %s58_s25, 32  ;;  %p3807_p0 = scmp.lt.s32.totalorder %s58_s25, %s58_s25 }
  0x3f   :  { %p3803_p13 = scmp.ne.s32.totalorder %s58_s25, %s3802_s2  ;;  %p3808_p1 = scmp.lt.s32.totalorder %s3802_s2, %s3802_s2 }
  0x41   :  { %p3809_p2 = por %p3808_p1, %p3807_p0 }
  0x43   :  { %p3810_p3 = pnand %p3809_p2, %p3803_p13 }
  0x45   :  { %3813 = shalt.err (!%p3810_p3)
}
  0x46   :  { %60 = dma.hbm_to_vmem [thread:$0]  %s5463_s5, 32, %s58_s25, [#allocation10]  }
  0x47   :  { %s3814_s19 = scalar_lea.hbm %s5467_s9, 16 }
  0x48   :  { %p3815_p4 = scmp.ne.s32.totalorder %s5467_s9, %s3814_s19  ;;  %p3818_p5 = scmp.lt.u32.totalorder %s3814_s19, %s5467_s9 }
  0x4a   :  { %p3820_p6 = pnand %p3818_p5, %p3815_p4 }
  0x4c   :  { %3823 = shalt.err (!%p3820_p6)
}
  0x4d   :  { %s3824_s23 = scalar_lea.vmem %s82_s27, 16  ;;  %s3828_s26 = scalar_lea.vmem %s82_s27, 32 }
  0x4e   :  { %p3825_p7 = scmp.ne.s32.totalorder %s82_s27, %s3824_s23  ;;  %p3829_p8 = scmp.lt.s32.totalorder %s82_s27, %s82_s27 }
  0x4f   :  { %p3830_p9 = scmp.lt.s32.totalorder %s3828_s26, %s3824_s23 }
  0x51   :  { %p3831_p10 = por %p3830_p9, %p3829_p8 }
  0x53   :  { %p3832_p11 = pnand %p3831_p10, %p3825_p7 }
  0x55   :  { %3835 = shalt.err (!%p3832_p11)
}
  0x56   :  { %84 = dma.hbm_to_vmem [thread:$0]  %s5467_s9, 16, %s82_s27, [#allocation13]  }
  0x57   :  { %3866 = dma.done.wait [#allocation7], 512  }
  0x58   :  { %3867 = vsyncadd [#allocation7], 4294966784 }
  0x59   :  { %3868 = dma.done.wait [#allocation10], 64  }
  0x5a   :  { %3869 = vsyncadd [#allocation10], 4294967232 }
  0x5b   :  { %3870 = dma.done.wait [#allocation13], 32  }
  0x5c   :  { %3871 = vsyncadd [#allocation13], 4294967264  ;;  %v5472_v0 = vmov 0   ;;  %v3431_v1 = vld [vmem:[#allocation6 + $0x4] ss:$8 sps:$4 sm:$0xff]   ;;  %v3437_v5 = vld [vmem:[%s5458_s0] sm:$0xff]  }
  0x5d   :  { %330 = vmatprep.mubr.bf16.mxu0 %v5472_v0  ;;  %3429 = vset.pattern.permute.xlu1 %v5472_v0  ;;  %v3433_v2 = vld [vmem:[#allocation6] ss:$8 sps:$4 sm:$0xff]   ;;  %v3434_v3 = vld [vmem:[#allocation6 + $0x14] ss:$8 sps:$4 sm:$0xff]   ;;  %v3436_v4 = vld [vmem:[#allocation6 + $0x10] ss:$8 sps:$4 sm:$0xff]  }
  0x5e   :  { %3430 = vset.pattern.permute.xlu0 %v5472_v0  ;;  %298 = vmatprep.subr.bf16.mxu0 %v3431_v1  ;;  %vm249_vm0 = vcmask 261120   ;;  %v3438_v6 = vld [vmem:[%s5458_s0 + $0x8] sm:$0xff]   ;;  %v2487_v7 = vld [vmem:[%s5459_s1] sm:$0xff]  ;;  %v2489_v10 = vld [vmem:[%s5459_s1 + $0x10] sm:$0xff]  ;;  %s3836_s13 = scalar_lea.hbm %s5469_s11, 16 }
  0x5f   :  { %299 = vmatpush1.bf16.msra.mxu0 %v3433_v2  ;;  %2522 = vperm.xlu1 %3429, %v2487_v7   ;;  %vm2649_vm1 = vcmp.ge.s32.totalorder %v2487_v7, 0  ;;  %v2488_v8 = vld [vmem:[%s5459_s1 + $0x8] sm:$0xff]  ;;  %v3439_v11 = vld [vmem:[%s5458_s0 + $0x10] sm:$0xff]   ;;  %vm2651_vm3 = vcmp.ge.s32.totalorder %v2489_v10, 0  ;;  %v3440_v19 = vld [vmem:[%s5458_s0 + $0x18] sm:$0xff]   ;;  %p3837_p12 = scmp.ne.s32.totalorder %s5469_s11, %s3836_s13  ;;  %p3840_p13 = scmp.lt.u32.totalorder %s3836_s13, %s5469_s11 }
  0x60   :  { %300 = vmatprep.subr.bf16.mxu0 %v3434_v3  ;;  %v2681_v9 = vsel %vm2649_vm1, 1, %v5472_v0  ;;  %2525 = vperm.xlu0 %3430, %v2488_v8   ;;  %vm2650_vm2 = vcmp.ge.s32.totalorder %v2488_v8, 0  ;;  %v3453_v12 = vld [vmem:[%s5462_s4 + $0x4] ss:$8 sps:$4 sm:$0xff]   ;;  %v3455_v13 = vld [vmem:[%s5462_s4] ss:$8 sps:$4 sm:$0xff]  }
  0x61   :  { %v2682_v14 = vsel %vm2650_vm2, 1, %v5472_v0  ;;  %1270 = vmatprep.subr.bf16.mxu1 %v3453_v12  ;;  %v3456_v15 = vld [vmem:[%s5462_s4 + $0x14] ss:$8 sps:$4 sm:$0xff]   ;;  %v2683_v16 = vsel %vm2651_vm3, 1, %v5472_v0  ;;  %v3458_v17 = vld [vmem:[%s5462_s4 + $0x10] ss:$8 sps:$4 sm:$0xff]   ;;  %p3842_p0 = pnand %p3840_p13, %p3837_p12 }
  0x62   :  { %1271 = vmatpush1.bf16.msra.mxu1 %v3455_v13  ;;  %v3459_v18 = vld [vmem:[%s5462_s4 + $0x24] ss:$8 sps:$4 sm:$0xff]   ;;  %v2490_v20 = vld [vmem:[%s5459_s1 + $0x18] sm:$0xff]  ;;  %v3461_v22 = vld [vmem:[%s5462_s4 + $0x20] ss:$8 sps:$4 sm:$0xff]  }
  0x63   :  { %301 = vmatpush1.bf16.msra.mxu0 %v3436_v4  ;;  %2714 = vperm.xlu1 %3429, %v2681_v9   ;;  %vm2652_vm4 = vcmp.ge.s32.totalorder %v2490_v20, 0  ;;  %v2491_v21 = vld [vmem:[%s5459_s1 + $0x20] sm:$0xff]  ;;  %v3462_v23 = vld [vmem:[%s5462_s4 + $0x34] ss:$8 sps:$4 sm:$0xff]   ;;  %v3464_v26 = vld [vmem:[%s5462_s4 + $0x30] ss:$8 sps:$4 sm:$0xff]  }
  0x64   :  { %2528 = vperm.xlu0 %3430, %v2489_v10   ;;  %1272 = vmatprep.subr.bf16.mxu1 %v3456_v15  ;;  %vm2653_vm5 = vcmp.ge.s32.totalorder %v2491_v21, 0  ;;  %v2684_v24 = vsel %vm2652_vm4, 1, %v5472_v0  ;;  %v3465_v27 = vld [vmem:[%s5462_s4 + $0x44] ss:$8 sps:$4 sm:$0xff]   ;;  %v2493_v29 = vld [vmem:[%s5459_s1 + $0x30] sm:$0xff]  ;;  %v2494_v33 = vld [vmem:[%s5459_s1 + $0x38] sm:$0xff] }
  0x65   :  { %v2685_v25 = vsel %vm2653_vm5, 1, %v5472_v0  ;;  %v2492_v28 = vld [vmem:[%s5459_s1 + $0x28] sm:$0xff]  ;;  %v3441_v31 = vld [vmem:[%s5458_s0 + $0x20] sm:$0xff]   ;;  %vm2655_vm7 = vcmp.ge.s32.totalorder %v2493_v29, 0  ;;  %v3468_v32 = vld [vmem:[%s5462_s4 + $0x54] ss:$8 sps:$4 sm:$0xff]  }
  0x66   :  { %3151 = vmatmul.mubr.msk.bf16.vlgmr.msra.gmra.mrb[0].mxu0 %vm249_vm0, %v3437_v5  ;;  %1273 = vmatpush1.bf16.msra.mxu1 %v3458_v17  ;;  %vm2654_vm6 = vcmp.ge.s32.totalorder %v2492_v28, 0  ;;  %v3467_v30 = vld [vmem:[%s5462_s4 + $0x40] ss:$8 sps:$4 sm:$0xff]   ;;  %vm2656_vm8 = vcmp.ge.s32.totalorder %v2494_v33, 0  ;;  %v2687_v37 = vsel %vm2655_vm7, 1, %v5472_v0  ;;  %v2497_v38 = vld [vmem:[%s5459_s1 + $0x50] sm:$0xff] }
  0x67   :  { %340 = vmatprep.mubr.bf16.mxu0 %v5472_v0  ;;  %2717 = vperm.xlu1 %3429, %v2682_v14   ;;  %v2496_v34 = vld [vmem:[%s5459_s1 + $0x48] sm:$0xff]  ;;  %v2686_v35 = vsel %vm2654_vm6, 1, %v5472_v0  ;;  %v2495_v36 = vld [vmem:[%s5459_s1 + $0x40] sm:$0xff]  ;;  %v3470_v39 = vld [vmem:[%s5462_s4 + $0x50] ss:$8 sps:$4 sm:$0xff]   ;;  %vm2659_vm11 = vcmp.ge.s32.totalorder %v2497_v38, 0 }
  0x68   :  { %2720 = vperm.xlu0 %3430, %v2683_v16   ;;  %1274 = vmatprep.subr.bf16.mxu1 %v3459_v18  ;;  %vm2658_vm9 = vcmp.ge.s32.totalorder %v2496_v34, 0  ;;  %vm2657_vm10 = vcmp.ge.s32.totalorder %v2495_v36, 0  ;;  %v3471_v40 = vld [vmem:[%s5462_s4 + $0x64] ss:$8 sps:$4 sm:$0xff]   ;;  %v2688_v42 = vsel %vm2656_vm8, 1, %v5472_v0  ;;  %v2691_v47 = vsel %vm2659_vm11, 1, %v5472_v0 }
  0x69   :  { %v3442_v41 = vld [vmem:[%s5458_s0 + $0x28] sm:$0xff]   ;;  %v3474_v44 = vld [vmem:[%s5462_s4 + $0x74] ss:$8 sps:$4 sm:$0xff]   ;;  %v2690_v45 = vsel %vm2658_vm9, 1, %v5472_v0  ;;  %v2689_v46 = vsel %vm2657_vm10, 1, %v5472_v0  ;;  %v2499_v56 = vld [vmem:[%s5459_s1 + $0x60] sm:$0xff] }
  0x6a   :  { %1275 = vmatpush1.bf16.msra.mxu1 %v3461_v22  ;;  %v3473_v43 = vld [vmem:[%s5462_s4 + $0x60] ss:$8 sps:$4 sm:$0xff]   ;;  %v3476_v48 = vld [vmem:[%s5462_s4 + $0x70] ss:$8 sps:$4 sm:$0xff]   ;;  %v3477_v49 = vld [vmem:[%s5462_s4 + $0x84] ss:$8 sps:$4 sm:$0xff]  }
  0x6b   :  { %2531 = vperm.xlu1 %3429, %v2490_v20   ;;  %1276 = vmatprep.subr.bf16.mxu1 %v3462_v23  ;;  %v2498_v50 = vld [vmem:[%s5459_s1 + $0x58] sm:$0xff]  ;;  %v3479_v51 = vld [vmem:[%s5462_s4 + $0x80] ss:$8 sps:$4 sm:$0xff]   ;;  %v3443_v52 = vld [vmem:[%s5458_s0 + $0x30] sm:$0xff]   ;;  %vm2661_vm13 = vcmp.ge.s32.totalorder %v2499_v56, 0  ;;  %vm1001_vm5 = vcmask 7168  }
  0x6c   :  { %2534 = vperm.xlu0 %3430, %v2491_v21   ;;  %v3480_v53 = vld [vmem:[%s5462_s4 + $0x94] ss:$8 sps:$4 sm:$0xff]   ;;  %vm2660_vm12 = vcmp.ge.s32.totalorder %v2498_v50, 0  ;;  %v3482_v54 = vld [vmem:[%s5462_s4 + $0x90] ss:$8 sps:$4 sm:$0xff]   ;;  %v2693_v61 = vsel %vm2661_vm13, 1, %v5472_v0 }
  0x6d   :  { %v3483_v55 = vld [vmem:[%s5462_s4 + $0xa4] ss:$8 sps:$4 sm:$0xff]   ;;  %v3485_v57 = vld [vmem:[%s5462_s4 + $0xa0] ss:$8 sps:$4 sm:$0xff]   ;;  %v3444_v58 = vld [vmem:[%s5458_s0 + $0x38] sm:$0xff]   ;;  %v2692_v60 = vsel %vm2660_vm12, 1, %v5472_v0 }
  0x6e   :  { %3152 = vmatmul.mubr.msk.bf16.gmra.mrb[4].mxu0 %vm249_vm0, %v3438_v6  ;;  %1277 = vmatpush1.bf16.msra.mxu1 %v3464_v26  ;;  %v3486_v59 = vld [vmem:[%s5462_s4 + $0xb4] ss:$8 sps:$4 sm:$0xff]   ;;  %v3488_v62 = vld [vmem:[%s5462_s4 + $0xb0] ss:$8 sps:$4 sm:$0xff]   ;;  %v3489_v63 = vld [vmem:[%s5462_s4 + $0xc4] ss:$8 sps:$4 sm:$0xff]  }
  0x6f   :  { %350 = vmatprep.mubr.bf16.mxu0 %v5472_v0  ;;  %2723 = vperm.xlu1 %3429, %v2684_v24   ;;  %v2500_v1 = vld [vmem:[%s5459_s1 + $0x68] sm:$0xff]  ;;  %v2501_v2 = vld [vmem:[%s5459_s1 + $0x70] sm:$0xff]  ;;  %v3445_v4 = vld [vmem:[%s5458_s0 + $0x40] sm:$0xff]  }
  0x70   :  { %2726 = vperm.xlu0 %3430, %v2685_v25   ;;  %1278 = vmatprep.subr.bf16.mxu1 %v3465_v27  ;;  %vm2662_vm14 = vcmp.ge.s32.totalorder %v2500_v1, 0  ;;  %v3491_v3 = vld [vmem:[%s5462_s4 + $0xc0] ss:$8 sps:$4 sm:$0xff]   ;;  %vm2663_vm15 = vcmp.ge.s32.totalorder %v2501_v2, 0  ;;  %v3492_v5 = vld [vmem:[%s5462_s4 + $0xd4] ss:$8 sps:$4 sm:$0xff]  }
  0x71   :  { %v2694_v6 = vsel %vm2662_vm14, 1, %v5472_v0  ;;  %v2695_v7 = vsel %vm2663_vm15, 1, %v5472_v0  ;;  %v3494_v8 = vld [vmem:[%s5462_s4 + $0xd0] ss:$8 sps:$4 sm:$0xff]   ;;  %v2503_v10 = vld [vmem:[%s5459_s1 + $0x80] sm:$0xff]  ;;  %v2504_v14 = vld [vmem:[%s5459_s1 + $0x88] sm:$0xff] }
  0x72   :  { %1279 = vmatpush1.bf16.msra.mxu1 %v3467_v30  ;;  %v2502_v9 = vld [vmem:[%s5459_s1 + $0x78] sm:$0xff]  ;;  %vm2665_vm2 = vcmp.ge.s32.totalorder %v2503_v10, 0  ;;  %vm2666_vm3 = vcmp.ge.s32.totalorder %v2504_v14, 0  ;;  %v3447_v15 = vld [vmem:[%s5458_s0 + $0x50] sm:$0xff]   ;;  %v3495_v17 = vld [vmem:[%s5462_s4 + $0xe4] ss:$8 sps:$4 sm:$0xff]  }
  0x73   :  { %2537 = vperm.xlu1 %3429, %v2492_v28   ;;  %1280 = vmatprep.subr.bf16.mxu1 %v3468_v32  ;;  %vm2664_vm1 = vcmp.ge.s32.totalorder %v2502_v9, 0  ;;  %v2697_v13 = vsel %vm2665_vm2, 1, %v5472_v0  ;;  %v2698_v16 = vsel %vm2666_vm3, 1, %v5472_v0  ;;  %v3497_v18 = vld [vmem:[%s5462_s4 + $0xe0] ss:$8 sps:$4 sm:$0xff]   ;;  %v3451_v24 = vld [vmem:[%s5458_s0 + $0x70] sm:$0xff]   ;;  %v5471_v28 = vlaneseq }
  0x74   :  { %2540 = vperm.xlu0 %3430, %v2493_v29   ;;  %v2696_v12 = vsel %vm2664_vm1, 1, %v5472_v0  ;;  %v3498_v20 = vld [vmem:[%s5462_s4 + $0xf4] ss:$8 sps:$4 sm:$0xff]   ;;  %v3500_v21 = vld [vmem:[%s5462_s4 + $0xf0] ss:$8 sps:$4 sm:$0xff]   ;;  %v3449_v22 = vld [vmem:[%s5458_s0 + $0x60] sm:$0xff]  }
  0x75   :  { %v3450_v23 = vld [vmem:[%s5458_s0 + $0x68] sm:$0xff]   ;;  %v3452_v25 = vld [vmem:[%s5458_s0 + $0x78] sm:$0xff]   ;;  %v3501_v26 = vld [vmem:[%s5464_s6 + $0x40] sm:$0xff]   ;;  %v140_v29 = vshrl.u32 %v5471_v28, 7 }
  0x76   :  { %3153 = vmatmul.mubr.msk.bf16.gmra.mrb[8].mxu0 %vm249_vm0, %v3439_v11  ;;  %1281 = vmatpush1.bf16.msra.mxu1 %v3470_v39  ;;  %v3446_v11 = vld [vmem:[%s5458_s0 + $0x48] sm:$0xff]   ;;  %v3502_v27 = vld [vmem:[%s5464_s6] sm:$0xff]  }
  0x77   :  { %360 = vmatprep.mubr.bf16.mxu0 %v5472_v0  ;;  %2729 = vperm.xlu1 %3429, %v2686_v35   ;;  %v3503_v30 = vld [vmem:[%s5464_s6 + $0x48] sm:$0xff]   ;;  %v4277_v32 = vsub.s32 0, %v140_v29 }
  0x78   :  { %2732 = vperm.xlu0 %3430, %v2687_v37   ;;  %1282 = vmatprep.subr.bf16.mxu1 %v3471_v40 }
  0x79   :  { %3225 = vmatprep.subr.bf16.mxu0 %v3501_v26 }
  0x7a   :  { %1283 = vmatpush1.bf16.msra.mxu1 %v3473_v43  ;;  %3226 = vmatpush3.bf16.msra.mxu0 %v3502_v27  ;;  %v3506_v43 = vld [vmem:[%s5464_s6 + $0x10] sm:$0xff]  }
  0x7b   :  { %2543 = vperm.xlu1 %3429, %v2494_v33   ;;  %1284 = vmatprep.subr.bf16.mxu1 %v3474_v44  ;;  %v137_v33 = vld [vmem:[#allocation9] sm:$0x3] }
  0x7c   :  { %2546 = vperm.xlu0 %3430, %v2495_v36   ;;  %3227 = vmatprep.subr.bf16.mxu0 %v3503_v30  ;;  %v4282_v35 = vrot.slane %v137_v33, %v4277_v32  ;;  %v3507_v30 = vld [vmem:[%s5464_s6 + $0x58] sm:$0xff]  }
  0x7e   :  { %3154 = vmatmul.mubr.msk.bf16.gmra.mrb[12].mxu0 %vm249_vm0, %v3440_v19  ;;  %1285 = vmatpush1.bf16.msra.mxu1 %v3476_v48  ;;  %v3448_v19 = vld [vmem:[%s5458_s0 + $0x58] sm:$0xff]  }
  0x7f   :  { %370 = vmatprep.mubr.bf16.mxu0 %v5472_v0  ;;  %2735 = vperm.xlu1 %3429, %v2688_v42   ;;  %v3505_v42 = vld [vmem:[%s5464_s6 + $0x50] sm:$0xff]  }
  0x80   :  { %2738 = vperm.xlu0 %3430, %v2689_v46   ;;  %1286 = vmatprep.subr.bf16.mxu1 %v3477_v49 }
  0x82   :  { %1287 = vmatpush1.bf16.msra.mxu1 %v3479_v51 }
  0x83   :  { %2549 = vperm.xlu1 %3429, %v2496_v34   ;;  %1288 = vmatprep.subr.bf16.mxu1 %v3480_v53  ;;  %v4279_v34 = vsub.s32 1, %v140_v29 }
  0x84   :  { %2552 = vperm.xlu0 %3430, %v2497_v38  }
  0x85   :  { %v4285_v36 = vrot.slane %v137_v33, %v4279_v34 }
  0x86   :  { %3155 = vmatmul.mubr.msk.bf16.gmra.mrb[16].mxu0 %vm249_vm0, %v3441_v31  ;;  %1289 = vmatpush1.bf16.msra.mxu1 %v3482_v54  ;;  %v3504_v31 = vld [vmem:[%s5464_s6 + $0x8] sm:$0xff]  }
  0x87   :  { %380 = vmatprep.mubr.bf16.mxu0 %v5472_v0  ;;  %2741 = vperm.xlu1 %3429, %v2690_v45  }
  0x88   :  { %2744 = vperm.xlu0 %3430, %v2691_v47   ;;  %1290 = vmatprep.subr.bf16.mxu1 %v3483_v55 }
  0x89   :  { %3228 = vmatpush3.bf16.msra.mxu0 %v3504_v31  ;;  %v3508_v31 = vld [vmem:[%s5464_s6 + $0x18] sm:$0xff]  }
  0x8a   :  { %1291 = vmatpush1.bf16.msra.mxu1 %v3485_v57  ;;  %3229 = vmatprep.subr.bf16.mxu0 %v3505_v42 }
  0x8b   :  { %2555 = vperm.xlu1 %3429, %v2498_v50   ;;  %1292 = vmatprep.subr.bf16.mxu1 %v3486_v59 }
  0x8c   :  { %2558 = vperm.xlu0 %3430, %v2499_v56  }
  0x8d   :  { %3230 = vmatpush3.bf16.msra.mxu0 %v3506_v43 }
  0x8e   :  { %3156 = vmatmul.mubr.msk.bf16.gmra.mrb[20].mxu0 %vm249_vm0, %v3442_v41  ;;  %1293 = vmatpush1.bf16.msra.mxu1 %v3488_v62 }
  0x8f   :  { %390 = vmatprep.mubr.bf16.mxu0 %v5472_v0  ;;  %2747 = vperm.xlu1 %3429, %v2692_v60  }
  0x90   :  { %2750 = vperm.xlu0 %3430, %v2693_v61   ;;  %1294 = vmatprep.subr.bf16.mxu1 %v3489_v63 }
  0x91   :  { %3231 = vmatprep.subr.bf16.mxu0 %v3507_v30 }
  0x92   :  { %1295 = vmatpush1.bf16.msra.mxu1 %v3491_v3  ;;  %3232 = vmatpush3.bf16.msra.mxu0 %v3508_v31 }
  0x93   :  { %2561 = vperm.xlu1 %3429, %v2500_v1   ;;  %1296 = vmatprep.subr.bf16.mxu1 %v3492_v5 }
  0x94   :  { %2564 = vperm.xlu0 %3430, %v2501_v2  }
  0x96   :  { %3157 = vmatmul.mubr.msk.bf16.gmra.mrb[24].mxu0 %vm249_vm0, %v3443_v52  ;;  %1297 = vmatpush1.bf16.msra.mxu1 %v3494_v8 }
  0x97   :  { %400 = vmatprep.mubr.bf16.mxu0 %v5472_v0  ;;  %2753 = vperm.xlu1 %3429, %v2694_v6  }
  0x98   :  { %2756 = vperm.xlu0 %3430, %v2695_v7   ;;  %1298 = vmatprep.subr.bf16.mxu1 %v3495_v17 }
  0x9a   :  { %1299 = vmatpush1.bf16.msra.mxu1 %v3497_v18 }
  0x9b   :  { %2567 = vperm.xlu1 %3429, %v2502_v9   ;;  %1300 = vmatprep.subr.bf16.mxu1 %v3498_v20 }
  0x9c   :  { %2570 = vperm.xlu0 %3430, %v2503_v10  }
  0x9e   :  { %3158 = vmatmul.mubr.msk.bf16.gmra.mrb[28].mxu0 %vm249_vm0, %v3444_v58  ;;  %1301 = vmatpush1.bf16.msra.mxu1 %v3500_v21 }
  0x9f   :  { %410 = vmatprep.mubr.bf16.mxu0 %v5472_v0  ;;  %2759 = vperm.xlu1 %3429, %v2696_v12  }
  0xa0   :  { %2762 = vperm.xlu0 %3430, %v2697_v13  }
  0xa3   :  { %2573 = vperm.xlu1 %3429, %v2504_v14  }
  0xa6   :  { %3159 = vmatmul.mubr.msk.bf16.gmra.mrb[32].mxu0 %vm249_vm0, %v3445_v4 }
  0xa7   :  { %420 = vmatprep.mubr.bf16.mxu0 %v5472_v0  ;;  %2765 = vperm.xlu1 %3429, %v2698_v16  }
  0xae   :  { %3160 = vmatmul.mubr.msk.bf16.gmra.mrb[36].mxu0 %vm249_vm0, %v3446_v11 }
  0xaf   :  { %430 = vmatprep.mubr.bf16.mxu0 %v5472_v0 }
  0xb6   :  { %3161 = vmatmul.mubr.msk.bf16.gmra.mrb[40].mxu0 %vm249_vm0, %v3447_v15 }
  0xb7   :  { %440 = vmatprep.mubr.bf16.mxu0 %v5472_v0 }
  0xbe   :  { %3162 = vmatmul.mubr.msk.bf16.gmra.mrb[44].mxu0 %vm249_vm0, %v3448_v19 }
  0xbf   :  { %450 = vmatprep.mubr.bf16.mxu0 %v5472_v0 }
  0xc6   :  { %3163 = vmatmul.mubr.msk.bf16.gmra.mrb[48].mxu0 %vm249_vm0, %v3449_v22 }
  0xc7   :  { %460 = vmatprep.mubr.bf16.mxu0 %v5472_v0 }
  0xce   :  { %3164 = vmatmul.mubr.msk.bf16.gmra.mrb[52].mxu0 %vm249_vm0, %v3450_v23 }
  0xcf   :  { %470 = vmatprep.mubr.bf16.mxu0 %v5472_v0 }
  0xd6   :  { %3165 = vmatmul.mubr.msk.bf16.gmra.mrb[56].mxu0 %vm249_vm0, %v3451_v24 }
  0xd7   :  { %480 = vmatprep.mubr.bf16.mxu0 %v5472_v0 }
  0xde   :  { %3166 = vmatmul.mubr.msk.bf16.gmra.mrb[60].mxu0 %vm249_vm0, %v3452_v25 }
 0x139   :  { %v332_v37 = vpop.f32.mrb[0].mxu0 }
 0x13a   :  { %v333_v38 = vadd.f32 %v332_v37, %v4282_v35  ;;  %v334_v39 = vpop.f32.mrb[1].mxu0 }
 0x13b   :  { %v335_v40 = vadd.f32 %v334_v39, %v4285_v36  ;;  %v336_v41 = vpop.f32.mrb[2].mxu0 }
 0x13c   :  { %v500_v44 = vrot.slane %v333_v38, %v4277_v32  ;;  %v337_v45 = vadd.f32 %v336_v41, %v4282_v35  ;;  %v338_v46 = vpop.f32.mrb[3].mxu0 }
 0x13d   :  { %v504_v47 = vrot.slane %v335_v40, %v4277_v32  ;;  %v339_v48 = vadd.f32 %v338_v46, %v4285_v36 }
 0x13e   :  { %505 = vst [vmem:[#allocation2] sm:$0xff] %v500_v44  ;;  %v1034_v49 = vpack.c.bf16 %v337_v45, %v333_v38 }
 0x13f   :  { %506 = vst [vmem:[#allocation2 + $0x8] sm:$0xff] %v504_v47  ;;  %v1035_v50 = vpack.c.bf16 %v339_v48, %v335_v40 }
 0x141   :  { %v342_v51 = vpop.f32.mrb[4].mxu0  ;;  %1302 = vmatprep.mubr.bf16.mxu1 %v1035_v50 }
 0x142   :  { %v344_v52 = vpop.f32.mrb[5].mxu0  ;;  %1303 = vmatmul.mubr.bf16.vlgmr.msra.gmra.mrb[0].mxu1 %v1034_v49  ;;  %v343_v54 = vadd.f32 %v342_v51, %v4282_v35 }
 0x143   :  { %v346_v53 = vpop.f32.mrb[6].mxu0  ;;  %v345_v57 = vadd.f32 %v344_v52, %v4285_v36 }
 0x144   :  { %v347_v55 = vadd.f32 %v346_v53, %v4282_v35  ;;  %v348_v56 = vpop.f32.mrb[7].mxu0 }
 0x145   :  { %v349_v58 = vadd.f32 %v348_v56, %v4285_v36 }
 0x146   :  { %v507_v59 = vld [vmem:[#allocation2] ss:$8 sm:$0x3]  ;;  %v1036_v60 = vpack.c.bf16 %v347_v55, %v343_v54 }
 0x147   :  { %v4304_v61 = vrot.slane %v507_v59, %v4277_v32  ;;  %v4307_v62 = vrot.slane %v507_v59, %v4279_v34  ;;  %v1037_v63 = vpack.c.bf16 %v349_v58, %v345_v57 }
 0x149   :  { %v521_v1 = vsub.f32 %v337_v45, %v4304_v61  ;;  %v522_v2 = vsub.f32 %v339_v48, %v4307_v62  ;;  %v523_v3 = vsub.f32 %v343_v54, %v4304_v61  ;;  %v524_v4 = vsub.f32 %v345_v57, %v4307_v62  ;;  %v352_v5 = vpop.f32.mrb[8].mxu0  ;;  %1312 = vmatprep.mubr.bf16.mxu1 %v1037_v63 }
 0x14a   :  { %v525_v6 = vsub.f32 %v347_v55, %v4304_v61  ;;  %v526_v7 = vsub.f32 %v349_v58, %v4307_v62  ;;  %v353_v8 = vadd.f32 %v352_v5, %v4282_v35  ;;  %v354_v9 = vpop.f32.mrb[9].mxu0  ;;  %1313 = vmatmul.mubr.bf16.gmra.mrb[4].mxu1 %v1036_v60  ;;  %v519_v10 = vsub.f32 %v333_v38, %v4304_v61 }
 0x14b   :  { %v585_v11 = vmul.f32 %v521_v1, %v521_v1  ;;  %v586_v12 = vmul.f32 %v522_v2, %v522_v2  ;;  %v587_v13 = vmul.f32 %v523_v3, %v523_v3  ;;  %v588_v14 = vmul.f32 %v524_v4, %v524_v4  ;;  %v356_v15 = vpop.f32.mrb[10].mxu0 }
 0x14c   :  { %v589_v16 = vmul.f32 %v525_v6, %v525_v6  ;;  %v590_v17 = vmul.f32 %v526_v7, %v526_v7  ;;  %v527_v18 = vsub.f32 %v353_v8, %v4304_v61  ;;  %v355_v19 = vadd.f32 %v354_v9, %v4285_v36  ;;  %v358_v20 = vpop.f32.mrb[11].mxu0 }
 0x14d   :  { %v357_v21 = vadd.f32 %v356_v15, %v4282_v35  ;;  %v359_v22 = vadd.f32 %v358_v20, %v4285_v36  ;;  %v653_v23 = vadd.f32 %v588_v14, %v587_v13  ;;  %v520_v24 = vsub.f32 %v335_v40, %v4307_v62 }
 0x14e   :  { %v591_v25 = vmul.f32 %v527_v18, %v527_v18  ;;  %v528_v26 = vsub.f32 %v355_v19, %v4307_v62  ;;  %v583_v27 = vmul.f32 %v519_v10, %v519_v10  ;;  %v656_v29 = vadd.f32 %v590_v17, %v589_v16 }
 0x14f   :  { %v529_v33 = vsub.f32 %v357_v21, %v4304_v61  ;;  %v1038_v37 = vpack.c.bf16 %v357_v21, %v353_v8  ;;  %v530_v38 = vsub.f32 %v359_v22, %v4307_v62  ;;  %v1039_v39 = vpack.c.bf16 %v359_v22, %v355_v19  ;;  %654 = vadd.xlane.f32.xlu1 %v653_v23 }
 0x150   :  { %v592_v40 = vmul.f32 %v528_v26, %v528_v26  ;;  %v584_v41 = vmul.f32 %v520_v24, %v520_v24  ;;  %v650_v42 = vadd.f32 %v586_v12, %v585_v11 }
 0x151   :  { %v593_v43 = vmul.f32 %v529_v33, %v529_v33  ;;  %v594_v44 = vmul.f32 %v530_v38, %v530_v38  ;;  %v362_v45 = vpop.f32.mrb[12].mxu0  ;;  %1322 = vmatprep.mubr.bf16.mxu1 %v1039_v39 }
 0x152   :  { %v647_v46 = vadd.f32 %v584_v41, %v583_v27  ;;  %v363_v47 = vadd.f32 %v362_v45, %v4282_v35  ;;  %v364_v48 = vpop.f32.mrb[13].mxu0  ;;  %1323 = vmatmul.mubr.bf16.gmra.mrb[8].mxu1 %v1038_v37  ;;  %v659_v49 = vadd.f32 %v592_v40, %v591_v25 }
 0x153   :  { %v365_v50 = vadd.f32 %v364_v48, %v4285_v36  ;;  %v366_v51 = vpop.f32.mrb[14].mxu0  ;;  %657 = vadd.xlane.f32.xlu1 %v656_v29  ;;  %v662_v52 = vadd.f32 %v594_v44, %v593_v43 }
 0x154   :  { %648 = vadd.xlane.f32.xlu0 %v647_v46  ;;  %v531_v53 = vsub.f32 %v363_v47, %v4304_v61  ;;  %v367_v54 = vadd.f32 %v366_v51, %v4282_v35  ;;  %v368_v55 = vpop.f32.mrb[15].mxu0 }
 0x155   :  { %v532_v56 = vsub.f32 %v365_v50, %v4307_v62  ;;  %v369_v57 = vadd.f32 %v368_v55, %v4285_v36 }
 0x156   :  { %v595_v58 = vmul.f32 %v531_v53, %v531_v53  ;;  %v533_v59 = vsub.f32 %v367_v54, %v4304_v61  ;;  %v1040_v60 = vpack.c.bf16 %v367_v54, %v363_v47  ;;  %v4358_v54 = vpop.permute.xlu1 %2522 }
 0x157   :  { %v596_v63 = vmul.f32 %v532_v56, %v532_v56  ;;  %v534_v1 = vsub.f32 %v369_v57, %v4307_v62  ;;  %v1041_v2 = vpack.c.bf16 %v369_v57, %v365_v50  ;;  %663 = vadd.xlane.f32.xlu1 %v662_v52 }
 0x158   :  { %v597_v3 = vmul.f32 %v533_v59, %v533_v59  ;;  %651 = vadd.xlane.f32.xlu0 %v650_v42 }
 0x159   :  { %v598_v4 = vmul.f32 %v534_v1, %v534_v1  ;;  %v372_v5 = vpop.f32.mrb[16].mxu0  ;;  %1332 = vmatprep.mubr.bf16.mxu1 %v1041_v2  ;;  %v665_v6 = vadd.f32 %v596_v63, %v595_v58 }
 0x15a   :  { %v373_v7 = vadd.f32 %v372_v5, %v4282_v35  ;;  %v374_v8 = vpop.f32.mrb[17].mxu0  ;;  %1333 = vmatmul.mubr.bf16.gmra.mrb[12].mxu1 %v1040_v60 }
 0x15b   :  { %v375_v9 = vadd.f32 %v374_v8, %v4285_v36  ;;  %v376_v10 = vpop.f32.mrb[18].mxu0  ;;  %v668_v11 = vadd.f32 %v598_v4, %v597_v3 }
 0x15c   :  { %660 = vadd.xlane.f32.xlu0 %v659_v49  ;;  %v535_v12 = vsub.f32 %v373_v7, %v4304_v61  ;;  %v377_v13 = vadd.f32 %v376_v10, %v4282_v35  ;;  %v378_v14 = vpop.f32.mrb[19].mxu0 }
 0x15d   :  { %v536_v15 = vsub.f32 %v375_v9, %v4307_v62  ;;  %v379_v16 = vadd.f32 %v378_v14, %v4285_v36  ;;  %669 = vadd.xlane.f32.xlu1 %v668_v11 }
 0x15e   :  { %v599_v17 = vmul.f32 %v535_v12, %v535_v12  ;;  %v537_v18 = vsub.f32 %v377_v13, %v4304_v61  ;;  %v1042_v19 = vpack.c.bf16 %v377_v13, %v373_v7 }
 0x15f   :  { %v600_v20 = vmul.f32 %v536_v15, %v536_v15  ;;  %v538_v21 = vsub.f32 %v379_v16, %v4307_v62  ;;  %v1043_v22 = vpack.c.bf16 %v379_v16, %v375_v9  ;;  %v4369_v9 = vpop.permute.xlu1 %2714 }
 0x160   :  { %v601_v23 = vmul.f32 %v537_v18, %v537_v18  ;;  %666 = vadd.xlane.f32.xlu0 %v665_v6  ;;  %vm2809_vm3 = vcmp.eq.s32.totalorder %v4369_v9, 1  ;;  %v5474_v9 = vmov 0.0  }
 0x161   :  { %v602_v24 = vmul.f32 %v538_v21, %v538_v21  ;;  %v382_v25 = vpop.f32.mrb[20].mxu0  ;;  %1342 = vmatprep.mubr.bf16.mxu1 %v1043_v22  ;;  %v671_v26 = vadd.f32 %v600_v20, %v599_v17  ;;  %v2506_v17 = vld [vmem:[%s5459_s1 + $0x98] sm:$0xff]  ;;  %v3510_v20 = vld [vmem:[%s5464_s6 + $0x20] sm:$0xff]  }
 0x162   :  { %v383_v27 = vadd.f32 %v382_v25, %v4282_v35  ;;  %v384_v29 = vpop.f32.mrb[21].mxu0  ;;  %1343 = vmatmul.mubr.bf16.gmra.mrb[16].mxu1 %v1042_v19  ;;  %v3509_v19 = vld [vmem:[%s5464_s6 + $0x60] sm:$0xff]   ;;  %vm2668_vm0 = vcmp.ge.s32.totalorder %v2506_v17, 0 }
 0x163   :  { %v385_v30 = vadd.f32 %v384_v29, %v4285_v36  ;;  %v386_v31 = vpop.f32.mrb[22].mxu0  ;;  %v674_v33 = vadd.f32 %v602_v24, %v601_v23  ;;  %3233 = vmatprep.subr.bf16.mxu0 %v3509_v19 }
 0x164   :  { %v539_v37 = vsub.f32 %v383_v27, %v4304_v61  ;;  %v387_v38 = vadd.f32 %v386_v31, %v4282_v35  ;;  %672 = vadd.xlane.f32.xlu0 %v671_v26  ;;  %v388_v39 = vpop.f32.mrb[23].mxu0  ;;  %3234 = vmatpush3.bf16.msra.mxu0 %v3510_v20 }
 0x165   :  { %v540_v40 = vsub.f32 %v385_v30, %v4307_v62  ;;  %v389_v41 = vadd.f32 %v388_v39, %v4285_v36  ;;  %675 = vadd.xlane.f32.xlu1 %v674_v33 }
 0x166   :  { %v603_v42 = vmul.f32 %v539_v37, %v539_v37  ;;  %v541_v43 = vsub.f32 %v387_v38, %v4304_v61  ;;  %v1044_v44 = vpack.c.bf16 %v387_v38, %v383_v27  ;;  %v4397_v38 = vld [vmem:[%s5459_s1 + $0x90] sm:$0xff] }
 0x167   :  { %v604_v45 = vmul.f32 %v540_v40, %v540_v40  ;;  %v542_v46 = vsub.f32 %v389_v41, %v4307_v62  ;;  %v1045_v47 = vpack.c.bf16 %v389_v41, %v385_v30  ;;  %v4391_v30 = vpop.permute.xlu1 %2717  ;;  %v2700_v40 = vsel %vm2668_vm0, 1, %v5472_v0 }
 0x168   :  { %v605_v48 = vmul.f32 %v541_v43, %v541_v43  ;;  %vm2667_vm4 = vcmp.ge.s32.totalorder %v4397_v38, 0 }
 0x169   :  { %v606_v49 = vmul.f32 %v542_v46, %v542_v46  ;;  %v392_v50 = vpop.f32.mrb[24].mxu0  ;;  %1352 = vmatprep.mubr.bf16.mxu1 %v1045_v47  ;;  %v4355_v51 = vadd.f32 %v604_v45, %v603_v42 }
 0x16a   :  { %v393_v52 = vadd.f32 %v392_v50, %v4282_v35  ;;  %v394_v53 = vpop.f32.mrb[25].mxu0  ;;  %1353 = vmatmul.mubr.bf16.gmra.mrb[20].mxu1 %v1044_v44 }
 0x16b   :  { %v395_v55 = vadd.f32 %v394_v53, %v4285_v36  ;;  %v396_v56 = vpop.f32.mrb[26].mxu0  ;;  %v4361_v57 = vadd.f32 %v606_v49, %v605_v48  ;;  %v4405_v48 = vpop.permute.xlu0 %2525 }
 0x16c   :  { %v543_v58 = vsub.f32 %v393_v52, %v4304_v61  ;;  %v397_v59 = vadd.f32 %v396_v56, %v4282_v35  ;;  %v398_v60 = vpop.f32.mrb[27].mxu0 }
 0x16d   :  { %v544_v63 = vsub.f32 %v395_v55, %v4307_v62  ;;  %v399_v1 = vadd.f32 %v398_v60, %v4285_v36 }
 0x16e   :  { %v607_v2 = vmul.f32 %v543_v58, %v543_v58  ;;  %v545_v3 = vsub.f32 %v397_v59, %v4304_v61  ;;  %v1046_v4 = vpack.c.bf16 %v397_v59, %v393_v52 }
 0x16f   :  { %v608_v5 = vmul.f32 %v544_v63, %v544_v63  ;;  %v546_v6 = vsub.f32 %v399_v1, %v4307_v62  ;;  %v1047_v7 = vpack.c.bf16 %v399_v1, %v395_v55  ;;  %v4411_v55 = vpop.permute.xlu1 %2531 }
 0x170   :  { %v609_v8 = vmul.f32 %v545_v3, %v545_v3 }
 0x171   :  { %v610_v10 = vmul.f32 %v546_v6, %v546_v6  ;;  %v402_v11 = vpop.f32.mrb[28].mxu0  ;;  %1362 = vmatprep.mubr.bf16.mxu1 %v1047_v7  ;;  %v4371_v12 = vadd.f32 %v608_v5, %v607_v2  ;;  %v3512_v5 = vld [vmem:[%s5464_s6 + $0x28] sm:$0xff]  }
 0x172   :  { %v403_v13 = vadd.f32 %v402_v11, %v4282_v35  ;;  %v404_v14 = vpop.f32.mrb[29].mxu0  ;;  %1363 = vmatmul.mubr.bf16.gmra.mrb[24].mxu1 %v1046_v4  ;;  %v3511_v4 = vld [vmem:[%s5464_s6 + $0x68] sm:$0xff]  }
 0x173   :  { %v405_v15 = vadd.f32 %v404_v14, %v4285_v36  ;;  %v406_v16 = vpop.f32.mrb[30].mxu0  ;;  %v4378_v18 = vadd.f32 %v610_v10, %v609_v8  ;;  %v4423_v10 = vpop.permute.xlu0 %2528  ;;  %3235 = vmatprep.subr.bf16.mxu0 %v3511_v4  ;;  %v3516_v4 = vld [vmem:[%s5464_s6 + $0x38] sm:$0xff]  }
 0x174   :  { %v547_v21 = vsub.f32 %v403_v13, %v4304_v61  ;;  %v407_v22 = vadd.f32 %v406_v16, %v4282_v35  ;;  %v408_v23 = vpop.f32.mrb[31].mxu0  ;;  %3236 = vmatpush3.bf16.msra.mxu0 %v3512_v5 }
 0x175   :  { %v548_v24 = vsub.f32 %v405_v15, %v4307_v62  ;;  %v409_v25 = vadd.f32 %v408_v23, %v4285_v36  ;;  %v3513_v23 = vld [vmem:[%s5464_s6 + $0x70] sm:$0xff]  }
 0x176   :  { %v611_v26 = vmul.f32 %v547_v21, %v547_v21  ;;  %v549_v27 = vsub.f32 %v407_v22, %v4304_v61  ;;  %v1048_v29 = vpack.c.bf16 %v407_v22, %v403_v13  ;;  %2579 = vperm.xlu1 %3429, %v2506_v17   ;;  %3237 = vmatprep.subr.bf16.mxu0 %v3513_v23 }
 0x177   :  { %v612_v31 = vmul.f32 %v548_v24, %v548_v24  ;;  %v550_v33 = vsub.f32 %v409_v25, %v4307_v62  ;;  %v1049_v37 = vpack.c.bf16 %v409_v25, %v405_v15  ;;  %v4428_v15 = vpop.permute.xlu1 %2723  ;;  %v3514_v24 = vld [vmem:[%s5464_s6 + $0x30] sm:$0xff]  }
 0x178   :  { %v613_v39 = vmul.f32 %v549_v27, %v549_v27  ;;  %3238 = vmatpush3.bf16.msra.mxu0 %v3514_v24 }
 0x179   :  { %v614_v41 = vmul.f32 %v550_v33, %v550_v33  ;;  %v412_v42 = vpop.f32.mrb[32].mxu0  ;;  %1372 = vmatprep.mubr.bf16.mxu1 %v1049_v37  ;;  %v4400_v43 = vadd.f32 %v612_v31, %v611_v26 }
 0x17a   :  { %v413_v44 = vadd.f32 %v412_v42, %v4282_v35  ;;  %2576 = vperm.xlu0 %3430, %v4397_v38   ;;  %v414_v45 = vpop.f32.mrb[33].mxu0  ;;  %1373 = vmatmul.mubr.bf16.gmra.mrb[28].mxu1 %v1048_v29 }
 0x17b   :  { %v415_v46 = vadd.f32 %v414_v45, %v4285_v36  ;;  %2771 = vperm.xlu1 %3429, %v2700_v40   ;;  %v416_v47 = vpop.f32.mrb[34].mxu0  ;;  %v4407_v49 = vadd.f32 %v614_v41, %v613_v39  ;;  %v4445_v40 = vpop.permute.xlu0 %2720 }
 0x17c   :  { %v551_v50 = vsub.f32 %v413_v44, %v4304_v61  ;;  %v417_v52 = vadd.f32 %v416_v47, %v4282_v35  ;;  %v418_v53 = vpop.f32.mrb[35].mxu0  ;;  %v4447_v42 = vpop.permute.xlu1 %2537 }
 0x17d   :  { %v552_v56 = vsub.f32 %v415_v46, %v4307_v62  ;;  %v419_v58 = vadd.f32 %v418_v53, %v4285_v36 }
 0x17e   :  { %v615_v59 = vmul.f32 %v551_v50, %v551_v50  ;;  %v553_v60 = vsub.f32 %v417_v52, %v4304_v61  ;;  %v1050_v63 = vpack.c.bf16 %v417_v52, %v413_v44 }
 0x17f   :  { %v616_v1 = vmul.f32 %v552_v56, %v552_v56  ;;  %v554_v2 = vsub.f32 %v419_v58, %v4307_v62  ;;  %v1051_v3 = vpack.c.bf16 %v419_v58, %v415_v46 }
 0x180   :  { %v617_v6 = vmul.f32 %v553_v60, %v553_v60 }
 0x181   :  { %v618_v7 = vmul.f32 %v554_v2, %v554_v2  ;;  %v422_v8 = vpop.f32.mrb[36].mxu0  ;;  %1382 = vmatprep.mubr.bf16.mxu1 %v1051_v3  ;;  %v4425_v11 = vadd.f32 %v616_v1, %v615_v59  ;;  %v4459_v2 = vpop.permute.xlu0 %2534  ;;  %v3515_v3 = vld [vmem:[%s5464_s6 + $0x78] sm:$0xff]  }
 0x182   :  { %v423_v13 = vadd.f32 %v422_v8, %v4282_v35  ;;  %v424_v14 = vpop.f32.mrb[37].mxu0  ;;  %1383 = vmatmul.mubr.bf16.gmra.mrb[32].mxu1 %v1050_v63  ;;  %v4468_v8 = vpop.permute.xlu1 %2729  ;;  %3239 = vmatprep.subr.bf16.mxu0 %v3515_v3 }
 0x183   :  { %v425_v16 = vadd.f32 %v424_v14, %v4285_v36  ;;  %v426_v17 = vpop.f32.mrb[38].mxu0  ;;  %v4431_v19 = vadd.f32 %v618_v7, %v617_v6  ;;  %3240 = vmatpush3.bf16.msra.mxu0 %v3516_v4 }
 0x184   :  { %v555_v20 = vsub.f32 %v423_v13, %v4304_v61  ;;  %v427_v21 = vadd.f32 %v426_v17, %v4282_v35  ;;  %v428_v22 = vpop.f32.mrb[39].mxu0 }
 0x185   :  { %v556_v25 = vsub.f32 %v425_v16, %v4307_v62  ;;  %v429_v26 = vadd.f32 %v428_v22, %v4285_v36 }
 0x186   :  { %v619_v27 = vmul.f32 %v555_v20, %v555_v20  ;;  %v557_v29 = vsub.f32 %v427_v21, %v4304_v61  ;;  %v1052_v31 = vpack.c.bf16 %v427_v21, %v423_v13 }
 0x187   :  { %v620_v33 = vmul.f32 %v556_v25, %v556_v25  ;;  %v558_v37 = vsub.f32 %v429_v26, %v4307_v62  ;;  %v1053_v39 = vpack.c.bf16 %v429_v26, %v425_v16 }
 0x188   :  { %v621_v41 = vmul.f32 %v557_v29, %v557_v29 }
 0x189   :  { %v622_v44 = vmul.f32 %v558_v37, %v558_v37  ;;  %v432_v45 = vpop.f32.mrb[40].mxu0  ;;  %1392 = vmatprep.mubr.bf16.mxu1 %v1053_v39  ;;  %v4449_v46 = vadd.f32 %v620_v33, %v619_v27  ;;  %v4475_v27 = vpop.permute.xlu0 %2726 }
 0x18a   :  { %v433_v47 = vadd.f32 %v432_v45, %v4282_v35  ;;  %v434_v50 = vpop.f32.mrb[41].mxu0  ;;  %1393 = vmatmul.mubr.bf16.gmra.mrb[36].mxu1 %v1052_v31  ;;  %v4481_v39 = vpop.permute.xlu1 %2543 }
 0x18b   :  { %v435_v52 = vadd.f32 %v434_v50, %v4285_v36  ;;  %v436_v53 = vpop.f32.mrb[42].mxu0  ;;  %v4453_v56 = vadd.f32 %v622_v44, %v621_v41 }
 0x18c   :  { %v559_v58 = vsub.f32 %v433_v47, %v4304_v61  ;;  %v437_v59 = vadd.f32 %v436_v53, %v4282_v35  ;;  %v438_v60 = vpop.f32.mrb[43].mxu0 }
 0x18d   :  { %v560_v63 = vsub.f32 %v435_v52, %v4307_v62  ;;  %v439_v1 = vadd.f32 %v438_v60, %v4285_v36 }
 0x18e   :  { %v623_v5 = vmul.f32 %v559_v58, %v559_v58  ;;  %v561_v6 = vsub.f32 %v437_v59, %v4304_v61  ;;  %v1054_v7 = vpack.c.bf16 %v437_v59, %v433_v47 }
 0x18f   :  { %v624_v13 = vmul.f32 %v560_v63, %v560_v63  ;;  %v562_v14 = vsub.f32 %v439_v1, %v4307_v62  ;;  %v1055_v16 = vpack.c.bf16 %v439_v1, %v435_v52  ;;  %v4488_v1 = vpop.permute.xlu0 %2540 }
 0x190   :  { %v625_v17 = vmul.f32 %v561_v6, %v561_v6  ;;  %v4493_v6 = vpop.permute.xlu1 %2735 }
 0x191   :  { %v626_v20 = vmul.f32 %v562_v14, %v562_v14  ;;  %v442_v21 = vpop.f32.mrb[44].mxu0  ;;  %1402 = vmatprep.mubr.bf16.mxu1 %v1055_v16  ;;  %v4471_v22 = vadd.f32 %v624_v13, %v623_v5 }
 0x192   :  { %v443_v23 = vadd.f32 %v442_v21, %v4282_v35  ;;  %v444_v24 = vpop.f32.mrb[45].mxu0  ;;  %1403 = vmatmul.mubr.bf16.gmra.mrb[40].mxu1 %v1054_v7 }
 0x193   :  { %v445_v25 = vadd.f32 %v444_v24, %v4285_v36  ;;  %v446_v26 = vpop.f32.mrb[46].mxu0  ;;  %v4477_v29 = vadd.f32 %v626_v20, %v625_v17 }
 0x194   :  { %v563_v31 = vsub.f32 %v443_v23, %v4304_v61  ;;  %v447_v33 = vadd.f32 %v446_v26, %v4282_v35  ;;  %v448_v37 = vpop.f32.mrb[47].mxu0 }
 0x195   :  { %v564_v41 = vsub.f32 %v445_v25, %v4307_v62  ;;  %v449_v44 = vadd.f32 %v448_v37, %v4285_v36  ;;  %v4505_v37 = vpop.permute.xlu0 %2732 }
 0x196   :  { %v627_v45 = vmul.f32 %v563_v31, %v563_v31  ;;  %v565_v47 = vsub.f32 %v447_v33, %v4304_v61  ;;  %v1056_v50 = vpack.c.bf16 %v447_v33, %v443_v23 }
 0x197   :  { %v628_v52 = vmul.f32 %v564_v41, %v564_v41  ;;  %v566_v53 = vsub.f32 %v449_v44, %v4307_v62  ;;  %v1057_v58 = vpack.c.bf16 %v449_v44, %v445_v25  ;;  %v4507_v44 = vpop.permute.xlu1 %2549 }
 0x198   :  { %v629_v59 = vmul.f32 %v565_v47, %v565_v47 }
 0x199   :  { %v630_v60 = vmul.f32 %v566_v53, %v566_v53  ;;  %678 = vadd.xlane.f32.xlu0 %v4355_v51  ;;  %v452_v63 = vpop.f32.mrb[48].mxu0  ;;  %1412 = vmatprep.mubr.bf16.mxu1 %v1057_v58  ;;  %v4490_v3 = vadd.f32 %v628_v52, %v627_v45 }
 0x19a   :  { %v453_v4 = vadd.f32 %v452_v63, %v4282_v35  ;;  %v454_v5 = vpop.f32.mrb[49].mxu0  ;;  %1413 = vmatmul.mubr.bf16.gmra.mrb[44].mxu1 %v1056_v50 }
 0x19b   :  { %v455_v7 = vadd.f32 %v454_v5, %v4285_v36  ;;  %v456_v13 = vpop.f32.mrb[50].mxu0  ;;  %v4496_v14 = vadd.f32 %v630_v60, %v629_v59 }
 0x19c   :  { %v567_v16 = vsub.f32 %v453_v4, %v4304_v61  ;;  %v457_v51 = vadd.f32 %v456_v13, %v4282_v35  ;;  %v458_v17 = vpop.f32.mrb[51].mxu0  ;;  %v4520_v13 = vpop.permute.xlu0 %2546 }
 0x19d   :  { %v568_v20 = vsub.f32 %v455_v7, %v4307_v62  ;;  %v459_v21 = vadd.f32 %v458_v17, %v4285_v36 }
 0x19e   :  { %v631_v23 = vmul.f32 %v567_v16, %v567_v16  ;;  %v569_v24 = vsub.f32 %v457_v51, %v4304_v61  ;;  %v1058_v25 = vpack.c.bf16 %v457_v51, %v453_v4 }
 0x19f   :  { %v632_v26 = vmul.f32 %v568_v20, %v568_v20  ;;  %v570_v31 = vsub.f32 %v459_v21, %v4307_v62  ;;  %v1059_v33 = vpack.c.bf16 %v459_v21, %v455_v7  ;;  %681 = vadd.xlane.f32.xlu1 %v4361_v57  ;;  %v4523_v20 = vpop.permute.xlu1 %2741 }
 0x1a0   :  { %v633_v41 = vmul.f32 %v569_v24, %v569_v24 }
 0x1a1   :  { %v634_v45 = vmul.f32 %v570_v31, %v570_v31  ;;  %v462_v47 = vpop.f32.mrb[52].mxu0  ;;  %1422 = vmatprep.mubr.bf16.mxu1 %v1059_v33  ;;  %v4509_v50 = vadd.f32 %v632_v26, %v631_v23 }
 0x1a2   :  { %v463_v52 = vadd.f32 %v462_v47, %v4282_v35  ;;  %v464_v53 = vpop.f32.mrb[53].mxu0  ;;  %1423 = vmatmul.mubr.bf16.gmra.mrb[48].mxu1 %v1058_v25 }
 0x1a3   :  { %v465_v58 = vadd.f32 %v464_v53, %v4285_v36  ;;  %687 = vadd.xlane.f32.xlu1 %v4378_v18  ;;  %v466_v59 = vpop.f32.mrb[54].mxu0  ;;  %v4514_v57 = vadd.f32 %v634_v45, %v633_v41 }
 0x1a4   :  { %v571_v60 = vsub.f32 %v463_v52, %v4304_v61  ;;  %v467_v63 = vadd.f32 %v466_v59, %v4282_v35  ;;  %v468_v4 = vpop.f32.mrb[55].mxu0  ;;  %v2699_v59 = vsel %vm2667_vm4, 1, %v5472_v0  ;;  %vm2810_vm4 = vcmp.eq.s32.totalorder %v4391_v30, 1 }
 0x1a5   :  { %v572_v5 = vsub.f32 %v465_v58, %v4307_v62  ;;  %v469_v7 = vadd.f32 %v468_v4, %v4285_v36 }
 0x1a6   :  { %v635_v16 = vmul.f32 %v571_v60, %v571_v60  ;;  %v573_v51 = vsub.f32 %v467_v63, %v4304_v61  ;;  %v1060_v17 = vpack.c.bf16 %v467_v63, %v463_v52  ;;  %v4533_v52 = vpop.permute.xlu0 %2738  ;;  %v4540_v60 = vpop.permute.xlu1 %2555 }
 0x1a7   :  { %v636_v18 = vmul.f32 %v572_v5, %v572_v5  ;;  %v574_v21 = vsub.f32 %v469_v7, %v4307_v62  ;;  %v1061_v23 = vpack.c.bf16 %v469_v7, %v465_v58  ;;  %693 = vadd.xlane.f32.xlu1 %v4407_v49 }
 0x1a8   :  { %v637_v24 = vmul.f32 %v573_v51, %v573_v51 }
 0x1a9   :  { %v638_v25 = vmul.f32 %v574_v21, %v574_v21  ;;  %v472_v26 = vpop.f32.mrb[56].mxu0  ;;  %1432 = vmatprep.mubr.bf16.mxu1 %v1061_v23  ;;  %v4528_v31 = vadd.f32 %v636_v18, %v635_v16 }
 0x1aa   :  { %v473_v33 = vadd.f32 %v472_v26, %v4282_v35  ;;  %v474_v41 = vpop.f32.mrb[57].mxu0  ;;  %1433 = vmatmul.mubr.bf16.gmra.mrb[52].mxu1 %v1060_v17 }
 0x1ab   :  { %v475_v45 = vadd.f32 %v474_v41, %v4285_v36  ;;  %699 = vadd.xlane.f32.xlu1 %v4431_v19  ;;  %v476_v47 = vpop.f32.mrb[58].mxu0  ;;  %v4535_v49 = vadd.f32 %v638_v25, %v637_v24  ;;  %v4547_v24 = vpop.permute.xlu0 %2552 }
 0x1ac   :  { %v575_v53 = vsub.f32 %v473_v33, %v4304_v61  ;;  %v477_v58 = vadd.f32 %v476_v47, %v4282_v35  ;;  %v478_v38 = vpop.f32.mrb[59].mxu0 }
 0x1ad   :  { %v576_v63 = vsub.f32 %v475_v45, %v4307_v62  ;;  %v479_v4 = vadd.f32 %v478_v38, %v4285_v36 }
 0x1ae   :  { %v639_v5 = vmul.f32 %v575_v53, %v575_v53  ;;  %v577_v19 = vsub.f32 %v477_v58, %v4304_v61  ;;  %v1062_v7 = vpack.c.bf16 %v477_v58, %v473_v33  ;;  %v4552_v33 = vpop.permute.xlu1 %2747 }
 0x1af   :  { %v640_v16 = vmul.f32 %v576_v63, %v576_v63  ;;  %v578_v51 = vsub.f32 %v479_v4, %v4307_v62  ;;  %v1063_v17 = vpack.c.bf16 %v479_v4, %v475_v45  ;;  %705 = vadd.xlane.f32.xlu1 %v4453_v56  ;;  %2768 = vperm.xlu0 %3430, %v2699_v59  }
 0x1b0   :  { %v641_v18 = vmul.f32 %v577_v19, %v577_v19 }
 0x1b1   :  { %v642_v21 = vmul.f32 %v578_v51, %v578_v51  ;;  %v482_v23 = vpop.f32.mrb[60].mxu0  ;;  %1442 = vmatprep.mubr.bf16.mxu1 %v1063_v17  ;;  %v4549_v25 = vadd.f32 %v640_v16, %v639_v5  ;;  %v4565_v51 = vpop.permute.xlu0 %2744 }
 0x1b2   :  { %v483_v26 = vadd.f32 %v482_v23, %v4282_v35  ;;  %v484_v41 = vpop.f32.mrb[61].mxu0  ;;  %1443 = vmatmul.mubr.bf16.gmra.mrb[56].mxu1 %v1062_v7 }
 0x1b3   :  { %v485_v47 = vadd.f32 %v484_v41, %v4285_v36  ;;  %711 = vadd.xlane.f32.xlu1 %v4477_v29  ;;  %v486_v56 = vpop.f32.mrb[62].mxu0  ;;  %v4556_v45 = vadd.f32 %v642_v21, %v641_v18  ;;  %v4567_v18 = vpop.permute.xlu1 %2561 }
 0x1b4   :  { %v579_v53 = vsub.f32 %v483_v26, %v4304_v61  ;;  %v487_v58 = vadd.f32 %v486_v56, %v4282_v35  ;;  %v488_v38 = vpop.f32.mrb[63].mxu0 }
 0x1b5   :  { %v580_v59 = vsub.f32 %v485_v47, %v4307_v62  ;;  %v489_v63 = vadd.f32 %v488_v38, %v4285_v36 }
 0x1b6   :  { %v643_v4 = vmul.f32 %v579_v53, %v579_v53  ;;  %v581_v5 = vsub.f32 %v487_v58, %v4304_v61  ;;  %v1064_v19 = vpack.c.bf16 %v487_v58, %v483_v26  ;;  %v4574_v61 = vpop.permute.xlu0 %2558  ;;  %v2509_v26 = vld [vmem:[%s5459_s1 + $0xb0] sm:$0xff] }
 0x1b7   :  { %v644_v7 = vmul.f32 %v580_v59, %v580_v59  ;;  %v582_v16 = vsub.f32 %v489_v63, %v4307_v62  ;;  %v1065_v29 = vpack.c.bf16 %v489_v63, %v485_v47  ;;  %717 = vadd.xlane.f32.xlu1 %v4496_v14  ;;  %v4576_v62 = vpop.permute.xlu1 %2753 }
 0x1b8   :  { %v645_v17 = vmul.f32 %v581_v5, %v581_v5 }
 0x1b9   :  { %v646_v35 = vmul.f32 %v582_v16, %v582_v16  ;;  %1452 = vmatprep.mubr.bf16.mxu1 %v1065_v29  ;;  %v4569_v21 = vadd.f32 %v644_v7, %v643_v4 }
 0x1ba   :  { %1453 = vmatmul.mubr.bf16.gmra.mrb[60].mxu1 %v1064_v19  ;;  %v4578_v23 = vpop.permute.xlu0 %2750 }
 0x1bb   :  { %723 = vadd.xlane.f32.xlu1 %v4514_v57  ;;  %v4572_v36 = vadd.f32 %v646_v35, %v645_v17  ;;  %v4580_v14 = vpop.permute.xlu1 %2567 }
 0x1be   :  { %v4585_v41 = vpop.permute.xlu0 %2564 }
 0x1bf   :  { %v4587_v47 = vpop.permute.xlu1 %2759 }
 0x1c2   :  { %v4590_v57 = vpop.permute.xlu0 %2756 }
 0x1c3   :  { %v4592_v56 = vpop.permute.xlu1 %2573 }
 0x1c6   :  { %v4595_v53 = vpop.permute.xlu0 %2570 }
 0x1c7   :  { %v4598_v58 = vpop.permute.xlu1 %2765 }
 0x1ca   :  { %v4601_v38 = vpop.permute.xlu0 %2762 }
 0x1cc   :  { %2588 = vperm.xlu1 %3429, %v2509_v26  }
 0x1ce   :  { %684 = vadd.xlane.f32.xlu0 %v4371_v12 }
 0x1d2   :  { %690 = vadd.xlane.f32.xlu0 %v4400_v43 }
 0x1d6   :  { %696 = vadd.xlane.f32.xlu0 %v4425_v11 }
 0x1da   :  { %702 = vadd.xlane.f32.xlu0 %v4449_v46 }
 0x1dc   :  { %v655_v59 = vpop.xlane.xlu1 %654 }
 0x1dd   :  { %v745_v63 = vadd.f32 1e-12, %v655_v59 }
 0x1de   :  { %708 = vadd.xlane.f32.xlu0 %v4471_v22 }
 0x1df   :  { %3525 = vrsqrt.f32 %v745_v63 }
 0x1e0   :  { %v658_v12 = vpop.xlane.xlu1 %657 }
 0x1e1   :  { %v649_v4 = vpop.xlane.xlu0 %648  ;;  %v746_v5 = vadd.f32 1e-12, %v658_v12 }
 0x1e2   :  { %v743_v19 = vadd.f32 1e-12, %v649_v4 }
 0x1e3   :  { %3527 = vrsqrt.f32 %v746_v5 }
 0x1e4   :  { %3529 = vrsqrt.f32 %v743_v19  ;;  %v664_v43 = vpop.xlane.xlu1 %663  ;;  %vm777_vm6 = vcmp.eq.f32.partialorder %v743_v19, inf  ;;  %v780_v5 = vand.u32 2147483648, %v743_v19  ;;  %vm779_vm7 = vcmp.eq.f32.partialorder %v743_v19, 0.0 }
 0x1e5   :  { %v652_v7 = vpop.xlane.xlu0 %651  ;;  %v748_v11 = vadd.f32 1e-12, %v664_v43 }
 0x1e6   :  { %v744_v16 = vadd.f32 1e-12, %v652_v7 }
 0x1e7   :  { %3531 = vrsqrt.f32 %v748_v11 }
 0x1e8   :  { %3533 = vrsqrt.f32 %v744_v16  ;;  %v4608_v16 = vld [vmem:[%s5459_s1 + $0xa0] sm:$0xff] }
 0x1e9   :  { %v3526_v46 = vpop.eup %3525  ;;  %v661_v29 = vpop.xlane.xlu0 %660  ;;  %vm2669_vm14 = vcmp.ge.s32.totalorder %v4608_v16, 0 }
 0x1ea   :  { %v747_v17 = vadd.f32 1e-12, %v661_v29  ;;  %v670_v35 = vpop.xlane.xlu1 %669 }
 0x1eb   :  { %v750_v26 = vadd.f32 1e-12, %v670_v35 }
 0x1ec   :  { %3535 = vrsqrt.f32 %v747_v17 }
 0x1ed   :  { %v3528_v22 = vpop.eup %3527  ;;  %v667_v59 = vpop.xlane.xlu0 %666  ;;  %3537 = vrsqrt.f32 %v750_v26 }
 0x1ee   :  { %v3530_v63 = vpop.eup %3529  ;;  %v749_v12 = vadd.f32 1e-12, %v667_v59  ;;  %v2511_v59 = vld [vmem:[%s5459_s1 + $0xc0] sm:$0xff] }
 0x1ef   :  { %v776_v4 = vmul.f32 %v3530_v63, %v743_v19  ;;  %vm2673_vm8 = vcmp.ge.s32.totalorder %v2511_v59, 0 }
 0x1f0   :  { %3539 = vrsqrt.f32 %v749_v12  ;;  %729 = vadd.xlane.f32.xlu1 %v4535_v49 }
 0x1f1   :  { %v3532_v43 = vpop.eup %3531  ;;  %v778_v7 = vsel %vm777_vm6, %v743_v19, %v776_v4  ;;  %v673_v11 = vpop.xlane.xlu0 %672  ;;  %v2512_v4 = vld [vmem:[%s5459_s1 + $0xc8] sm:$0xff] }
 0x1f2   :  { %v3534_v46 = vpop.eup %3533  ;;  %v781_v29 = vsel %vm779_vm7, %v780_v5, %v778_v7  ;;  %v751_v17 = vadd.f32 1e-12, %v673_v11  ;;  %v676_v35 = vpop.xlane.xlu1 %675  ;;  %v2705_v5 = vsel %vm2673_vm8, 1, %v5472_v0  ;;  %vm2674_vm9 = vcmp.ge.s32.totalorder %v2512_v4, 0  ;;  %v2514_v7 = vld [vmem:[%s5459_s1 + $0xd8] sm:$0xff] }
 0x1f3   :  { %1002 = vst.msk [vmem:[#allocation3] sm:$0xff] %vm1001_vm5, %v781_v29  ;;  %v752_v26 = vadd.f32 1e-12, %v676_v35  ;;  %v2706_v43 = vsel %vm2674_vm9, 1, %v5472_v0  ;;  %vm2676_vm11 = vcmp.ge.s32.totalorder %v2514_v7, 0  ;;  %v2515_v46 = vld [vmem:[%s5459_s1 + $0xe0] sm:$0xff] }
 0x1f4   :  { %3541 = vrsqrt.f32 %v751_v17  ;;  %735 = vadd.xlane.f32.xlu1 %v4556_v45  ;;  %2582 = vperm.xlu0 %3430, %v4608_v16   ;;  %v2513_v45 = vld [vmem:[%s5459_s1 + $0xd0] sm:$0xff]  ;;  %v2708_v29 = vsel %vm2676_vm11, 1, %v5472_v0  ;;  %vm2677_vm12 = vcmp.ge.s32.totalorder %v2515_v46, 0  ;;  %v2516_v35 = vld [vmem:[%s5459_s1 + $0xe8] sm:$0xff]  ;;  %vm2811_vm8 = vcmp.eq.s32.totalorder %v4445_v40, 1 }
 0x1f5   :  { %3543 = vrsqrt.f32 %v752_v26  ;;  %vm2675_vm10 = vcmp.ge.s32.totalorder %v2513_v45, 0  ;;  %v1098_v17 = vld [vmem:[#allocation11] sm:$0x3]  ;;  %vm2678_vm13 = vcmp.ge.s32.totalorder %v2516_v35, 0 }
 0x1f6   :  { %v3536_v49 = vpop.eup %3535  ;;  %v2707_v11 = vsel %vm2675_vm10, 1, %v5472_v0  ;;  %v4636_v26 = vrot.slane %v1098_v17, %v4277_v32  ;;  %v4650_v28 = vpop.permute.xlu1 %2579 }
 0x1f7   :  { %v3538_v19 = vpop.eup %3537  ;;  %v2709_v49 = vsel %vm2677_vm12, 1, %v5472_v0  ;;  %5526 = vst [vmem:[#allocation24_spill] sm:$0xff] %v4650_v28  ;;  %vm2812_vm12 = vcmp.eq.s32.totalorder %v4428_v15, 1 }
 0x1f8   :  { %v4640_v19 = vrot.slane %v1098_v17, %v4279_v34 }
 0x1fa   :  { %v3540_v22 = vpop.eup %3539 }
 0x1fe   :  { %v3542_v63 = vpop.eup %3541 }
 0x1ff   :  { %v3544_v12 = vpop.eup %3543 }
 0x200   :  { %v2710_v12 = vsel %vm2678_vm13, 1, %v5472_v0 }
 0x205   :  { %2786 = vperm.xlu1 %3429, %v2705_v5  }
 0x209   :  { %2789 = vperm.xlu1 %3429, %v2706_v43  }
 0x20d   :  { %2792 = vperm.xlu1 %3429, %v2707_v11  }
 0x211   :  { %2795 = vperm.xlu1 %3429, %v2708_v29  }
 0x213   :  { %714 = vadd.xlane.f32.xlu0 %v4490_v3 }
 0x215   :  { %2798 = vperm.xlu1 %3429, %v2709_v49   ;;  %v1304_v22 = vpop.f32.mrb[0].mxu1 }
 0x216   :  { %v1305_v59 = vadd.f32 %v1304_v22, %v4636_v26  ;;  %v1306_v63 = vpop.f32.mrb[1].mxu1 }
 0x217   :  { %v1307_v4 = vadd.f32 %v1306_v63, %v4640_v19  ;;  %v1308_v5 = vpop.f32.mrb[2].mxu1 }
 0x218   :  { %v1309_v32 = vadd.f32 %v1308_v5, %v4636_v26  ;;  %v1310_v45 = vpop.f32.mrb[3].mxu1  ;;  %v1463_v34 = vmax.f32 %v1305_v59, 0.0  ;;  %v4653_v59 = vpop.permute.xlu0 %2576 }
 0x219   :  { %v1311_v43 = vadd.f32 %v1310_v45, %v4640_v19  ;;  %2801 = vperm.xlu1 %3429, %v2710_v12   ;;  %v1464_v3 = vmax.f32 %v1307_v4, 0.0  ;;  %5527 = vst [vmem:[#allocation25_spill] sm:$0xff] %v4653_v59 }
 0x21a   :  { %v1465_v7 = vmax.f32 %v1309_v32, 0.0 }
 0x21b   :  { %v1466_v11 = vmax.f32 %v1311_v43, 0.0 }
 0x21c   :  { %v1527_v46 = vpack.c.bf16 %v1465_v7, %v1463_v34 }
 0x21d   :  { %v1528_v29 = vpack.c.bf16 %v1466_v11, %v1464_v3  ;;  %v1314_v17 = vpop.f32.mrb[4].mxu1 }
 0x21e   :  { %v1315_v35 = vadd.f32 %v1314_v17, %v4636_v26  ;;  %v1316_v49 = vpop.f32.mrb[5].mxu1 }
 0x21f   :  { %v1317_v22 = vadd.f32 %v1316_v49, %v4640_v19  ;;  %v1318_v63 = vpop.f32.mrb[6].mxu1  ;;  %1726 = vmatprep.mubr.bf16.mxu0 %v1528_v29  ;;  %v4657_v29 = vpop.permute.xlu1 %2771 }
 0x220   :  { %v1319_v5 = vadd.f32 %v1318_v63, %v4636_v26  ;;  %v1320_v45 = vpop.f32.mrb[7].mxu1  ;;  %1727 = vmatmul.mubr.bf16.vlgmr.msra.gmra.mrb[64].mxu0 %v1527_v46  ;;  %v1467_v4 = vmax.f32 %v1315_v35, 0.0  ;;  %5528 = vst [vmem:[#allocation26_spill] sm:$0xff] %v4657_v29  ;;  %v2701_v46 = vsel %vm2669_vm14, 1, %v5472_v0 }
 0x221   :  { %v1321_v12 = vadd.f32 %v1320_v45, %v4640_v19  ;;  %v1468_v43 = vmax.f32 %v1317_v22, 0.0 }
 0x222   :  { %v1469_v32 = vmax.f32 %v1319_v5, 0.0 }
 0x223   :  { %v1470_v34 = vmax.f32 %v1321_v12, 0.0 }
 0x224   :  { %v1529_v7 = vpack.c.bf16 %v1469_v32, %v1467_v4 }
 0x225   :  { %v1530_v3 = vpack.c.bf16 %v1470_v34, %v1468_v43  ;;  %v1324_v11 = vpop.f32.mrb[8].mxu1 }
 0x226   :  { %v1325_v17 = vadd.f32 %v1324_v11, %v4636_v26  ;;  %v679_v49 = vpop.xlane.xlu0 %678  ;;  %v1326_v63 = vpop.f32.mrb[9].mxu1 }
 0x227   :  { %v753_v28 = vadd.f32 1e-12, %v679_v49  ;;  %v1328_v59 = vpop.f32.mrb[10].mxu1  ;;  %1734 = vmatprep.mubr.bf16.mxu0 %v1530_v3  ;;  %v1327_v35 = vadd.f32 %v1326_v63, %v4640_v19 }
 0x228   :  { %v1329_v22 = vadd.f32 %v1328_v59, %v4636_v26  ;;  %v1330_v5 = vpop.f32.mrb[11].mxu1  ;;  %1735 = vmatmul.mubr.bf16.gmra.mrb[68].mxu0 %v1529_v7  ;;  %v1471_v16 = vmax.f32 %v1325_v17, 0.0 }
 0x229   :  { %3545 = vrsqrt.f32 %v753_v28  ;;  %2774 = vperm.xlu0 %3430, %v2701_v46   ;;  %v1331_v12 = vadd.f32 %v1330_v5, %v4640_v19  ;;  %v1472_v4 = vmax.f32 %v1327_v35, 0.0 }
 0x22a   :  { %v1473_v45 = vmax.f32 %v1329_v22, 0.0 }
 0x22b   :  { %v1474_v43 = vmax.f32 %v1331_v12, 0.0 }
 0x22c   :  { %v1531_v32 = vpack.c.bf16 %v1473_v45, %v1471_v16  ;;  %v682_v34 = vpop.xlane.xlu1 %681  ;;  %v3517_v45 = vld [vmem:[%s5466_s8] sm:$0xff]  }
 0x22d   :  { %v754_v11 = vadd.f32 1e-12, %v682_v34  ;;  %v1334_v49 = vpop.f32.mrb[12].mxu1  ;;  %v1532_v0 = vpack.c.bf16 %v1474_v43, %v1472_v4  ;;  %3361 = vmatprep.subr.bf16.mxu1 %v3517_v45 }
 0x22e   :  { %v1335_v3 = vadd.f32 %v1334_v49, %v4636_v26  ;;  %v1336_v63 = vpop.f32.mrb[13].mxu1  ;;  %3362 = vmatpush3.bf16.msra.mxu1 %v3517_v45 }
 0x22f   :  { %3547 = vrsqrt.f32 %v754_v11  ;;  %v1338_v59 = vpop.f32.mrb[14].mxu1  ;;  %v1337_v7 = vadd.f32 %v1336_v63, %v4640_v19  ;;  %1742 = vmatprep.mubr.bf16.mxu0 %v1532_v0 }
 0x230   :  { %v1339_v28 = vadd.f32 %v1338_v59, %v4636_v26  ;;  %v688_v17 = vpop.xlane.xlu1 %687  ;;  %v1340_v46 = vpop.f32.mrb[15].mxu1  ;;  %1743 = vmatmul.mubr.bf16.gmra.mrb[72].mxu0 %v1531_v32  ;;  %v1475_v5 = vmax.f32 %v1335_v3, 0.0 }
 0x231   :  { %v756_v22 = vadd.f32 1e-12, %v688_v17  ;;  %v1341_v35 = vadd.f32 %v1340_v46, %v4640_v19  ;;  %v1476_v4 = vmax.f32 %v1337_v7, 0.0 }
 0x232   :  { %v1477_v16 = vmax.f32 %v1339_v28, 0.0 }
 0x233   :  { %v3546_v12 = vpop.eup %3545  ;;  %3549 = vrsqrt.f32 %v756_v22  ;;  %v1478_v34 = vmax.f32 %v1341_v35, 0.0 }
 0x234   :  { %v1533_v43 = vpack.c.bf16 %v1477_v16, %v1475_v5  ;;  %v694_v11 = vpop.xlane.xlu1 %693 }
 0x235   :  { %v758_v0 = vadd.f32 1e-12, %v694_v11  ;;  %v1344_v49 = vpop.f32.mrb[16].mxu1  ;;  %v1534_v63 = vpack.c.bf16 %v1478_v34, %v1476_v4 }
 0x236   :  { %v1345_v59 = vadd.f32 %v1344_v49, %v4636_v26  ;;  %v1346_v32 = vpop.f32.mrb[17].mxu1 }
 0x237   :  { %3551 = vrsqrt.f32 %v758_v0  ;;  %v1348_v3 = vpop.f32.mrb[18].mxu1  ;;  %v1347_v28 = vadd.f32 %v1346_v32, %v4640_v19  ;;  %1750 = vmatprep.mubr.bf16.mxu0 %v1534_v63 }
 0x238   :  { %v1349_v17 = vadd.f32 %v1348_v3, %v4636_v26  ;;  %v700_v46 = vpop.xlane.xlu1 %699  ;;  %v1350_v7 = vpop.f32.mrb[19].mxu1  ;;  %1751 = vmatmul.mubr.bf16.gmra.mrb[76].mxu0 %v1533_v43  ;;  %v1479_v16 = vmax.f32 %v1345_v59, 0.0 }
 0x239   :  { %v3548_v22 = vpop.eup %3547  ;;  %v760_v35 = vadd.f32 1e-12, %v700_v46  ;;  %v1351_v5 = vadd.f32 %v1350_v7, %v4640_v19  ;;  %v1480_v12 = vmax.f32 %v1347_v28, 0.0 }
 0x23a   :  { %v1481_v45 = vmax.f32 %v1349_v17, 0.0 }
 0x23b   :  { %3553 = vrsqrt.f32 %v760_v35  ;;  %v1482_v34 = vmax.f32 %v1351_v5, 0.0 }
 0x23c   :  { %v1535_v4 = vpack.c.bf16 %v1481_v45, %v1479_v16  ;;  %v706_v11 = vpop.xlane.xlu1 %705 }
 0x23d   :  { %v3550_v0 = vpop.eup %3549  ;;  %v762_v49 = vadd.f32 1e-12, %v706_v11  ;;  %741 = vadd.xlane.f32.xlu1 %v4572_v36  ;;  %v1354_v32 = vpop.f32.mrb[20].mxu1  ;;  %v1536_v63 = vpack.c.bf16 %v1482_v34, %v1480_v12 }
 0x23e   :  { %v1355_v3 = vadd.f32 %v1354_v32, %v4636_v26  ;;  %v1356_v22 = vpop.f32.mrb[21].mxu1 }
 0x23f   :  { %3555 = vrsqrt.f32 %v762_v49  ;;  %v1358_v46 = vpop.f32.mrb[22].mxu1  ;;  %v1357_v43 = vadd.f32 %v1356_v22, %v4640_v19  ;;  %1758 = vmatprep.mubr.bf16.mxu0 %v1536_v63 }
 0x240   :  { %v1359_v59 = vadd.f32 %v1358_v46, %v4636_v26  ;;  %v712_v28 = vpop.xlane.xlu1 %711  ;;  %v1360_v17 = vpop.f32.mrb[23].mxu1  ;;  %1759 = vmatmul.mubr.bf16.gmra.mrb[80].mxu0 %v1535_v4  ;;  %v1483_v36 = vmax.f32 %v1355_v3, 0.0 }
 0x241   :  { %v3552_v7 = vpop.eup %3551  ;;  %v764_v35 = vadd.f32 1e-12, %v712_v28  ;;  %v1361_v5 = vadd.f32 %v1360_v17, %v4640_v19  ;;  %v1484_v45 = vmax.f32 %v1357_v43, 0.0 }
 0x242   :  { %v1485_v16 = vmax.f32 %v1359_v59, 0.0 }
 0x243   :  { %3557 = vrsqrt.f32 %v764_v35  ;;  %v1486_v34 = vmax.f32 %v1361_v5, 0.0 }
 0x244   :  { %v1537_v12 = vpack.c.bf16 %v1485_v16, %v1483_v36  ;;  %v718_v11 = vpop.xlane.xlu1 %717 }
 0x245   :  { %v3554_v0 = vpop.eup %3553  ;;  %v766_v49 = vadd.f32 1e-12, %v718_v11  ;;  %v1364_v32 = vpop.f32.mrb[24].mxu1  ;;  %v1538_v22 = vpack.c.bf16 %v1486_v34, %v1484_v45 }
 0x246   :  { %v1365_v63 = vadd.f32 %v1364_v32, %v4636_v26  ;;  %v1366_v46 = vpop.f32.mrb[25].mxu1 }
 0x247   :  { %3559 = vrsqrt.f32 %v766_v49  ;;  %v1368_v7 = vpop.f32.mrb[26].mxu1  ;;  %v1367_v28 = vadd.f32 %v1366_v46, %v4640_v19  ;;  %1766 = vmatprep.mubr.bf16.mxu0 %v1538_v22 }
 0x248   :  { %v1369_v4 = vadd.f32 %v1368_v7, %v4636_v26  ;;  %v724_v3 = vpop.xlane.xlu1 %723  ;;  %720 = vadd.xlane.f32.xlu0 %v4509_v50  ;;  %v1370_v43 = vpop.f32.mrb[27].mxu1  ;;  %1767 = vmatmul.mubr.bf16.gmra.mrb[84].mxu0 %v1537_v12  ;;  %v1487_v5 = vmax.f32 %v1365_v63, 0.0 }
 0x249   :  { %v3556_v59 = vpop.eup %3555  ;;  %v768_v17 = vadd.f32 1e-12, %v724_v3  ;;  %v1371_v35 = vadd.f32 %v1370_v43, %v4640_v19  ;;  %v1488_v16 = vmax.f32 %v1367_v28, 0.0 }
 0x24a   :  { %v1489_v36 = vmax.f32 %v1369_v4, 0.0 }
 0x24b   :  { %3561 = vrsqrt.f32 %v768_v17  ;;  %v1490_v34 = vmax.f32 %v1371_v35, 0.0 }
 0x24c   :  { %v1539_v45 = vpack.c.bf16 %v1489_v36, %v1487_v5 }
 0x24d   :  { %v3558_v11 = vpop.eup %3557  ;;  %v1374_v0 = vpop.f32.mrb[28].mxu1  ;;  %v1540_v49 = vpack.c.bf16 %v1490_v34, %v1488_v16 }
 0x24e   :  { %v1375_v32 = vadd.f32 %v1374_v0, %v4636_v26  ;;  %v1376_v22 = vpop.f32.mrb[29].mxu1  ;;  %v4690_v11 = vpop.permute.xlu0 %2768 }
 0x24f   :  { %v1377_v50 = vadd.f32 %v1376_v22, %v4640_v19  ;;  %v1378_v46 = vpop.f32.mrb[30].mxu1  ;;  %1774 = vmatprep.mubr.bf16.mxu0 %v1540_v49 }
 0x250   :  { %v1379_v7 = vadd.f32 %v1378_v46, %v4636_v26  ;;  %v1380_v3 = vpop.f32.mrb[31].mxu1  ;;  %1775 = vmatmul.mubr.bf16.gmra.mrb[88].mxu0 %v1539_v45  ;;  %v1491_v28 = vmax.f32 %v1375_v32, 0.0 }
 0x251   :  { %v3560_v12 = vpop.eup %3559  ;;  %v1381_v63 = vadd.f32 %v1380_v3, %v4640_v19  ;;  %v1492_v43 = vmax.f32 %v1377_v50, 0.0 }
 0x252   :  { %v1493_v4 = vmax.f32 %v1379_v7, 0.0 }
 0x253   :  { %v1494_v59 = vmax.f32 %v1381_v63, 0.0  ;;  %v4698_v63 = vld [vmem:[%s5459_s1 + $0xa8] sm:$0xff] }
 0x254   :  { %v1541_v17 = vpack.c.bf16 %v1493_v4, %v1491_v28  ;;  %vm2670_vm15 = vcmp.ge.s32.totalorder %v4698_v63, 0 }
 0x255   :  { %v3562_v35 = vpop.eup %3561  ;;  %v1542_v5 = vpack.c.bf16 %v1494_v59, %v1492_v43  ;;  %v1384_v36 = vpop.f32.mrb[32].mxu1  ;;  %v3518_v43 = vld [vmem:[%s5466_s8 + $0x8] sm:$0xff]  }
 0x256   :  { %v1385_v16 = vadd.f32 %v1384_v36, %v4636_v26  ;;  %v1386_v34 = vpop.f32.mrb[33].mxu1  ;;  %3363 = vmatprep.subr.bf16.mxu1 %v3518_v43 }
 0x257   :  { %v1387_v0 = vadd.f32 %v1386_v34, %v4640_v19  ;;  %v1388_v49 = vpop.f32.mrb[34].mxu1  ;;  %1782 = vmatprep.mubr.bf16.mxu0 %v1542_v5  ;;  %3364 = vmatpush3.bf16.msra.mxu1 %v3518_v43 }
 0x258   :  { %v1389_v22 = vadd.f32 %v1388_v49, %v4636_v26  ;;  %v1390_v45 = vpop.f32.mrb[35].mxu1  ;;  %1783 = vmatmul.mubr.bf16.gmra.mrb[92].mxu0 %v1541_v17  ;;  %v1495_v50 = vmax.f32 %v1385_v16, 0.0 }
 0x259   :  { %v1391_v32 = vadd.f32 %v1390_v45, %v4640_v19  ;;  %v1496_v7 = vmax.f32 %v1387_v0, 0.0 }
 0x25a   :  { %v1497_v46 = vmax.f32 %v1389_v22, 0.0 }
 0x25b   :  { %v1498_v3 = vmax.f32 %v1391_v32, 0.0  ;;  %v685_v12 = vpop.xlane.xlu0 %684 }
 0x25c   :  { %v1543_v28 = vpack.c.bf16 %v1497_v46, %v1495_v50  ;;  %v755_v4 = vadd.f32 1e-12, %v685_v12 }
 0x25d   :  { %v1544_v59 = vpack.c.bf16 %v1498_v3, %v1496_v7  ;;  %v1394_v35 = vpop.f32.mrb[36].mxu1 }
 0x25e   :  { %3563 = vrsqrt.f32 %v755_v4  ;;  %2585 = vperm.xlu0 %3430, %v4698_v63   ;;  %v1396_v17 = vpop.f32.mrb[37].mxu1  ;;  %v1395_v5 = vadd.f32 %v1394_v35, %v4636_v26 }
 0x25f   :  { %v1397_v36 = vadd.f32 %v1396_v17, %v4640_v19  ;;  %v691_v16 = vpop.xlane.xlu0 %690  ;;  %v1398_v34 = vpop.f32.mrb[38].mxu1  ;;  %1790 = vmatprep.mubr.bf16.mxu0 %v1544_v59 }
 0x260   :  { %v757_v0 = vadd.f32 1e-12, %v691_v16  ;;  %v1399_v49 = vadd.f32 %v1398_v34, %v4636_v26  ;;  %v1400_v22 = vpop.f32.mrb[39].mxu1  ;;  %1791 = vmatmul.mubr.bf16.gmra.mrb[96].mxu0 %v1543_v28  ;;  %v1499_v32 = vmax.f32 %v1395_v5, 0.0  ;;  %v3519_v28 = vld [vmem:[%s5466_s8 + $0x10] sm:$0xff]   ;;  %v3520_v5 = vld [vmem:[%s5466_s8 + $0x18] sm:$0xff]  }
 0x261   :  { %v1401_v45 = vadd.f32 %v1400_v22, %v4640_v19  ;;  %v1500_v50 = vmax.f32 %v1397_v36, 0.0  ;;  %3365 = vmatprep.subr.bf16.mxu1 %v3519_v28 }
 0x262   :  { %3565 = vrsqrt.f32 %v757_v0  ;;  %v1501_v46 = vmax.f32 %v1399_v49, 0.0  ;;  %3366 = vmatpush3.bf16.msra.mxu1 %v3519_v28 }
 0x263   :  { %v1502_v7 = vmax.f32 %v1401_v45, 0.0  ;;  %v697_v3 = vpop.xlane.xlu0 %696  ;;  %3367 = vmatprep.subr.bf16.mxu1 %v3520_v5 }
 0x264   :  { %v759_v12 = vadd.f32 1e-12, %v697_v3  ;;  %v1545_v4 = vpack.c.bf16 %v1501_v46, %v1499_v32 }
 0x265   :  { %v1546_v35 = vpack.c.bf16 %v1502_v7, %v1500_v50  ;;  %v1404_v17 = vpop.f32.mrb[40].mxu1 }
 0x266   :  { %3567 = vrsqrt.f32 %v759_v12  ;;  %v1406_v59 = vpop.f32.mrb[41].mxu1  ;;  %v1405_v43 = vadd.f32 %v1404_v17, %v4636_v26  ;;  %3368 = vmatpush3.bf16.msra.mxu1 %v3520_v5 }
 0x267   :  { %v1407_v16 = vadd.f32 %v1406_v59, %v4640_v19  ;;  %v703_v34 = vpop.xlane.xlu0 %702  ;;  %v1408_v29 = vpop.f32.mrb[42].mxu1  ;;  %1798 = vmatprep.mubr.bf16.mxu0 %v1546_v35 }
 0x268   :  { %v3564_v36 = vpop.eup %3563  ;;  %v761_v0 = vadd.f32 1e-12, %v703_v34  ;;  %v1409_v49 = vadd.f32 %v1408_v29, %v4636_v26  ;;  %v1410_v22 = vpop.f32.mrb[43].mxu1  ;;  %1799 = vmatmul.mubr.bf16.gmra.mrb[100].mxu0 %v1545_v4  ;;  %v1503_v32 = vmax.f32 %v1405_v43, 0.0 }
 0x269   :  { %v1411_v45 = vadd.f32 %v1410_v22, %v4640_v19  ;;  %v1504_v50 = vmax.f32 %v1407_v16, 0.0 }
 0x26a   :  { %3569 = vrsqrt.f32 %v761_v0  ;;  %v1505_v46 = vmax.f32 %v1409_v49, 0.0 }
 0x26b   :  { %v1506_v7 = vmax.f32 %v1411_v45, 0.0  ;;  %v709_v3 = vpop.xlane.xlu0 %708 }
 0x26c   :  { %v3566_v12 = vpop.eup %3565  ;;  %v763_v35 = vadd.f32 1e-12, %v709_v3  ;;  %v1547_v17 = vpack.c.bf16 %v1505_v46, %v1503_v32 }
 0x26d   :  { %v1548_v59 = vpack.c.bf16 %v1506_v7, %v1504_v50  ;;  %v1414_v34 = vpop.f32.mrb[44].mxu1 }
 0x26e   :  { %3571 = vrsqrt.f32 %v763_v35  ;;  %v1416_v29 = vpop.f32.mrb[45].mxu1  ;;  %v1415_v36 = vadd.f32 %v1414_v34, %v4636_v26 }
 0x26f   :  { %v1417_v4 = vadd.f32 %v1416_v29, %v4640_v19  ;;  %v1418_v43 = vpop.f32.mrb[46].mxu1  ;;  %1806 = vmatprep.mubr.bf16.mxu0 %v1548_v59  ;;  %v4724_v29 = vpop.permute.xlu1 %2588 }
 0x270   :  { %v3568_v28 = vpop.eup %3567  ;;  %v1419_v16 = vadd.f32 %v1418_v43, %v4636_v26  ;;  %v1420_v0 = vpop.f32.mrb[47].mxu1  ;;  %1807 = vmatmul.mubr.bf16.gmra.mrb[104].mxu0 %v1547_v17  ;;  %v1507_v22 = vmax.f32 %v1415_v36, 0.0 }
 0x271   :  { %v1421_v49 = vadd.f32 %v1420_v0, %v4640_v19  ;;  %v1508_v32 = vmax.f32 %v1417_v4, 0.0 }
 0x272   :  { %v1509_v45 = vmax.f32 %v1419_v16, 0.0 }
 0x273   :  { %v1510_v50 = vmax.f32 %v1421_v49, 0.0 }
 0x274   :  { %v3570_v46 = vpop.eup %3569  ;;  %v1549_v7 = vpack.c.bf16 %v1509_v45, %v1507_v22  ;;  %v3521_v22 = vld [vmem:[%s5466_s8 + $0x20] sm:$0xff]   ;;  %v3522_v45 = vld [vmem:[%s5466_s8 + $0x28] sm:$0xff]  }
 0x275   :  { %v1550_v5 = vpack.c.bf16 %v1510_v50, %v1508_v32  ;;  %v1424_v3 = vpop.f32.mrb[48].mxu1  ;;  %3369 = vmatprep.subr.bf16.mxu1 %v3521_v22 }
 0x276   :  { %v1425_v12 = vadd.f32 %v1424_v3, %v4636_v26  ;;  %v1426_v35 = vpop.f32.mrb[49].mxu1  ;;  %3370 = vmatpush3.bf16.msra.mxu1 %v3521_v22 }
 0x277   :  { %v1427_v59 = vadd.f32 %v1426_v35, %v4640_v19  ;;  %v1428_v34 = vpop.f32.mrb[50].mxu1  ;;  %1814 = vmatprep.mubr.bf16.mxu0 %v1550_v5  ;;  %3371 = vmatprep.subr.bf16.mxu1 %v3522_v45 }
 0x278   :  { %v3572_v43 = vpop.eup %3571  ;;  %v1429_v17 = vadd.f32 %v1428_v34, %v4636_v26  ;;  %v1430_v36 = vpop.f32.mrb[51].mxu1  ;;  %1815 = vmatmul.mubr.bf16.gmra.mrb[108].mxu0 %v1549_v7  ;;  %v1511_v28 = vmax.f32 %v1425_v12, 0.0 }
 0x279   :  { %v1431_v4 = vadd.f32 %v1430_v36, %v4640_v19  ;;  %v1512_v0 = vmax.f32 %v1427_v59, 0.0 }
 0x27a   :  { %v1513_v16 = vmax.f32 %v1429_v17, 0.0  ;;  %3372 = vmatpush3.bf16.msra.mxu1 %v3522_v45 }
 0x27b   :  { %v1514_v49 = vmax.f32 %v1431_v4, 0.0 }
 0x27c   :  { %v1551_v32 = vpack.c.bf16 %v1513_v16, %v1511_v28 }
 0x27d   :  { %v1552_v50 = vpack.c.bf16 %v1514_v49, %v1512_v0  ;;  %v730_v46 = vpop.xlane.xlu1 %729  ;;  %726 = vadd.xlane.f32.xlu0 %v4528_v31  ;;  %v1434_v5 = vpop.f32.mrb[52].mxu1  ;;  %v3523_v49 = vld [vmem:[%s5466_s8 + $0x30] sm:$0xff]  }
 0x27e   :  { %v770_v7 = vadd.f32 1e-12, %v730_v46  ;;  %v1436_v3 = vpop.f32.mrb[53].mxu1  ;;  %v1435_v12 = vadd.f32 %v1434_v5, %v4636_v26  ;;  %3373 = vmatprep.subr.bf16.mxu1 %v3523_v49 }
 0x27f   :  { %v1437_v35 = vadd.f32 %v1436_v3, %v4640_v19  ;;  %v1438_v59 = vpop.f32.mrb[54].mxu1  ;;  %1822 = vmatprep.mubr.bf16.mxu0 %v1552_v50  ;;  %3374 = vmatpush3.bf16.msra.mxu1 %v3523_v49 }
 0x280   :  { %3573 = vrsqrt.f32 %v770_v7  ;;  %v1440_v34 = vpop.f32.mrb[55].mxu1  ;;  %v1439_v43 = vadd.f32 %v1438_v59, %v4636_v26  ;;  %1823 = vmatmul.mubr.bf16.gmra.mrb[112].mxu0 %v1551_v32  ;;  %v1515_v4 = vmax.f32 %v1435_v12, 0.0  ;;  %v3524_v32 = vld [vmem:[%s5466_s8 + $0x38] sm:$0xff]  }
 0x281   :  { %v1441_v17 = vadd.f32 %v1440_v34, %v4640_v19  ;;  %v736_v31 = vpop.xlane.xlu1 %735  ;;  %v1516_v28 = vmax.f32 %v1437_v35, 0.0  ;;  %3375 = vmatprep.subr.bf16.mxu1 %v3524_v32 }
 0x282   :  { %v772_v36 = vadd.f32 1e-12, %v736_v31  ;;  %v1517_v16 = vmax.f32 %v1439_v43, 0.0 }
 0x283   :  { %v1518_v0 = vmax.f32 %v1441_v17, 0.0  ;;  %3376 = vmatpush3.bf16.msra.mxu1 %v3524_v32 }
 0x284   :  { %3575 = vrsqrt.f32 %v772_v36  ;;  %v1553_v22 = vpack.c.bf16 %v1517_v16, %v1515_v4 }
 0x285   :  { %v1554_v50 = vpack.c.bf16 %v1518_v0, %v1516_v28  ;;  %v1444_v46 = vpop.f32.mrb[56].mxu1 }
 0x286   :  { %v1445_v5 = vadd.f32 %v1444_v46, %v4636_v26  ;;  %v1446_v45 = vpop.f32.mrb[57].mxu1 }
 0x287   :  { %v1447_v7 = vadd.f32 %v1446_v45, %v4640_v19  ;;  %v1448_v3 = vpop.f32.mrb[58].mxu1  ;;  %1830 = vmatprep.mubr.bf16.mxu0 %v1554_v50 }
 0x288   :  { %v1449_v12 = vadd.f32 %v1448_v3, %v4636_v26  ;;  %v1450_v35 = vpop.f32.mrb[59].mxu1  ;;  %1831 = vmatmul.mubr.bf16.gmra.mrb[116].mxu0 %v1553_v22  ;;  %v1519_v43 = vmax.f32 %v1445_v5, 0.0  ;;  %v5529_v3 = vmov 0  }
 0x289   :  { %v1451_v59 = vadd.f32 %v1450_v35, %v4640_v19  ;;  %v1520_v31 = vmax.f32 %v1447_v7, 0.0  ;;  %v2702_v32 = vsel %vm2670_vm15, 1, %v5529_v3  ;;  %vm2813_vm15 = vcmp.eq.s32.totalorder %v4475_v27, 1 }
 0x28a   :  { %v3574_v34 = vpop.eup %3573  ;;  %v1521_v17 = vmax.f32 %v1449_v12, 0.0 }
 0x28b   :  { %v1522_v36 = vmax.f32 %v1451_v59, 0.0 }
 0x28c   :  { %v1555_v4 = vpack.c.bf16 %v1521_v17, %v1519_v43  ;;  %v4755_v17 = vpop.permute.xlu0 %2582 }
 0x28d   :  { %v1556_v28 = vpack.c.bf16 %v1522_v36, %v1520_v31  ;;  %v1454_v16 = vpop.f32.mrb[60].mxu1 }
 0x28e   :  { %v3576_v0 = vpop.eup %3575  ;;  %v1455_v49 = vadd.f32 %v1454_v16, %v4636_v26  ;;  %v1456_v50 = vpop.f32.mrb[61].mxu1 }
 0x28f   :  { %v1457_v46 = vadd.f32 %v1456_v50, %v4640_v19  ;;  %v1458_v45 = vpop.f32.mrb[62].mxu1  ;;  %1838 = vmatprep.mubr.bf16.mxu0 %v1556_v28 }
 0x290   :  { %v1459_v22 = vadd.f32 %v1458_v45, %v4636_v26  ;;  %v1460_v5 = vpop.f32.mrb[63].mxu1  ;;  %1839 = vmatmul.mubr.bf16.gmra.mrb[120].mxu0 %v1555_v4  ;;  %v1523_v12 = vmax.f32 %v1455_v49, 0.0  ;;  %v4757_v26 = vpop.permute.xlu1 %2786  ;;  %v3719_v49 = vld [vmem:[%s5459_s1 + $0xb0] sm:$0xff] }
 0x291   :  { %v1461_v7 = vadd.f32 %v1460_v5, %v4640_v19  ;;  %v1524_v59 = vmax.f32 %v1457_v46, 0.0  ;;  %vm2671_vm1 = vcmp.ge.s32.totalorder %v3719_v49, 0 }
 0x292   :  { %v1525_v35 = vmax.f32 %v1459_v22, 0.0  ;;  %v2703_v46 = vsel %vm2671_vm1, 1, %v5529_v3 }
 0x293   :  { %v1526_v63 = vmax.f32 %v1461_v7, 0.0  ;;  %2777 = vperm.xlu0 %3430, %v2702_v32  }
 0x294   :  { %v1557_v34 = vpack.c.bf16 %v1525_v35, %v1523_v12  ;;  %v4759_v28 = vpop.permute.xlu1 %2789  ;;  %v5530_v35 = vlaneseq }
 0x295   :  { %v1558_v43 = vpack.c.bf16 %v1526_v63, %v1524_v59 }
 0x296   :  { %v4778_v59 = vand.u32 127, %v5530_v35 }
 0x297   :  { %1846 = vmatprep.mubr.bf16.mxu0 %v1558_v43 }
 0x298   :  { %1847 = vmatmul.mubr.bf16.gmra.mrb[124].mxu0 %v1557_v34  ;;  %v4762_v4 = vpop.permute.xlu1 %2792  ;;  %vm2617_vm2 = vcmp.eq.s32.totalorder %v4778_v59, %v4358_v54  ;;  %vm2618_vm0 = vcmp.eq.s32.totalorder %v4778_v59, %v4405_v48  ;;  %v4786_v34 = vld [vmem:[#allocation12] ss:$0 sm:$0xff]  ;;  %vm2619_vm7 = vcmp.eq.s32.totalorder %v4778_v59, %v4423_v10  ;;  %vm2620_vm11 = vcmp.eq.s32.totalorder %v4778_v59, %v4411_v55 }
 0x299   :  { %vm2841_vm5 = vmand %vm2617_vm2, %vm2809_vm3  ;;  %vm2621_vm14 = vcmp.eq.s32.totalorder %v4778_v59, %v4459_v2  ;;  %vm2622_vm2 = vcmp.eq.s32.totalorder %v4778_v59, %v4447_v42  ;;  %vm2814_vm3 = vcmp.eq.s32.totalorder %v4468_v8, 1 }
 0x29a   :  { %vm2842_vm6 = vmand %vm2618_vm0, %vm2810_vm4  ;;  %v4794_v30 = vsel %vm2841_vm5, 1.0, %v5474_v9  ;;  %vm2623_vm4 = vcmp.eq.s32.totalorder %v4778_v59, %v4488_v1  ;;  %vm2815_vm5 = vcmp.eq.s32.totalorder %v4505_v37, 1 }
 0x29b   :  { %v4797_v48 = vsel %vm2842_vm6, 1.0, %v5474_v9  ;;  %vm2843_vm9 = vmand %vm2619_vm7, %vm2811_vm8  ;;  %vm2624_vm7 = vcmp.eq.s32.totalorder %v4778_v59, %v4481_v39  ;;  %vm2816_vm8 = vcmp.eq.s32.totalorder %v4493_v6, 1 }
 0x29c   :  { %v4764_v16 = vpop.permute.xlu1 %2795  ;;  %v3004_v40 = vadd.f32 %v4797_v48, %v4794_v30  ;;  %v4808_v35 = vsel %vm2843_vm9, 1.0, %v5474_v9  ;;  %vm2844_vm13 = vmand %vm2620_vm11, %vm2812_vm12  ;;  %vm2817_vm11 = vcmp.eq.s32.totalorder %v4533_v52, 1 }
 0x29d   :  { %vm2845_vm1 = vmand %vm2621_vm14, %vm2813_vm15  ;;  %vm2818_vm14 = vcmp.eq.s32.totalorder %v4523_v20, 1 }
 0x29e   :  { %v3005_v15 = vadd.f32 %v3004_v40, %v4808_v35  ;;  %vm2846_vm0 = vmand %vm2622_vm2, %vm2814_vm3  ;;  %vm2819_vm2 = vcmp.eq.s32.totalorder %v4565_v51, 1 }
 0x29f   :  { %vm2847_vm6 = vmand %vm2623_vm4, %vm2815_vm5  ;;  %vm2820_vm4 = vcmp.eq.s32.totalorder %v4552_v33, 1 }
 0x2a0   :  { %v715_v31 = vpop.xlane.xlu0 %714  ;;  %v4766_v0 = vpop.permute.xlu1 %2798  ;;  %vm2848_vm9 = vmand %vm2624_vm7, %vm2816_vm8  ;;  %vm2821_vm7 = vcmp.eq.s32.totalorder %v4578_v23, 1 }
 0x2a1   :  { %v765_v36 = vadd.f32 1e-12, %v715_v31 }
 0x2a3   :  { %3577 = vrsqrt.f32 %v765_v36 }
 0x2a4   :  { %v4771_v50 = vpop.permute.xlu1 %2801 }
 0x2ad   :  { %v3578_v19 = vpop.eup %3577 }
 0x2b2   :  { %732 = vadd.xlane.f32.xlu0 %v4549_v25  ;;  %v4774_v25 = vpop.permute.xlu0 %2774 }
 0x2c8   :  { %2780 = vperm.xlu0 %3430, %v2703_v46   ;;  %v2510_v46 = vld [vmem:[%s5459_s1 + $0xb8] sm:$0xff] }
 0x2c9   :  { %vm2672_vm10 = vcmp.ge.s32.totalorder %v2510_v46, 0 }
 0x2ca   :  { %v742_v45 = vpop.xlane.xlu1 %741 }
 0x2cb   :  { %v774_v22 = vadd.f32 1e-12, %v742_v45 }
 0x2cd   :  { %3579 = vrsqrt.f32 %v774_v22 }
 0x2d5   :  { %v721_v5 = vpop.xlane.xlu0 %720 }
 0x2d6   :  { %v767_v32 = vadd.f32 1e-12, %v721_v5 }
 0x2d7   :  { %v3580_v7 = vpop.eup %3579 }
 0x2d8   :  { %3581 = vrsqrt.f32 %v767_v32 }
 0x2e2   :  { %v3582_v12 = vpop.eup %3581 }
 0x2e7   :  { %738 = vadd.xlane.f32.xlu0 %v4569_v21 }
 0x2f3   :  { %v3241_v63 = vpop.f32.mrb[64].mxu0 }
 0x2f4   :  { %v3242_v43 = vpop.f32.mrb[65].mxu0 }
 0x2f5   :  { %v3243_v31 = vadd.f32 %v3242_v43, %v3241_v63  ;;  %v3244_v36 = vpop.f32.mrb[66].mxu0  ;;  %v2704_v43 = vsel %vm2672_vm10, 1, %v5529_v3  ;;  %vm2625_vm10 = vcmp.eq.s32.totalorder %v4778_v59, %v4520_v13 }
 0x2f6   :  { %v3245_v21 = vpop.f32.mrb[67].mxu0  ;;  %vm2849_vm12 = vmand %vm2625_vm10, %vm2817_vm11  ;;  %vm2822_vm10 = vcmp.eq.s32.totalorder %v4576_v62, 1 }
 0x2f7   :  { %v1729_v19 = vadd.f32 %v3243_v31, %v4786_v34  ;;  %v3246_v49 = vadd.f32 %v3245_v21, %v3244_v36  ;;  %v4818_v21 = vsel %vm2844_vm13, 1.0, %v5474_v9  ;;  %vm2626_vm13 = vcmp.eq.s32.totalorder %v4778_v59, %v4507_v44 }
 0x2f8   :  { %v3006_v2 = vadd.f32 %v3005_v15, %v4818_v21  ;;  %vm2850_vm15 = vmand %vm2626_vm13, %vm2818_vm14  ;;  %vm2823_vm13 = vcmp.eq.s32.totalorder %v4590_v57, 1 }
 0x2f9   :  { %v1732_v54 = vadd.f32 %v3246_v49, %v4786_v34  ;;  %v1855_v45 = vmax.f32 %v1729_v19, 0.0 }
 0x2fb   :  { %v1856_v22 = vmax.f32 %v1732_v54, 0.0  ;;  %v3247_v5 = vpop.f32.mrb[68].mxu0 }
 0x2fc   :  { %v3248_v10 = vpop.f32.mrb[69].mxu0 }
 0x2fd   :  { %v3249_v32 = vadd.f32 %v3248_v10, %v3247_v5  ;;  %2591 = vperm.xlu0 %3430, %v2510_v46   ;;  %v3250_v7 = vpop.f32.mrb[70].mxu0  ;;  %v1887_v12 = vpack.c.bf16 %v1856_v22, %v1855_v45  ;;  %v3720_v45 = vld [vmem:[%s5459_s1 + $0xc0] sm:$0xff]  ;;  %v4828_v22 = vsel %vm2845_vm1, 1.0, %v5474_v9  ;;  %v4830_v5 = vpop.permute.xlu0 %2585  ;;  %vm2627_vm1 = vcmp.eq.s32.totalorder %v4778_v59, %v4547_v24 }
 0x2fe   :  { %v3251_v63 = vpop.f32.mrb[71].mxu0  ;;  %vm2851_vm3 = vmand %vm2627_vm1, %vm2819_vm2  ;;  %vm2824_vm1 = vcmp.eq.s32.totalorder %v4587_v47, 1 }
 0x2ff   :  { %v1737_v31 = vadd.f32 %v3249_v32, %v4786_v34  ;;  %v3252_v55 = vadd.f32 %v3251_v63, %v3250_v7  ;;  %3377 = vmatprep.mubr.bf16.mxu1 %v1887_v12  ;;  %v3007_v7 = vadd.f32 %v3006_v2, %v4828_v22  ;;  %v3721_v12 = vld [vmem:[%s5459_s1 + $0xc8] sm:$0xff]  ;;  %v4841_v63 = vsel %vm2846_vm0, 1.0, %v5474_v9 }
 0x300   :  { %vm2628_vm0 = vcmp.eq.s32.totalorder %v4778_v59, %v4540_v60 }
 0x301   :  { %v1740_v36 = vadd.f32 %v3252_v55, %v4786_v34  ;;  %2783 = vperm.xlu0 %3430, %v2704_v43   ;;  %v1857_v19 = vmax.f32 %v1737_v31, 0.0  ;;  %vm2852_vm5 = vmand %vm2628_vm0, %vm2820_vm4  ;;  %vm2825_vm0 = vcmp.eq.s32.totalorder %v4601_v38, 1 }
 0x303   :  { %v1858_v49 = vmax.f32 %v1740_v36, 0.0  ;;  %v3253_v54 = vpop.f32.mrb[72].mxu0  ;;  %v3008_v36 = vadd.f32 %v3007_v7, %v4841_v63 }
 0x304   :  { %v3254_v46 = vpop.f32.mrb[73].mxu0 }
 0x305   :  { %v1888_v27 = vpack.c.bf16 %v1858_v49, %v1857_v19  ;;  %2594 = vperm.xlu0 %3430, %v3720_v45   ;;  %v3255_v10 = vadd.f32 %v3254_v46, %v3253_v54  ;;  %v3256_v40 = vpop.f32.mrb[74].mxu0  ;;  %v3722_v49 = vld [vmem:[%s5459_s1 + $0xd0] sm:$0xff]  ;;  %v4852_v54 = vsel %vm2847_vm6, 1.0, %v5474_v9  ;;  %vm2629_vm6 = vcmp.eq.s32.totalorder %v4778_v59, %v4574_v61 }
 0x306   :  { %v3257_v42 = vpop.f32.mrb[75].mxu0  ;;  %vm2853_vm8 = vmand %vm2629_vm6, %vm2821_vm7  ;;  %vm2826_vm6 = vcmp.eq.s32.totalorder %v4598_v58, 1 }
 0x307   :  { %3378 = vmatmul.mubr.bf16.vlgmr.msra.gmra.mrb[64].mxu1 %v1888_v27  ;;  %v1745_v8 = vadd.f32 %v3255_v10, %v4786_v34  ;;  %v3258_v32 = vadd.f32 %v3257_v42, %v3256_v40  ;;  %v3009_v10 = vadd.f32 %v3008_v36, %v4852_v54  ;;  %v3723_v40 = vld [vmem:[%s5459_s1 + $0xd8] sm:$0xff]  ;;  %v4863_v42 = vsel %vm2848_vm9, 1.0, %v5474_v9 }
 0x308   :  { %vm2630_vm9 = vcmp.eq.s32.totalorder %v4778_v59, %v4567_v18 }
 0x309   :  { %2597 = vperm.xlu0 %3430, %v3721_v12   ;;  %v1748_v43 = vadd.f32 %v3258_v32, %v4786_v34  ;;  %v1859_v37 = vmax.f32 %v1745_v8, 0.0  ;;  %v3010_v7 = vadd.f32 %v3009_v10, %v4863_v42  ;;  %vm2854_vm11 = vmand %vm2630_vm9, %vm2822_vm10  ;;  %vm2827_vm9 = vcmp.eq.s32.totalorder %v4690_v11, 1 }
 0x30a   :  { %v727_v31 = vpop.xlane.xlu0 %726 }
 0x30b   :  { %v769_v1 = vadd.f32 1e-12, %v727_v31  ;;  %v1860_v55 = vmax.f32 %v1748_v43, 0.0  ;;  %v3259_v15 = vpop.f32.mrb[76].mxu0  ;;  %v3724_v43 = vld [vmem:[%s5459_s1 + $0xe0] sm:$0xff]  ;;  %v4874_v31 = vsel %vm2849_vm12, 1.0, %v5474_v9  ;;  %vm2631_vm12 = vcmp.eq.s32.totalorder %v4778_v59, %v4585_v41 }
 0x30c   :  { %v3260_v19 = vpop.f32.mrb[77].mxu0  ;;  %5531 = vst [vmem:[#allocation27_spill] sm:$0xff] %v4874_v31  ;;  %vm2855_vm14 = vmand %vm2631_vm12, %vm2823_vm13  ;;  %vm2829_vm13 = vcmp.eq.s32.totalorder %v4774_v25, 1 }
 0x30d   :  { %3583 = vrsqrt.f32 %v769_v1  ;;  %2600 = vperm.xlu0 %3430, %v3722_v49   ;;  %v3261_v2 = vadd.f32 %v3260_v19, %v3259_v15  ;;  %v3262_v27 = vpop.f32.mrb[78].mxu0  ;;  %v1889_v39 = vpack.c.bf16 %v1860_v55, %v1859_v37  ;;  %v3011_v19 = vadd.f32 %v3010_v7, %v4874_v31  ;;  %v3725_v49 = vld [vmem:[%s5459_s1 + $0xe8] sm:$0xff] }
 0x30e   :  { %v3263_v6 = vpop.f32.mrb[79].mxu0 }
 0x30f   :  { %v1753_v46 = vadd.f32 %v3261_v2, %v4786_v34  ;;  %v3264_v45 = vadd.f32 %v3263_v6, %v3262_v27  ;;  %3381 = vmatprep.mubr.bf16.mxu1 %v1889_v39  ;;  %v4885_v2 = vsel %vm2850_vm15, 1.0, %v5474_v9  ;;  %vm2632_vm15 = vcmp.eq.s32.totalorder %v4778_v59, %v4580_v14 }
 0x310   :  { %5532 = vst [vmem:[#allocation28_spill] sm:$0xff] %v4885_v2  ;;  %v3012_v6 = vadd.f32 %v3011_v19, %v4885_v2  ;;  %v4917_v19 = vsel %vm2854_vm11, 1.0, %v5474_v9  ;;  %vm2856_vm2 = vmand %vm2632_vm15, %vm2824_vm1  ;;  %vm2637_vm15 = vcmp.eq.s32.totalorder %v4778_v59, %v4755_v17 }
 0x311   :  { %2603 = vperm.xlu0 %3430, %v3723_v40   ;;  %v1756_v8 = vadd.f32 %v3264_v45, %v4786_v34  ;;  %v1861_v13 = vmax.f32 %v1753_v46, 0.0  ;;  %v4893_v45 = vsel %vm2851_vm3, 1.0, %v5474_v9  ;;  %5536 = vst [vmem:[#allocation32_spill] sm:$0xff] %v4917_v19  ;;  %vm2633_vm3 = vcmp.eq.s32.totalorder %v4778_v59, %v4595_v53 }
 0x312   :  { %5533 = vst [vmem:[#allocation29_spill] sm:$0xff] %v4893_v45  ;;  %vm2857_vm4 = vmand %vm2633_vm3, %vm2825_vm0  ;;  %vm2638_vm3 = vcmp.eq.s32.totalorder %v4778_v59, %v4830_v5 }
 0x313   :  { %v1862_v52 = vmax.f32 %v1756_v8, 0.0  ;;  %v3265_v32 = vpop.f32.mrb[80].mxu0 }
 0x314   :  { %v3266_v12 = vpop.f32.mrb[81].mxu0 }
 0x315   :  { %2606 = vperm.xlu0 %3430, %v3724_v43   ;;  %v3267_v1 = vadd.f32 %v3266_v12, %v3265_v32  ;;  %v3268_v37 = vpop.f32.mrb[82].mxu0  ;;  %v1890_v55 = vpack.c.bf16 %v1862_v52, %v1861_v13  ;;  %v3013_v52 = vadd.f32 %v3012_v6, %v4893_v45  ;;  %v4901_v32 = vsel %vm2852_vm5, 1.0, %v5474_v9 }
 0x316   :  { %v3269_v20 = vpop.f32.mrb[83].mxu0  ;;  %5534 = vst [vmem:[#allocation30_spill] sm:$0xff] %v4901_v32  ;;  %vm2634_vm5 = vcmp.eq.s32.totalorder %v4778_v59, %v4592_v56 }
 0x317   :  { %v3584_v44 = vpop.eup %3583  ;;  %v1761_v15 = vadd.f32 %v3267_v1, %v4786_v34  ;;  %v3270_v36 = vadd.f32 %v3269_v20, %v3268_v37  ;;  %3382 = vmatmul.mubr.bf16.gmra.mrb[68].mxu1 %v1890_v55  ;;  %v3014_v43 = vadd.f32 %v3013_v52, %v4901_v32  ;;  %v4909_v37 = vsel %vm2853_vm8, 1.0, %v5474_v9  ;;  %vm2858_vm7 = vmand %vm2634_vm5, %vm2826_vm6 }
 0x318   :  { %5535 = vst [vmem:[#allocation31_spill] sm:$0xff] %v4909_v37 }
 0x319   :  { %2609 = vperm.xlu0 %3430, %v3725_v49   ;;  %v1764_v27 = vadd.f32 %v3270_v36, %v4786_v34  ;;  %v1863_v24 = vmax.f32 %v1761_v15, 0.0  ;;  %v3015_v36 = vadd.f32 %v3014_v43, %v4909_v37 }
 0x31b   :  { %v1864_v51 = vmax.f32 %v1764_v27, 0.0  ;;  %v3271_v39 = vpop.f32.mrb[84].mxu0 }
 0x31c   :  { %v3272_v46 = vpop.f32.mrb[85].mxu0 }
 0x31d   :  { %v3273_v10 = vadd.f32 %v3272_v46, %v3271_v39  ;;  %v3274_v40 = vpop.f32.mrb[86].mxu0  ;;  %v1891_v8 = vpack.c.bf16 %v1864_v51, %v1863_v24  ;;  %v3016_v24 = vadd.f32 %v3015_v36, %v4917_v19  ;;  %v4925_v39 = vsel %vm2855_vm14, 1.0, %v5474_v9  ;;  %v5543_v36 = vld [vmem:[#allocation26_spill] sm:$0xff] }
 0x31e   :  { %v3275_v13 = vpop.f32.mrb[87].mxu0  ;;  %5537 = vst [vmem:[#allocation33_spill] sm:$0xff] %v4925_v39  ;;  %vm2828_vm12 = vcmp.eq.s32.totalorder %v5543_v36, 1 }
 0x31f   :  { %v1769_v60 = vadd.f32 %v3273_v10, %v4786_v34  ;;  %v3276_v33 = vadd.f32 %v3275_v13, %v3274_v40  ;;  %3385 = vmatprep.mubr.bf16.mxu1 %v1891_v8  ;;  %v3017_v8 = vadd.f32 %v3016_v24, %v4925_v39  ;;  %v4933_v13 = vsel %vm2856_vm2, 1.0, %v5474_v9  ;;  %vm2861_vm2 = vmand %vm2637_vm15, %vm2829_vm13 }
 0x320   :  { %5538 = vst [vmem:[#allocation34_spill] sm:$0xff] %v4933_v13  ;;  %v4971_v17 = vsel %vm2861_vm2, 1.0, %v5474_v9  ;;  %vm2834_vm13 = vcmp.eq.s32.totalorder %v4759_v28, 1 }
 0x321   :  { %v1772_v7 = vadd.f32 %v3276_v33, %v4786_v34  ;;  %v1865_v61 = vmax.f32 %v1769_v60, 0.0  ;;  %v3018_v52 = vadd.f32 %v3017_v8, %v4933_v13  ;;  %5546 = vst [vmem:[#allocation36_spill] sm:$0xff] %v4971_v17 }
 0x323   :  { %v1866_v12 = vmax.f32 %v1772_v7, 0.0  ;;  %v3277_v23 = vpop.f32.mrb[88].mxu0 }
 0x324   :  { %v3278_v1 = vpop.f32.mrb[89].mxu0 }
 0x325   :  { %v3279_v55 = vadd.f32 %v3278_v1, %v3277_v23  ;;  %v3280_v44 = vpop.f32.mrb[90].mxu0  ;;  %v1892_v20 = vpack.c.bf16 %v1866_v12, %v1865_v61  ;;  %v4941_v61 = vsel %vm2857_vm4, 1.0, %v5474_v9  ;;  %vm2639_vm4 = vcmp.eq.s32.totalorder %v4778_v59, %v4724_v29 }
 0x326   :  { %v3281_v15 = vpop.f32.mrb[91].mxu0  ;;  %5539 = vst [vmem:[#allocation35_spill] sm:$0xff] %v4941_v61 }
 0x327   :  { %v1777_v18 = vadd.f32 %v3279_v55, %v4786_v34  ;;  %v3282_v62 = vadd.f32 %v3281_v15, %v3280_v44  ;;  %3386 = vmatmul.mubr.bf16.gmra.mrb[72].mxu1 %v1892_v20  ;;  %v5540_v55 = vld [vmem:[#allocation25_spill] sm:$0xff]  ;;  %v3019_v44 = vadd.f32 %v3018_v52, %v4941_v61  ;;  %v4949_v20 = vsel %vm2858_vm7, 1.0, %v5474_v9 }
 0x328   :  { %vm2635_vm8 = vcmp.eq.s32.totalorder %v4778_v59, %v5540_v55  ;;  %5541 = vst [vmem:[#allocation25_spill] sm:$0xff] %v4949_v20 }
 0x329   :  { %v1780_v49 = vadd.f32 %v3282_v62, %v4786_v34  ;;  %v1867_v41 = vmax.f32 %v1777_v18, 0.0  ;;  %vm2859_vm10 = vmand %vm2635_vm8, %vm2827_vm9  ;;  %v2778_v18 = vpop.permute.xlu0 %2777  ;;  %v5542_v62 = vld [vmem:[#allocation24_spill] sm:$0xff] }
 0x32a   :  { %vm2636_vm11 = vcmp.eq.s32.totalorder %v4778_v59, %v5542_v62  ;;  %v4957_v24 = vsel %vm2859_vm10, 1.0, %v5474_v9  ;;  %vm2830_vm1 = vcmp.eq.s32.totalorder %v2778_v18, 1  ;;  %vm2833_vm10 = vcmp.eq.s32.totalorder %v4757_v26, 1 }
 0x32b   :  { %v1868_v27 = vmax.f32 %v1780_v49, 0.0  ;;  %v3283_v57 = vpop.f32.mrb[92].mxu0  ;;  %5544 = vst [vmem:[#allocation24_spill] sm:$0xff] %v4957_v24  ;;  %vm2860_vm14 = vmand %vm2636_vm11, %vm2828_vm12 }
 0x32c   :  { %v3284_v51 = vpop.f32.mrb[93].mxu0  ;;  %v4965_v25 = vsel %vm2860_vm14, 1.0, %v5474_v9  ;;  %vm2862_vm0 = vmand %vm2638_vm3, %vm2830_vm1  ;;  %vm2835_vm1 = vcmp.eq.s32.totalorder %v4762_v4, 1 }
 0x32d   :  { %v3285_v6 = vadd.f32 %v3284_v51, %v3283_v57  ;;  %v3286_v46 = vpop.f32.mrb[94].mxu0  ;;  %v1893_v10 = vpack.c.bf16 %v1868_v27, %v1867_v41  ;;  %v3020_v27 = vadd.f32 %v3019_v44, %v4949_v20  ;;  %5545 = vst [vmem:[#allocation26_spill] sm:$0xff] %v4965_v25 }
 0x32e   :  { %v3287_v40 = vpop.f32.mrb[95].mxu0 }
 0x32f   :  { %v1785_v14 = vadd.f32 %v3285_v6, %v4786_v34  ;;  %v3288_v47 = vadd.f32 %v3287_v40, %v3286_v46  ;;  %3389 = vmatprep.mubr.bf16.mxu1 %v1893_v10 }
 0x331   :  { %v1788_v60 = vadd.f32 %v3288_v47, %v4786_v34  ;;  %v1869_v53 = vmax.f32 %v1785_v14, 0.0 }
 0x333   :  { %v1870_v33 = vmax.f32 %v1788_v60, 0.0  ;;  %v3289_v38 = vpop.f32.mrb[96].mxu0  ;;  %v3021_v60 = vadd.f32 %v3020_v27, %v4957_v24 }
 0x334   :  { %v3290_v7 = vpop.f32.mrb[97].mxu0 }
 0x335   :  { %v3291_v12 = vadd.f32 %v3290_v7, %v3289_v38  ;;  %v3292_v23 = vpop.f32.mrb[98].mxu0  ;;  %v1894_v43 = vpack.c.bf16 %v1870_v33, %v1869_v53  ;;  %v3022_v7 = vadd.f32 %v3021_v60, %v4965_v25 }
 0x336   :  { %v3293_v1 = vpop.f32.mrb[99].mxu0 }
 0x337   :  { %v1793_v56 = vadd.f32 %v3291_v12, %v4786_v34  ;;  %v3294_v58 = vadd.f32 %v3293_v1, %v3292_v23  ;;  %3390 = vmatmul.mubr.bf16.gmra.mrb[76].mxu1 %v1894_v43  ;;  %v4975_v23 = vsel %vm2862_vm0, 1.0, %v5474_v9  ;;  %v3023_v5 = vadd.f32 %v3022_v7, %v4971_v17 }
 0x338   :  { %5547 = vst [vmem:[#allocation37_spill] sm:$0xff] %v4975_v23  ;;  %vm2836_vm0 = vcmp.eq.s32.totalorder %v4764_v16, 1 }
 0x339   :  { %v1796_v15 = vadd.f32 %v3294_v58, %v4786_v34  ;;  %v1871_v49 = vmax.f32 %v1793_v56, 0.0  ;;  %v3024_v18 = vadd.f32 %v3023_v5, %v4975_v23 }
 0x33b   :  { %v1872_v11 = vmax.f32 %v1796_v15, 0.0  ;;  %v3295_v41 = vpop.f32.mrb[100].mxu0 }
 0x33c   :  { %v3296_v57 = vpop.f32.mrb[101].mxu0 }
 0x33d   :  { %v3297_v51 = vadd.f32 %v3296_v57, %v3295_v41  ;;  %v3298_v6 = vpop.f32.mrb[102].mxu0  ;;  %v1895_v46 = vpack.c.bf16 %v1872_v11, %v1871_v49 }
 0x33e   :  { %v3299_v10 = vpop.f32.mrb[103].mxu0 }
 0x33f   :  { %v733_v40 = vpop.xlane.xlu0 %732  ;;  %v1801_v14 = vadd.f32 %v3297_v51, %v4786_v34  ;;  %v3300_v47 = vadd.f32 %v3299_v10, %v3298_v6  ;;  %3393 = vmatprep.mubr.bf16.mxu1 %v1895_v46 }
 0x340   :  { %v771_v8 = vadd.f32 1e-12, %v733_v40 }
 0x341   :  { %v1804_v53 = vadd.f32 %v3300_v47, %v4786_v34  ;;  %v1873_v33 = vmax.f32 %v1801_v14, 0.0 }
 0x342   :  { %3585 = vrsqrt.f32 %v771_v8 }
 0x343   :  { %v1874_v38 = vmax.f32 %v1804_v53, 0.0  ;;  %v3301_v52 = vpop.f32.mrb[104].mxu0 }
 0x344   :  { %v3302_v12 = vpop.f32.mrb[105].mxu0 }
 0x345   :  { %v3303_v43 = vadd.f32 %v3302_v12, %v3301_v52  ;;  %v3304_v1 = vpop.f32.mrb[106].mxu0  ;;  %v1896_v55 = vpack.c.bf16 %v1874_v38, %v1873_v33 }
 0x346   :  { %v3305_v56 = vpop.f32.mrb[107].mxu0 }
 0x347   :  { %v2781_v58 = vpop.permute.xlu0 %2780  ;;  %v1809_v44 = vadd.f32 %v3303_v43, %v4786_v34  ;;  %v3306_v15 = vadd.f32 %v3305_v56, %v3304_v1  ;;  %3394 = vmatmul.mubr.bf16.gmra.mrb[80].mxu1 %v1896_v55 }
 0x348   :  { %vm2831_vm5 = vcmp.eq.s32.totalorder %v2781_v58, 1 }
 0x349   :  { %vm2863_vm6 = vmand %vm2639_vm4, %vm2831_vm5  ;;  %v1812_v62 = vadd.f32 %v3306_v15, %v4786_v34  ;;  %v1875_v41 = vmax.f32 %v1809_v44, 0.0 }
 0x34a   :  { %v4984_v36 = vsel %vm2863_vm6, 1.0, %v5474_v9  ;;  %vm2837_vm6 = vcmp.eq.s32.totalorder %v4766_v0, 1  ;;  %v5043_v0 = vld [vmem:[#allocation14] ss:$0 sm:$0xff] }
 0x34b   :  { %5548 = vst [vmem:[#allocation38_spill] sm:$0xff] %v4984_v36  ;;  %v4987_v49 = vadd.f32 %v3024_v18, %v4984_v36  ;;  %v1876_v27 = vmax.f32 %v1812_v62, 0.0  ;;  %v3307_v29 = vpop.f32.mrb[108].mxu0 }
 0x34c   :  { %v3586_v11 = vpop.eup %3585  ;;  %v3308_v57 = vpop.f32.mrb[109].mxu0 }
 0x34d   :  { %v3309_v51 = vadd.f32 %v3308_v57, %v3307_v29  ;;  %v3310_v6 = vpop.f32.mrb[110].mxu0  ;;  %v1897_v46 = vpack.c.bf16 %v1876_v27, %v1875_v41 }
 0x34e   :  { %v3311_v10 = vpop.f32.mrb[111].mxu0 }
 0x34f   :  { %v1817_v40 = vadd.f32 %v3309_v51, %v4786_v34  ;;  %v3312_v14 = vadd.f32 %v3311_v10, %v3310_v6  ;;  %3397 = vmatprep.mubr.bf16.mxu1 %v1897_v46 }
 0x351   :  { %v1820_v47 = vadd.f32 %v3312_v14, %v4786_v34  ;;  %v1877_v8 = vmax.f32 %v1817_v40, 0.0 }
 0x353   :  { %v1878_v60 = vmax.f32 %v1820_v47, 0.0  ;;  %v3313_v53 = vpop.f32.mrb[112].mxu0 }
 0x354   :  { %v3314_v33 = vpop.f32.mrb[113].mxu0 }
 0x355   :  { %v3315_v38 = vadd.f32 %v3314_v33, %v3313_v53  ;;  %v3316_v52 = vpop.f32.mrb[114].mxu0  ;;  %v1898_v7 = vpack.c.bf16 %v1878_v60, %v1877_v8 }
 0x356   :  { %v3317_v12 = vpop.f32.mrb[115].mxu0 }
 0x357   :  { %v1825_v43 = vadd.f32 %v3315_v38, %v4786_v34  ;;  %v3318_v1 = vadd.f32 %v3317_v12, %v3316_v52  ;;  %3398 = vmatmul.mubr.bf16.gmra.mrb[84].mxu1 %v1898_v7 }
 0x359   :  { %v1828_v55 = vadd.f32 %v3318_v1, %v4786_v34  ;;  %v1879_v5 = vmax.f32 %v1825_v43, 0.0 }
 0x35b   :  { %v1880_v56 = vmax.f32 %v1828_v55, 0.0  ;;  %v3319_v58 = vpop.f32.mrb[116].mxu0 }
 0x35c   :  { %v3320_v44 = vpop.f32.mrb[117].mxu0 }
 0x35d   :  { %v3321_v15 = vadd.f32 %v3320_v44, %v3319_v58  ;;  %v3322_v18 = vpop.f32.mrb[118].mxu0  ;;  %v1899_v62 = vpack.c.bf16 %v1880_v56, %v1879_v5 }
 0x35e   :  { %v3323_v11 = vpop.f32.mrb[119].mxu0 }
 0x35f   :  { %v1833_v41 = vadd.f32 %v3321_v15, %v4786_v34  ;;  %v3324_v27 = vadd.f32 %v3323_v11, %v3322_v18  ;;  %3401 = vmatprep.mubr.bf16.mxu1 %v1899_v62 }
 0x361   :  { %v1836_v29 = vadd.f32 %v3324_v27, %v4786_v34  ;;  %v1881_v57 = vmax.f32 %v1833_v41, 0.0 }
 0x363   :  { %v1882_v51 = vmax.f32 %v1836_v29, 0.0  ;;  %v3325_v6 = vpop.f32.mrb[120].mxu0 }
 0x364   :  { %v3326_v46 = vpop.f32.mrb[121].mxu0 }
 0x365   :  { %v3327_v10 = vadd.f32 %v3326_v46, %v3325_v6  ;;  %v3328_v40 = vpop.f32.mrb[122].mxu0  ;;  %v1900_v14 = vpack.c.bf16 %v1882_v51, %v1881_v57 }
 0x366   :  { %v3329_v47 = vpop.f32.mrb[123].mxu0 }
 0x367   :  { %v1841_v8 = vadd.f32 %v3327_v10, %v4786_v34  ;;  %v3330_v60 = vadd.f32 %v3329_v47, %v3328_v40  ;;  %3402 = vmatmul.mubr.bf16.gmra.mrb[88].mxu1 %v1900_v14 }
 0x369   :  { %v1844_v53 = vadd.f32 %v3330_v60, %v4786_v34  ;;  %v1883_v33 = vmax.f32 %v1841_v8, 0.0 }
 0x36b   :  { %v1884_v38 = vmax.f32 %v1844_v53, 0.0  ;;  %v3331_v52 = vpop.f32.mrb[124].mxu0 }
 0x36c   :  { %v3332_v7 = vpop.f32.mrb[125].mxu0 }
 0x36d   :  { %v3333_v12 = vadd.f32 %v3332_v7, %v3331_v52  ;;  %v3334_v43 = vpop.f32.mrb[126].mxu0  ;;  %v1901_v1 = vpack.c.bf16 %v1884_v38, %v1883_v33 }
 0x36e   :  { %v3335_v55 = vpop.f32.mrb[127].mxu0 }
 0x36f   :  { %v1849_v5 = vadd.f32 %v3333_v12, %v4786_v34  ;;  %v3336_v56 = vadd.f32 %v3335_v55, %v3334_v43  ;;  %3405 = vmatprep.mubr.bf16.mxu1 %v1901_v1 }
 0x371   :  { %v1852_v58 = vadd.f32 %v3336_v56, %v4786_v34  ;;  %v1885_v44 = vmax.f32 %v1849_v5, 0.0 }
 0x373   :  { %v1886_v15 = vmax.f32 %v1852_v58, 0.0 }
 0x374   :  { %v739_v18 = vpop.xlane.xlu0 %738 }
 0x375   :  { %v773_v62 = vadd.f32 1e-12, %v739_v18  ;;  %v1902_v11 = vpack.c.bf16 %v1886_v15, %v1885_v44 }
 0x377   :  { %3587 = vrsqrt.f32 %v773_v62  ;;  %3406 = vmatmul.mubr.bf16.gmra.mrb[92].mxu1 %v1902_v11 }
 0x37c   :  { %v2592_v41 = vpop.permute.xlu0 %2591 }
 0x37d   :  { %vm2640_vm7 = vcmp.eq.s32.totalorder %v4778_v59, %v2592_v41 }
 0x380   :  { %v2784_v27 = vpop.permute.xlu0 %2783 }
 0x381   :  { %v3588_v29 = vpop.eup %3587  ;;  %vm2832_vm8 = vcmp.eq.s32.totalorder %v2784_v27, 1 }
 0x382   :  { %vm2864_vm9 = vmand %vm2640_vm7, %vm2832_vm8 }
 0x383   :  { %v5001_v57 = vsel %vm2864_vm9, 1.0, %v5474_v9  ;;  %vm2838_vm9 = vcmp.eq.s32.totalorder %v4771_v50, 1 }
 0x384   :  { %5549 = vst [vmem:[#allocation39_spill] sm:$0xff] %v5001_v57  ;;  %v3026_v34 = vadd.f32 %v4987_v49, %v5001_v57  ;;  %v2595_v51 = vpop.permute.xlu0 %2594 }
 0x385   :  { %vm2641_vm11 = vcmp.eq.s32.totalorder %v4778_v59, %v2595_v51 }
 0x386   :  { %vm2865_vm12 = vmand %vm2641_vm11, %vm2833_vm10 }
 0x387   :  { %v5008_v6 = vsel %vm2865_vm12, 1.0, %v5474_v9 }
 0x388   :  { %5550 = vst [vmem:[#allocation40_spill] sm:$0xff] %v5008_v6  ;;  %v3027_v46 = vadd.f32 %v3026_v34, %v5008_v6  ;;  %v2598_v10 = vpop.permute.xlu0 %2597 }
 0x389   :  { %vm2642_vm14 = vcmp.eq.s32.totalorder %v4778_v59, %v2598_v10 }
 0x38a   :  { %vm2866_vm15 = vmand %vm2642_vm14, %vm2834_vm13 }
 0x38b   :  { %v5014_v40 = vsel %vm2866_vm15, 1.0, %v5474_v9 }
 0x38c   :  { %5551 = vst [vmem:[#allocation41_spill] sm:$0xff] %v5014_v40  ;;  %v3028_v49 = vadd.f32 %v3027_v46, %v5014_v40  ;;  %v2601_v26 = vpop.permute.xlu0 %2600 }
 0x38d   :  { %vm2643_vm2 = vcmp.eq.s32.totalorder %v4778_v59, %v2601_v26 }
 0x38e   :  { %vm2867_vm3 = vmand %vm2643_vm2, %vm2835_vm1  ;;  %vm3045_vm2 = vcmask 1024  }
 0x38f   :  { %v5020_v14 = vsel %vm2867_vm3, 1.0, %v5474_v9 }
 0x390   :  { %5552 = vst [vmem:[#allocation42_spill] sm:$0xff] %v5020_v14  ;;  %v3029_v47 = vadd.f32 %v3028_v49, %v5020_v14  ;;  %v2604_v28 = vpop.permute.xlu0 %2603 }
 0x391   :  { %vm2644_vm4 = vcmp.eq.s32.totalorder %v4778_v59, %v2604_v28 }
 0x392   :  { %vm2868_vm5 = vmand %vm2644_vm4, %vm2836_vm0 }
 0x393   :  { %v5026_v8 = vsel %vm2868_vm5, 1.0, %v5474_v9 }
 0x394   :  { %5553 = vst [vmem:[#allocation43_spill] sm:$0xff] %v5026_v8  ;;  %v3030_v60 = vadd.f32 %v3029_v47, %v5026_v8  ;;  %v2607_v4 = vpop.permute.xlu0 %2606 }
 0x395   :  { %vm2645_vm7 = vcmp.eq.s32.totalorder %v4778_v59, %v2607_v4 }
 0x396   :  { %vm2869_vm8 = vmand %vm2645_vm7, %vm2837_vm6 }
 0x397   :  { %v5032_v53 = vsel %vm2869_vm8, 1.0, %v5474_v9 }
 0x398   :  { %5554 = vst [vmem:[#allocation44_spill] sm:$0xff] %v5032_v53  ;;  %v3031_v33 = vadd.f32 %v3030_v60, %v5032_v53  ;;  %v2610_v16 = vpop.permute.xlu0 %2609 }
 0x399   :  { %vm2646_vm10 = vcmp.eq.s32.totalorder %v4778_v59, %v2610_v16 }
 0x39a   :  { %vm2870_vm11 = vmand %vm2646_vm10, %vm2838_vm9 }
 0x39b   :  { %v5038_v38 = vsel %vm2870_vm11, 1.0, %v5474_v9 }
 0x39c   :  { %5555 = vst [vmem:[#allocation45_spill] sm:$0xff] %v5038_v38  ;;  %v5041_v52 = vadd.f32 %v3031_v33, %v5038_v38 }
 0x3da   :  { %v3379_v7 = vpop.f32.mrb[64].mxu1 }
 0x3db   :  { %v5046_v12 = vadd.f32 %v3379_v7, %v5043_v0  ;;  %v2008_v43 = vpop.f32.mrb[65].mxu1 }
 0x3dc   :  { %v3380_v1 = vpop.f32.mrb[66].mxu1  ;;  %v5053_v5 = vadd.f32 %v5043_v0, %v2008_v43 }
 0x3dd   :  { %v5049_v55 = vadd.f32 %v3380_v1, %v5043_v0  ;;  %v2011_v50 = vpop.f32.mrb[67].mxu1  ;;  %2139 = vmax.xlane.f32.xlu1 %v5046_v12 }
 0x3de   :  { %v5057_v56 = vadd.f32 %v5043_v0, %v2011_v50 }
 0x3df   :  { %2141 = vmax.xlane.f32.xlu0 %v5049_v55 }
 0x3e1   :  { %2135 = vmax.xlane.f32.xlu1 %v5053_v5 }
 0x3e3   :  { %2137 = vmax.xlane.f32.xlu0 %v5057_v56 }
 0x3ea   :  { %v3383_v58 = vpop.f32.mrb[68].mxu1 }
 0x3eb   :  { %v5062_v44 = vadd.f32 %v3383_v58, %v5043_v0  ;;  %v2024_v15 = vpop.f32.mrb[69].mxu1 }
 0x3ec   :  { %v3384_v18 = vpop.f32.mrb[70].mxu1  ;;  %v5069_v41 = vadd.f32 %v5043_v0, %v2024_v15 }
 0x3ed   :  { %v5065_v62 = vadd.f32 %v3384_v18, %v5043_v0  ;;  %v2027_v11 = vpop.f32.mrb[71].mxu1  ;;  %2147 = vmax.xlane.f32.xlu1 %v5062_v44 }
 0x3ee   :  { %v5073_v27 = vadd.f32 %v5043_v0, %v2027_v11 }
 0x3ef   :  { %2149 = vmax.xlane.f32.xlu0 %v5065_v62 }
 0x3f1   :  { %2143 = vmax.xlane.f32.xlu1 %v5069_v41 }
 0x3f3   :  { %2145 = vmax.xlane.f32.xlu0 %v5073_v27 }
 0x3fa   :  { %v3387_v29 = vpop.f32.mrb[72].mxu1 }
 0x3fb   :  { %v5078_v34 = vadd.f32 %v3387_v29, %v5043_v0  ;;  %v2040_v51 = vpop.f32.mrb[73].mxu1 }
 0x3fc   :  { %v3388_v46 = vpop.f32.mrb[74].mxu1  ;;  %v5085_v26 = vadd.f32 %v5043_v0, %v2040_v51 }
 0x3fd   :  { %5556 = vst [vmem:[#allocation46_spill] sm:$0xff] %v5078_v34  ;;  %v5081_v10 = vadd.f32 %v3388_v46, %v5043_v0  ;;  %v2043_v49 = vpop.f32.mrb[75].mxu1  ;;  %2155 = vmax.xlane.f32.xlu1 %v5078_v34 }
 0x3fe   :  { %v5089_v47 = vadd.f32 %v5043_v0, %v2043_v49 }
 0x3ff   :  { %5557 = vst [vmem:[#allocation47_spill] sm:$0xff] %v5081_v10  ;;  %2157 = vmax.xlane.f32.xlu0 %v5081_v10 }
 0x401   :  { %2151 = vmax.xlane.f32.xlu1 %v5085_v26 }
 0x403   :  { %2153 = vmax.xlane.f32.xlu0 %v5089_v47 }
 0x40a   :  { %v3391_v28 = vpop.f32.mrb[76].mxu1 }
 0x40b   :  { %v5094_v60 = vadd.f32 %v3391_v28, %v5043_v0  ;;  %v2056_v4 = vpop.f32.mrb[77].mxu1 }
 0x40c   :  { %v3392_v33 = vpop.f32.mrb[78].mxu1  ;;  %v5101_v43 = vadd.f32 %v5043_v0, %v2056_v4 }
 0x40d   :  { %5558 = vst [vmem:[#allocation48_spill] sm:$0xff] %v5094_v60  ;;  %v5097_v16 = vadd.f32 %v3392_v33, %v5043_v0  ;;  %v2059_v7 = vpop.f32.mrb[79].mxu1  ;;  %2163 = vmax.xlane.f32.xlu1 %v5094_v60 }
 0x40e   :  { %v5105_v1 = vadd.f32 %v5043_v0, %v2059_v7 }
 0x40f   :  { %5559 = vst [vmem:[#allocation49_spill] sm:$0xff] %v5097_v16  ;;  %2165 = vmax.xlane.f32.xlu0 %v5097_v16 }
 0x411   :  { %2159 = vmax.xlane.f32.xlu1 %v5101_v43 }
 0x413   :  { %2161 = vmax.xlane.f32.xlu0 %v5105_v1 }
 0x41a   :  { %v3395_v50 = vpop.f32.mrb[80].mxu1 }
 0x41b   :  { %v5110_v58 = vadd.f32 %v3395_v50, %v5043_v0  ;;  %v2072_v15 = vpop.f32.mrb[81].mxu1 }
 0x41c   :  { %v3396_v18 = vpop.f32.mrb[82].mxu1  ;;  %v5117_v51 = vadd.f32 %v5043_v0, %v2072_v15 }
 0x41d   :  { %5560 = vst [vmem:[#allocation50_spill] sm:$0xff] %v5110_v58  ;;  %v5113_v11 = vadd.f32 %v3396_v18, %v5043_v0  ;;  %v2075_v29 = vpop.f32.mrb[83].mxu1  ;;  %2171 = vmax.xlane.f32.xlu1 %v5110_v58 }
 0x41e   :  { %v5121_v46 = vadd.f32 %v5043_v0, %v2075_v29 }
 0x41f   :  { %5561 = vst [vmem:[#allocation51_spill] sm:$0xff] %v5113_v11  ;;  %2173 = vmax.xlane.f32.xlu0 %v5113_v11 }
 0x420   :  { %5562 = vst [vmem:[#allocation52_spill] sm:$0xff] %v5121_v46 }
 0x421   :  { %2167 = vmax.xlane.f32.xlu1 %v5117_v51 }
 0x423   :  { %2169 = vmax.xlane.f32.xlu0 %v5121_v46 }
 0x42a   :  { %v3399_v49 = vpop.f32.mrb[84].mxu1 }
 0x42b   :  { %v5126_v28 = vadd.f32 %v3399_v49, %v5043_v0  ;;  %v2088_v4 = vpop.f32.mrb[85].mxu1 }
 0x42c   :  { %v3400_v33 = vpop.f32.mrb[86].mxu1  ;;  %v5133_v15 = vadd.f32 %v5043_v0, %v2088_v4 }
 0x42d   :  { %5563 = vst [vmem:[#allocation53_spill] sm:$0xff] %v5126_v28  ;;  %v5129_v7 = vadd.f32 %v3400_v33, %v5043_v0  ;;  %v2091_v50 = vpop.f32.mrb[87].mxu1  ;;  %2179 = vmax.xlane.f32.xlu1 %v5126_v28 }
 0x42e   :  { %v5137_v18 = vadd.f32 %v5043_v0, %v2091_v50 }
 0x42f   :  { %5564 = vst [vmem:[#allocation54_spill] sm:$0xff] %v5129_v7  ;;  %2181 = vmax.xlane.f32.xlu0 %v5129_v7 }
 0x430   :  { %5565 = vst [vmem:[#allocation55_spill] sm:$0xff] %v5137_v18 }
 0x431   :  { %2175 = vmax.xlane.f32.xlu1 %v5133_v15 }
 0x433   :  { %2177 = vmax.xlane.f32.xlu0 %v5137_v18 }
 0x43a   :  { %v3403_v29 = vpop.f32.mrb[88].mxu1 }
 0x43b   :  { %v5142_v49 = vadd.f32 %v3403_v29, %v5043_v0  ;;  %v2104_v33 = vpop.f32.mrb[89].mxu1 }
 0x43c   :  { %v3404_v9 = vpop.f32.mrb[90].mxu1  ;;  %v5149_v53 = vadd.f32 %v5043_v0, %v2104_v33 }
 0x43d   :  { %5566 = vst [vmem:[#allocation56_spill] sm:$0xff] %v5142_v49  ;;  %v5145_v38 = vadd.f32 %v3404_v9, %v5043_v0  ;;  %v2107_v4 = vpop.f32.mrb[91].mxu1  ;;  %2187 = vmax.xlane.f32.xlu1 %v5142_v49 }
 0x43e   :  { %v5153_v50 = vadd.f32 %v5043_v0, %v2107_v4 }
 0x43f   :  { %5567 = vst [vmem:[#allocation57_spill] sm:$0xff] %v5145_v38  ;;  %2189 = vmax.xlane.f32.xlu0 %v5145_v38 }
 0x440   :  { %5568 = vst [vmem:[#allocation58_spill] sm:$0xff] %v5153_v50 }
 0x441   :  { %2183 = vmax.xlane.f32.xlu1 %v5149_v53 }
 0x443   :  { %2185 = vmax.xlane.f32.xlu0 %v5153_v50 }
 0x44a   :  { %v3407_v29 = vpop.f32.mrb[92].mxu1 }
 0x44b   :  { %v5158_v8 = vadd.f32 %v3407_v29, %v5043_v0  ;;  %v2120_v9 = vpop.f32.mrb[93].mxu1 }
 0x44c   :  { %v3408_v14 = vpop.f32.mrb[94].mxu1  ;;  %v5165_v6 = vadd.f32 %v5043_v0, %v2120_v9 }
 0x44d   :  { %5569 = vst [vmem:[#allocation59_spill] sm:$0xff] %v5158_v8  ;;  %v5161_v40 = vadd.f32 %v3408_v14, %v5043_v0  ;;  %v2123_v33 = vpop.f32.mrb[95].mxu1  ;;  %2195 = vmax.xlane.f32.xlu1 %v5158_v8  ;;  %v2517_v14 = vld [vmem:[%s5459_s1 + $0xf0] sm:$0xff] }
 0x44e   :  { %5571 = vst [vmem:[#allocation61_spill] sm:$0xff] %v5165_v6  ;;  %v5169_v4 = vadd.f32 %v5043_v0, %v2123_v33  ;;  %vm2679_vm12 = vcmp.ge.s32.totalorder %v2517_v14, 0 }
 0x44f   :  { %5570 = vst [vmem:[#allocation60_spill] sm:$0xff] %v5161_v40  ;;  %2197 = vmax.xlane.f32.xlu0 %v5161_v40  ;;  %v2711_v29 = vsel %vm2679_vm12, 1, %v5529_v3 }
 0x450   :  { %5572 = vst [vmem:[#allocation62_spill] sm:$0xff] %v5169_v4 }
 0x451   :  { %2191 = vmax.xlane.f32.xlu1 %v5165_v6 }
 0x453   :  { %2193 = vmax.xlane.f32.xlu0 %v5169_v4 }
 0x462   :  { %2804 = vperm.xlu1 %3429, %v2711_v29  }
 0x469   :  { %2612 = vperm.xlu0 %3430, %v2517_v14  }
 0x46a   :  { %v5179_v57 = vpop.xlane.xlu1 %2139 }
 0x46b   :  { %v2201_v36 = vsub.f32 %v5046_v12, %v5179_v57 }
 0x46c   :  { %v5177_v9 = vpop.xlane.xlu0 %2141 }
 0x46d   :  { %v2202_v0 = vsub.f32 %v5049_v55, %v5177_v9  ;;  %v2235_v29 = vmul.f32 1.442695, %v2201_v36 }
 0x46e   :  { %v5187_v23 = vpop.xlane.xlu1 %2135 }
 0x46f   :  { %v2237_v17 = vmul.f32 1.442695, %v2202_v0  ;;  %v2199_v14 = vsub.f32 %v5053_v5, %v5187_v23 }
 0x470   :  { %v5183_v33 = vpop.xlane.xlu0 %2137 }
 0x471   :  { %v2200_v25 = vsub.f32 %v5057_v56, %v5183_v33  ;;  %3589 = vpow2.f32 %v2237_v17  ;;  %v2231_v13 = vmul.f32 1.442695, %v2199_v14 }
 0x472   :  { %3591 = vpow2.f32 %v2235_v29 }
 0x473   :  { %v2233_v20 = vmul.f32 1.442695, %v2200_v25 }
 0x475   :  { %3593 = vpow2.f32 %v2233_v20 }
 0x476   :  { %3595 = vpow2.f32 %v2231_v13 }
 0x47a   :  { %v5193_v24 = vpop.xlane.xlu1 %2147 }
 0x47b   :  { %v2205_v39 = vsub.f32 %v5062_v44, %v5193_v24  ;;  %v3590_v14 = vpop.eup %3589 }
 0x47c   :  { %v5195_v61 = vpop.xlane.xlu0 %2149  ;;  %v3592_v2 = vpop.eup %3591 }
 0x47d   :  { %v2206_v0 = vsub.f32 %v5065_v62, %v5195_v61  ;;  %v2243_v32 = vmul.f32 1.442695, %v2205_v39 }
 0x47e   :  { %v5201_v19 = vpop.xlane.xlu1 %2143 }
 0x47f   :  { %v2245_v36 = vmul.f32 1.442695, %v2206_v0  ;;  %v2203_v25 = vsub.f32 %v5069_v41, %v5201_v19  ;;  %v3594_v20 = vpop.eup %3593 }
 0x480   :  { %v5203_v37 = vpop.xlane.xlu0 %2145  ;;  %v3596_v39 = vpop.eup %3595 }
 0x481   :  { %v2204_v17 = vsub.f32 %v5073_v27, %v5203_v37  ;;  %3597 = vpow2.f32 %v2245_v36  ;;  %v2239_v45 = vmul.f32 1.442695, %v2203_v25 }
 0x482   :  { %3599 = vpow2.f32 %v2243_v32 }
 0x483   :  { %v2241_v29 = vmul.f32 1.442695, %v2204_v17 }
 0x485   :  { %3601 = vpow2.f32 %v2241_v29 }
 0x486   :  { %2301 = vadd.xlane.f32.xlu1 %v3590_v14  ;;  %3603 = vpow2.f32 %v2239_v45 }
 0x488   :  { %2299 = vadd.xlane.f32.xlu0 %v3592_v2 }
 0x48a   :  { %v5209_v0 = vpop.xlane.xlu1 %2155  ;;  %2297 = vadd.xlane.f32.xlu1 %v3594_v20 }
 0x48b   :  { %v2209_v13 = vsub.f32 %v5078_v34, %v5209_v0  ;;  %v3598_v36 = vpop.eup %3597 }
 0x48c   :  { %2295 = vadd.xlane.f32.xlu0 %v3596_v39  ;;  %v5213_v31 = vpop.xlane.xlu0 %2157  ;;  %v3600_v2 = vpop.eup %3599 }
 0x48d   :  { %5573 = vst [vmem:[#allocation63_spill] sm:$0xff] %v5213_v31  ;;  %v2251_v17 = vmul.f32 1.442695, %v2209_v13  ;;  %v2210_v32 = vsub.f32 %v5081_v10, %v5213_v31 }
 0x48e   :  { %v5217_v25 = vpop.xlane.xlu1 %2151  ;;  %2309 = vadd.xlane.f32.xlu1 %v3598_v36 }
 0x48f   :  { %3605 = vpow2.f32 %v2251_v17  ;;  %v2253_v45 = vmul.f32 1.442695, %v2210_v32  ;;  %v2207_v29 = vsub.f32 %v5085_v26, %v5217_v25  ;;  %v3602_v20 = vpop.eup %3601 }
 0x490   :  { %2307 = vadd.xlane.f32.xlu0 %v3600_v2  ;;  %v5221_v14 = vpop.xlane.xlu0 %2153  ;;  %v3604_v10 = vpop.eup %3603 }
 0x491   :  { %3607 = vpow2.f32 %v2253_v45  ;;  %v2247_v39 = vmul.f32 1.442695, %v2207_v29  ;;  %v2208_v13 = vsub.f32 %v5089_v47, %v5221_v14 }
 0x492   :  { %2305 = vadd.xlane.f32.xlu1 %v3602_v20 }
 0x493   :  { %3609 = vpow2.f32 %v2247_v39  ;;  %v2249_v31 = vmul.f32 1.442695, %v2208_v13 }
 0x494   :  { %2303 = vadd.xlane.f32.xlu0 %v3604_v10 }
 0x495   :  { %3611 = vpow2.f32 %v2249_v31 }
 0x499   :  { %v3606_v36 = vpop.eup %3605 }
 0x49a   :  { %v5225_v17 = vpop.xlane.xlu1 %2163  ;;  %2315 = vadd.xlane.f32.xlu0 %v3606_v36 }
 0x49b   :  { %5574 = vst [vmem:[#allocation64_spill] sm:$0xff] %v5225_v17  ;;  %v3608_v32 = vpop.eup %3607  ;;  %v2213_v2 = vsub.f32 %v5094_v60, %v5225_v17 }
 0x49c   :  { %2317 = vadd.xlane.f32.xlu1 %v3608_v32  ;;  %v5229_v45 = vpop.xlane.xlu0 %2165 }
 0x49d   :  { %5575 = vst [vmem:[#allocation65_spill] sm:$0xff] %v5229_v45  ;;  %v3610_v29 = vpop.eup %3609  ;;  %v2259_v34 = vmul.f32 1.442695, %v2213_v2  ;;  %v2214_v20 = vsub.f32 %v5097_v16, %v5229_v45 }
 0x49e   :  { %v5233_v39 = vpop.xlane.xlu1 %2159  ;;  %2311 = vadd.xlane.f32.xlu0 %v3610_v29 }
 0x49f   :  { %v3612_v31 = vpop.eup %3611  ;;  %3613 = vpow2.f32 %v2259_v34  ;;  %v2261_v10 = vmul.f32 1.442695, %v2214_v20  ;;  %v2211_v13 = vsub.f32 %v5101_v43, %v5233_v39 }
 0x4a0   :  { %2313 = vadd.xlane.f32.xlu1 %v3612_v31  ;;  %v5237_v36 = vpop.xlane.xlu0 %2161 }
 0x4a1   :  { %3615 = vpow2.f32 %v2261_v10  ;;  %v2255_v32 = vmul.f32 1.442695, %v2211_v13  ;;  %v2212_v2 = vsub.f32 %v5105_v1, %v5237_v36 }
 0x4a3   :  { %3617 = vpow2.f32 %v2255_v32  ;;  %v2257_v60 = vmul.f32 1.442695, %v2212_v2 }
 0x4a5   :  { %3619 = vpow2.f32 %v2257_v60 }
 0x4a9   :  { %v3614_v16 = vpop.eup %3613 }
 0x4aa   :  { %v5241_v45 = vpop.xlane.xlu1 %2171  ;;  %2323 = vadd.xlane.f32.xlu0 %v3614_v16 }
 0x4ab   :  { %v3616_v34 = vpop.eup %3615  ;;  %v2217_v29 = vsub.f32 %v5110_v58, %v5241_v45 }
 0x4ac   :  { %2325 = vadd.xlane.f32.xlu1 %v3616_v34  ;;  %v5245_v20 = vpop.xlane.xlu0 %2173 }
 0x4ad   :  { %5576 = vst [vmem:[#allocation66_spill] sm:$0xff] %v5245_v20  ;;  %v3618_v31 = vpop.eup %3617  ;;  %v2267_v10 = vmul.f32 1.442695, %v2217_v29  ;;  %v2218_v13 = vsub.f32 %v5113_v11, %v5245_v20 }
 0x4ae   :  { %v5249_v17 = vpop.xlane.xlu1 %2167  ;;  %2319 = vadd.xlane.f32.xlu0 %v3618_v31 }
 0x4af   :  { %v3620_v60 = vpop.eup %3619  ;;  %3621 = vpow2.f32 %v2267_v10  ;;  %v2269_v32 = vmul.f32 1.442695, %v2218_v13  ;;  %v2215_v16 = vsub.f32 %v5117_v51, %v5249_v17 }
 0x4b0   :  { %2321 = vadd.xlane.f32.xlu1 %v3620_v60  ;;  %v5253_v2 = vpop.xlane.xlu0 %2169 }
 0x4b1   :  { %3623 = vpow2.f32 %v2269_v32  ;;  %v2263_v34 = vmul.f32 1.442695, %v2215_v16  ;;  %v2216_v29 = vsub.f32 %v5121_v46, %v5253_v2 }
 0x4b3   :  { %3625 = vpow2.f32 %v2263_v34  ;;  %v2265_v58 = vmul.f32 1.442695, %v2216_v29 }
 0x4b5   :  { %3627 = vpow2.f32 %v2265_v58 }
 0x4b9   :  { %v3622_v11 = vpop.eup %3621 }
 0x4ba   :  { %v5257_v20 = vpop.xlane.xlu1 %2179  ;;  %2331 = vadd.xlane.f32.xlu0 %v3622_v11 }
 0x4bb   :  { %v3624_v31 = vpop.eup %3623  ;;  %v2221_v10 = vsub.f32 %v5126_v28, %v5257_v20 }
 0x4bc   :  { %2333 = vadd.xlane.f32.xlu1 %v3624_v31  ;;  %v5261_v13 = vpop.xlane.xlu0 %2181 }
 0x4bd   :  { %5577 = vst [vmem:[#allocation67_spill] sm:$0xff] %v5261_v13  ;;  %v3626_v60 = vpop.eup %3625  ;;  %v2275_v32 = vmul.f32 1.442695, %v2221_v10  ;;  %v2222_v16 = vsub.f32 %v5129_v7, %v5261_v13 }
 0x4be   :  { %v5265_v46 = vpop.xlane.xlu1 %2175  ;;  %2327 = vadd.xlane.f32.xlu0 %v3626_v60 }
 0x4bf   :  { %v3628_v58 = vpop.eup %3627  ;;  %3629 = vpow2.f32 %v2275_v32  ;;  %v2277_v34 = vmul.f32 1.442695, %v2222_v16  ;;  %v2219_v11 = vsub.f32 %v5133_v15, %v5265_v46 }
 0x4c0   :  { %2329 = vadd.xlane.f32.xlu1 %v3628_v58  ;;  %v5269_v29 = vpop.xlane.xlu0 %2177 }
 0x4c1   :  { %3631 = vpow2.f32 %v2277_v34  ;;  %v2271_v31 = vmul.f32 1.442695, %v2219_v11  ;;  %v2220_v10 = vsub.f32 %v5137_v18, %v5269_v29 }
 0x4c3   :  { %3633 = vpow2.f32 %v2271_v31  ;;  %v2273_v28 = vmul.f32 1.442695, %v2220_v10 }
 0x4c5   :  { %3635 = vpow2.f32 %v2273_v28 }
 0x4c9   :  { %v3630_v7 = vpop.eup %3629 }
 0x4ca   :  { %v5273_v13 = vpop.xlane.xlu1 %2187  ;;  %2339 = vadd.xlane.f32.xlu0 %v3630_v7 }
 0x4cb   :  { %v3632_v60 = vpop.eup %3631  ;;  %v2225_v32 = vsub.f32 %v5142_v49, %v5273_v13 }
 0x4cc   :  { %2341 = vadd.xlane.f32.xlu1 %v3632_v60  ;;  %v5277_v16 = vpop.xlane.xlu0 %2189 }
 0x4cd   :  { %5578 = vst [vmem:[#allocation68_spill] sm:$0xff] %v5277_v16  ;;  %v3634_v58 = vpop.eup %3633  ;;  %v2283_v34 = vmul.f32 1.442695, %v2225_v32  ;;  %v2226_v11 = vsub.f32 %v5145_v38, %v5277_v16 }
 0x4ce   :  { %v5281_v18 = vpop.xlane.xlu1 %2183  ;;  %2335 = vadd.xlane.f32.xlu0 %v3634_v58 }
 0x4cf   :  { %v3636_v28 = vpop.eup %3635  ;;  %3637 = vpow2.f32 %v2283_v34  ;;  %v2285_v31 = vmul.f32 1.442695, %v2226_v11  ;;  %v2223_v7 = vsub.f32 %v5149_v53, %v5281_v18 }
 0x4d0   :  { %2337 = vadd.xlane.f32.xlu1 %v3636_v28  ;;  %v5285_v10 = vpop.xlane.xlu0 %2185 }
 0x4d1   :  { %3639 = vpow2.f32 %v2285_v31  ;;  %v2279_v60 = vmul.f32 1.442695, %v2223_v7  ;;  %v2224_v32 = vsub.f32 %v5153_v50, %v5285_v10 }
 0x4d3   :  { %3641 = vpow2.f32 %v2279_v60  ;;  %v2281_v49 = vmul.f32 1.442695, %v2224_v32 }
 0x4d5   :  { %3643 = vpow2.f32 %v2281_v49 }
 0x4d9   :  { %v3638_v38 = vpop.eup %3637 }
 0x4da   :  { %v5289_v16 = vpop.xlane.xlu1 %2195  ;;  %2347 = vadd.xlane.f32.xlu0 %v3638_v38 }
 0x4db   :  { %5579 = vst [vmem:[#allocation69_spill] sm:$0xff] %v5289_v16  ;;  %v3640_v58 = vpop.eup %3639  ;;  %v2229_v34 = vsub.f32 %v5158_v8, %v5289_v16 }
 0x4dc   :  { %2349 = vadd.xlane.f32.xlu1 %v3640_v58  ;;  %v5293_v11 = vpop.xlane.xlu0 %2197 }
 0x4dd   :  { %5580 = vst [vmem:[#allocation70_spill] sm:$0xff] %v5293_v11  ;;  %v3642_v28 = vpop.eup %3641  ;;  %v2291_v31 = vmul.f32 1.442695, %v2229_v34  ;;  %v2230_v7 = vsub.f32 %v5161_v40, %v5293_v11 }
 0x4de   :  { %v5297_v50 = vpop.xlane.xlu1 %2191  ;;  %2343 = vadd.xlane.f32.xlu0 %v3642_v28 }
 0x4df   :  { %5581 = vst [vmem:[#allocation71_spill] sm:$0xff] %v5297_v50  ;;  %v3644_v49 = vpop.eup %3643  ;;  %3645 = vpow2.f32 %v2291_v31  ;;  %v2293_v60 = vmul.f32 1.442695, %v2230_v7  ;;  %v2227_v38 = vsub.f32 %v5165_v6, %v5297_v50  ;;  %v5583_v7 = vmov 0.0  }
 0x4e0   :  { %2345 = vadd.xlane.f32.xlu1 %v3644_v49  ;;  %v5301_v32 = vpop.xlane.xlu0 %2193 }
 0x4e1   :  { %5582 = vst [vmem:[#allocation72_spill] sm:$0xff] %v5301_v32  ;;  %3647 = vpow2.f32 %v2293_v60  ;;  %v2287_v58 = vmul.f32 1.442695, %v2227_v38  ;;  %v2228_v34 = vsub.f32 %v5169_v4, %v5301_v32 }
 0x4e2   :  { %v2805_v40 = vpop.permute.xlu1 %2804 }
 0x4e3   :  { %3649 = vpow2.f32 %v2287_v58  ;;  %v2289_v8 = vmul.f32 1.442695, %v2228_v34  ;;  %vm2839_vm13 = vcmp.eq.s32.totalorder %v2805_v40, 1  ;;  %v2518_v40 = vld [vmem:[%s5459_s1 + $0xf8] sm:$0xff]  ;;  %v3040_v34 = vld [vmem:[#allocation3 + $0x1] sm:$0x3] }
 0x4e4   :  { %vm2680_vm1 = vcmp.ge.s32.totalorder %v2518_v40, 0 }
 0x4e5   :  { %3651 = vpow2.f32 %v2289_v8 }
 0x4e8   :  { %v2613_v11 = vpop.permute.xlu0 %2612 }
 0x4e9   :  { %v3646_v28 = vpop.eup %3645  ;;  %vm2647_vm14 = vcmp.eq.s32.totalorder %v4778_v59, %v2613_v11  ;;  %v2712_v11 = vsel %vm2680_vm1, 1, %v5529_v3 }
 0x4ea   :  { %vm2871_vm15 = vmand %vm2647_vm14, %vm2839_vm13  ;;  %2355 = vadd.xlane.f32.xlu0 %v3646_v28  ;;  %v3041_v28 = vld [vmem:[#allocation3 + $0x3] sm:$0x3] }
 0x4eb   :  { %v3648_v31 = vpop.eup %3647  ;;  %v5307_v49 = vsel %vm2871_vm15, 1.0, %v5583_v7 }
 0x4ec   :  { %5584 = vst [vmem:[#allocation73_spill] sm:$0xff] %v5307_v49  ;;  %v5311_v60 = vadd.f32 %v5041_v52, %v5307_v49  ;;  %2357 = vadd.xlane.f32.xlu1 %v3648_v31  ;;  %v3042_v52 = vsub.f32 %v3040_v34, %v3041_v28 }
 0x4ed   :  { %v3650_v38 = vpop.eup %3649 }
 0x4ee   :  { %5585 = vst [vmem:[#allocation74_spill] sm:$0xff] %v5311_v60  ;;  %2351 = vadd.xlane.f32.xlu0 %v3650_v38 }
 0x4ef   :  { %v3652_v8 = vpop.eup %3651 }
 0x4f0   :  { %2353 = vadd.xlane.f32.xlu1 %v3652_v8  ;;  %v3043_v8 = vadd.f32 0.5, %v3042_v52 }
 0x4f2   :  { %v3044_v6 = vmax.f32 %v3043_v8, 0.0 }
 0x501   :  { %2807 = vperm.xlu1 %3429, %v2712_v11  }
 0x504   :  { %2615 = vperm.xlu0 %3430, %v2518_v40  }
 0x513   :  { %v2302_v58 = vpop.xlane.xlu1 %2301 }
 0x515   :  { %v2300_v4 = vpop.xlane.xlu0 %2299 }
 0x516   :  { %3653 = vlog2.f32 %v2300_v4  ;;  %v3046_v4 = vsel %vm3045_vm2, %v3044_v6, 0.0 }
 0x517   :  { %3655 = vlog2.f32 %v2302_v58  ;;  %v2298_v31 = vpop.xlane.xlu1 %2297 }
 0x518   :  { %3657 = vlog2.f32 %v2298_v31 }
 0x519   :  { %v2296_v38 = vpop.xlane.xlu0 %2295 }
 0x51a   :  { %3659 = vlog2.f32 %v2296_v38 }
 0x51b   :  { %v2310_v49 = vpop.xlane.xlu1 %2309 }
 0x51d   :  { %v2308_v32 = vpop.xlane.xlu0 %2307 }
 0x51f   :  { %v2306_v50 = vpop.xlane.xlu1 %2305 }
 0x520   :  { %v3654_v3 = vpop.eup %3653  ;;  %3661 = vlog2.f32 %v2306_v50 }
 0x521   :  { %v3656_v40 = vpop.eup %3655  ;;  %v2364_v11 = vmul.f32 0.6931472, %v3654_v3  ;;  %3663 = vlog2.f32 %v2308_v32  ;;  %v2304_v60 = vpop.xlane.xlu0 %2303 }
 0x522   :  { %v3658_v16 = vpop.eup %3657  ;;  %3665 = vlog2.f32 %v2304_v60  ;;  %v2366_v28 = vmul.f32 0.6931472, %v3656_v40 }
 0x523   :  { %v2362_v58 = vmul.f32 0.6931472, %v3658_v16  ;;  %3047 = vadd.xlane.f32.xlu0 %v3046_v4  ;;  %v2425_v52 = vadd.f32 %v2364_v11, %v5179_v57  ;;  %3667 = vlog2.f32 %v2310_v49 }
 0x524   :  { %v3660_v34 = vpop.eup %3659  ;;  %v2426_v32 = vadd.f32 %v2366_v28, %v5177_v9 }
 0x525   :  { %v2424_v31 = vadd.f32 %v2362_v58, %v5183_v33  ;;  %v2360_v38 = vmul.f32 0.6931472, %v3660_v34  ;;  %v2457_v60 = vsub.f32 %v5046_v12, %v2425_v52 }
 0x526   :  { %v2458_v49 = vsub.f32 %v5049_v55, %v2426_v32 }
 0x527   :  { %v2456_v8 = vsub.f32 %v5057_v56, %v2424_v31  ;;  %v2423_v50 = vadd.f32 %v2360_v38, %v5187_v23  ;;  %v2316_v3 = vpop.xlane.xlu0 %2315  ;;  %v2908_v56 = vsub.f32 0.0, %v2457_v60 }
 0x529   :  { %v2907_v6 = vsub.f32 0.0, %v2456_v8  ;;  %v2455_v16 = vsub.f32 %v5053_v5, %v2423_v50  ;;  %v2318_v4 = vpop.xlane.xlu1 %2317  ;;  %v2909_v8 = vsub.f32 0.0, %v2458_v49  ;;  %v2940_v55 = vmul.f32 %v2908_v56, %v4808_v35 }
 0x52a   :  { %v3662_v40 = vpop.eup %3661 }
 0x52b   :  { %v3664_v7 = vpop.eup %3663  ;;  %v2906_v57 = vsub.f32 0.0, %v2455_v16  ;;  %v2370_v11 = vmul.f32 0.6931472, %v3662_v40  ;;  %v2312_v33 = vpop.xlane.xlu0 %2311  ;;  %v2939_v23 = vmul.f32 %v2907_v6, %v4797_v48 }
 0x52c   :  { %v3666_v58 = vpop.eup %3665  ;;  %3669 = vlog2.f32 %v2312_v33  ;;  %v2372_v52 = vmul.f32 0.6931472, %v3664_v7  ;;  %v2941_v7 = vmul.f32 %v2909_v8, %v4818_v21 }
 0x52d   :  { %v2938_v9 = vmul.f32 %v2906_v57, %v4794_v30  ;;  %v2368_v34 = vmul.f32 0.6931472, %v3666_v58  ;;  %v2314_v12 = vpop.xlane.xlu1 %2313  ;;  %v3668_v28 = vpop.eup %3667  ;;  %v2428_v31 = vadd.f32 %v2370_v11, %v5203_v37 }
 0x52e   :  { %3671 = vlog2.f32 %v2314_v12  ;;  %v2374_v32 = vmul.f32 0.6931472, %v3668_v28  ;;  %v2429_v30 = vadd.f32 %v2372_v52, %v5193_v24 }
 0x52f   :  { %v2970_v5 = vadd.f32 %v2939_v23, %v2938_v9  ;;  %v2427_v38 = vadd.f32 %v2368_v34, %v5201_v19  ;;  %3673 = vlog2.f32 %v2316_v3  ;;  %v2460_v60 = vsub.f32 %v5073_v27, %v2428_v31  ;;  %v5586_v31 = vld [vmem:[#allocation27_spill] sm:$0xff] }
 0x530   :  { %3675 = vlog2.f32 %v2318_v4  ;;  %v2430_v19 = vadd.f32 %v2374_v32, %v5195_v61  ;;  %v2461_v3 = vsub.f32 %v5062_v44, %v2429_v30  ;;  %v5588_v32 = vld [vmem:[#allocation63_spill] sm:$0xff] }
 0x531   :  { %v2459_v50 = vsub.f32 %v5069_v41, %v2427_v38  ;;  %v2971_v48 = vadd.f32 %v2970_v5, %v2940_v55  ;;  %v2911_v35 = vsub.f32 0.0, %v2460_v60  ;;  %v5587_v55 = vld [vmem:[#allocation46_spill] sm:$0xff] }
 0x532   :  { %v2462_v21 = vsub.f32 %v5065_v62, %v2430_v19  ;;  %v2912_v49 = vsub.f32 0.0, %v2461_v3  ;;  %v5590_v3 = vld [vmem:[#allocation47_spill] sm:$0xff] }
 0x533   :  { %v2910_v6 = vsub.f32 0.0, %v2459_v50  ;;  %v2972_v40 = vadd.f32 %v2971_v48, %v2941_v7  ;;  %v5589_v7 = vld [vmem:[#allocation28_spill] sm:$0xff] }
 0x534   :  { %v2944_v28 = vmul.f32 %v2912_v49, %v4852_v54 }
 0x535   :  { %v2942_v37 = vmul.f32 %v2910_v6, %v4828_v22  ;;  %v2943_v22 = vmul.f32 %v2911_v35, %v4841_v63 }
 0x536   :  { %v3670_v16 = vpop.eup %3669 }
 0x537   :  { %v2376_v41 = vmul.f32 0.6931472, %v3670_v16  ;;  %v2324_v57 = vpop.xlane.xlu0 %2323  ;;  %v2973_v33 = vadd.f32 %v2972_v40, %v2942_v37 }
 0x538   :  { %v3672_v11 = vpop.eup %3671 }
 0x539   :  { %v2431_v24 = vadd.f32 %v2376_v41, %v5217_v25  ;;  %v2326_v27 = vpop.xlane.xlu1 %2325  ;;  %v3674_v58 = vpop.eup %3673  ;;  %v2378_v4 = vmul.f32 0.6931472, %v3672_v11  ;;  %v2974_v23 = vadd.f32 %v2973_v33, %v2943_v22  ;;  %v2913_v25 = vsub.f32 0.0, %v2462_v21 }
 0x53a   :  { %v2380_v9 = vmul.f32 0.6931472, %v3674_v58  ;;  %v3676_v12 = vpop.eup %3675 }
 0x53b   :  { %v2463_v61 = vsub.f32 %v5085_v26, %v2431_v24  ;;  %v2320_v56 = vpop.xlane.xlu0 %2319  ;;  %v2432_v44 = vadd.f32 %v2378_v4, %v5221_v14  ;;  %v2382_v52 = vmul.f32 0.6931472, %v3676_v12  ;;  %v2975_v26 = vadd.f32 %v2974_v23, %v2944_v28  ;;  %v5591_v4 = vld [vmem:[#allocation29_spill] sm:$0xff]  ;;  %v5595_v28 = vld [vmem:[#allocation48_spill] sm:$0xff] }
 0x53c   :  { %3677 = vlog2.f32 %v2320_v56  ;;  %v2433_v63 = vadd.f32 %v2380_v9, %v5209_v0  ;;  %v2945_v14 = vmul.f32 %v2913_v25, %v4863_v42 }
 0x53d   :  { %3679 = vlog2.f32 %v2324_v57  ;;  %v2322_v34 = vpop.xlane.xlu1 %2321  ;;  %v2914_v5 = vsub.f32 0.0, %v2463_v61  ;;  %v2464_v62 = vsub.f32 %v5089_v47, %v2432_v44  ;;  %v2434_v48 = vadd.f32 %v2382_v52, %v5588_v32  ;;  %v5592_v44 = vld [vmem:[#allocation64_spill] sm:$0xff] }
 0x53e   :  { %3681 = vlog2.f32 %v2322_v34  ;;  %v2465_v50 = vsub.f32 %v5587_v55, %v2433_v63  ;;  %v2976_v30 = vadd.f32 %v2975_v26, %v2945_v14  ;;  %v5598_v55 = vld [vmem:[#allocation49_spill] sm:$0xff] }
 0x53f   :  { %3683 = vlog2.f32 %v2326_v27  ;;  %v2946_v38 = vmul.f32 %v2914_v5, %v5586_v31  ;;  %v2915_v8 = vsub.f32 0.0, %v2464_v62  ;;  %v2466_v35 = vsub.f32 %v5590_v3, %v2434_v48  ;;  %v5596_v62 = vld [vmem:[#allocation65_spill] sm:$0xff] }
 0x540   :  { %v2916_v19 = vsub.f32 0.0, %v2465_v50 }
 0x541   :  { %v2977_v6 = vadd.f32 %v2976_v30, %v2946_v38  ;;  %v2947_v47 = vmul.f32 %v2915_v8, %v5589_v7  ;;  %v2917_v49 = vsub.f32 0.0, %v2466_v35 }
 0x542   :  { %v2948_v21 = vmul.f32 %v2916_v19, %v5591_v4  ;;  %v5602_v4 = vld [vmem:[#allocation35_spill] sm:$0xff] }
 0x543   :  { %v2978_v11 = vadd.f32 %v2977_v6, %v2947_v47 }
 0x546   :  { %v3678_v60 = vpop.eup %3677 }
 0x547   :  { %v3680_v54 = vpop.eup %3679  ;;  %v2384_v37 = vmul.f32 0.6931472, %v3678_v60  ;;  %v2332_v0 = vpop.xlane.xlu0 %2331 }
 0x548   :  { %v3682_v16 = vpop.eup %3681  ;;  %v2388_v57 = vmul.f32 0.6931472, %v3680_v54  ;;  %3685 = vlog2.f32 %v2332_v0  ;;  %v5599_v0 = vld [vmem:[#allocation33_spill] sm:$0xff] }
 0x549   :  { %v2435_v42 = vadd.f32 %v2384_v37, %v5233_v39  ;;  %v2386_v40 = vmul.f32 0.6931472, %v3682_v16  ;;  %v2334_v41 = vpop.xlane.xlu1 %2333  ;;  %v3684_v58 = vpop.eup %3683  ;;  %v2979_v39 = vadd.f32 %v2978_v11, %v2948_v21 }
 0x54a   :  { %v2437_v23 = vadd.f32 %v2388_v57, %v5592_v44  ;;  %v2390_v9 = vmul.f32 0.6931472, %v3684_v58  ;;  %v5605_v44 = vld [vmem:[#allocation25_spill] sm:$0xff] }
 0x54b   :  { %v2467_v33 = vsub.f32 %v5101_v43, %v2435_v42  ;;  %v2436_v24 = vadd.f32 %v2386_v40, %v5237_v36  ;;  %v2328_v27 = vpop.xlane.xlu0 %2327  ;;  %v5593_v43 = vld [vmem:[#allocation30_spill] sm:$0xff]  ;;  %v5594_v36 = vld [vmem:[#allocation31_spill] sm:$0xff] }
 0x54c   :  { %3687 = vlog2.f32 %v2328_v27  ;;  %v2949_v34 = vmul.f32 %v2917_v49, %v5593_v43  ;;  %v2469_v5 = vsub.f32 %v5595_v28, %v2437_v23  ;;  %v2438_v63 = vadd.f32 %v2390_v9, %v5596_v62  ;;  %v5601_v27 = vld [vmem:[#allocation34_spill] sm:$0xff] }
 0x54d   :  { %v2918_v22 = vsub.f32 0.0, %v2467_v33  ;;  %v2468_v61 = vsub.f32 %v5105_v1, %v2436_v24  ;;  %v2330_v56 = vpop.xlane.xlu1 %2329  ;;  %v5597_v1 = vld [vmem:[#allocation32_spill] sm:$0xff] }
 0x54e   :  { %3689 = vlog2.f32 %v2330_v56  ;;  %v2980_v52 = vadd.f32 %v2979_v39, %v2949_v34  ;;  %v2920_v8 = vsub.f32 0.0, %v2469_v5  ;;  %v2470_v50 = vsub.f32 %v5598_v55, %v2438_v63  ;;  %v5600_v33 = vld [vmem:[#allocation52_spill] sm:$0xff] }
 0x54f   :  { %3691 = vlog2.f32 %v2334_v41  ;;  %v2950_v12 = vmul.f32 %v2918_v22, %v5594_v36  ;;  %v2919_v25 = vsub.f32 0.0, %v2468_v61  ;;  %v5603_v22 = vld [vmem:[#allocation50_spill] sm:$0xff]  ;;  %v5606_v36 = vld [vmem:[#allocation51_spill] sm:$0xff] }
 0x550   :  { %v2952_v16 = vmul.f32 %v2920_v8, %v5599_v0  ;;  %v2921_v19 = vsub.f32 0.0, %v2470_v50  ;;  %v5604_v61 = vld [vmem:[#allocation66_spill] sm:$0xff] }
 0x551   :  { %v2981_v14 = vadd.f32 %v2980_v52, %v2950_v12  ;;  %v2951_v31 = vmul.f32 %v2919_v25, %v5597_v1 }
 0x552   :  { %v3686_v26 = vpop.eup %3685  ;;  %v2953_v58 = vmul.f32 %v2921_v19, %v5601_v27  ;;  %v5612_v19 = vld [vmem:[#allocation55_spill] sm:$0xff] }
 0x553   :  { %v2396_v60 = vmul.f32 0.6931472, %v3686_v26  ;;  %v2982_v54 = vadd.f32 %v2981_v14, %v2951_v31  ;;  %v5607_v14 = vld [vmem:[#allocation24_spill] sm:$0xff] }
 0x555   :  { %v2441_v40 = vadd.f32 %v2396_v60, %v5241_v45  ;;  %v2983_v41 = vadd.f32 %v2982_v54, %v2952_v16 }
 0x556   :  { %v3688_v38 = vpop.eup %3687 }
 0x557   :  { %v2392_v32 = vmul.f32 0.6931472, %v3688_v38  ;;  %v2340_v48 = vpop.xlane.xlu0 %2339  ;;  %v2984_v56 = vadd.f32 %v2983_v41, %v2953_v58  ;;  %v5608_v38 = vld [vmem:[#allocation67_spill] sm:$0xff] }
 0x558   :  { %v3690_v30 = vpop.eup %3689  ;;  %3693 = vlog2.f32 %v2340_v48 }
 0x559   :  { %v2439_v6 = vadd.f32 %v2392_v32, %v5249_v17  ;;  %v2394_v7 = vmul.f32 0.6931472, %v3690_v30  ;;  %v2342_v47 = vpop.xlane.xlu1 %2341  ;;  %v3692_v37 = vpop.eup %3691  ;;  %v5609_v30 = vld [vmem:[#allocation53_spill] sm:$0xff] }
 0x55a   :  { %3695 = vlog2.f32 %v2342_v47  ;;  %v2398_v57 = vmul.f32 0.6931472, %v3692_v37  ;;  %v5611_v37 = vld [vmem:[#allocation54_spill] sm:$0xff] }
 0x55b   :  { %v2471_v3 = vsub.f32 %v5117_v51, %v2439_v6  ;;  %v2440_v35 = vadd.f32 %v2394_v7, %v5253_v2  ;;  %v2336_v42 = vpop.xlane.xlu0 %2335  ;;  %v2473_v51 = vsub.f32 %v5603_v22, %v2441_v40  ;;  %v5610_v7 = vld [vmem:[#allocation26_spill] sm:$0xff]  ;;  %v5613_v40 = vld [vmem:[#allocation36_spill] sm:$0xff] }
 0x55c   :  { %3697 = vlog2.f32 %v2336_v42  ;;  %v2442_v2 = vadd.f32 %v2398_v57, %v5604_v61 }
 0x55d   :  { %v2922_v11 = vsub.f32 0.0, %v2471_v3  ;;  %v2472_v17 = vsub.f32 %v5600_v33, %v2440_v35  ;;  %v2338_v24 = vpop.xlane.xlu1 %2337  ;;  %v2924_v34 = vsub.f32 0.0, %v2473_v51  ;;  %v5614_v33 = vld [vmem:[#allocation37_spill] sm:$0xff] }
 0x55e   :  { %3699 = vlog2.f32 %v2338_v24  ;;  %v2474_v12 = vsub.f32 %v5606_v36, %v2442_v2  ;;  %v5615_v24 = vld [vmem:[#allocation38_spill] sm:$0xff]  ;;  %v5617_v36 = vld [vmem:[#allocation68_spill] sm:$0xff] }
 0x55f   :  { %v2954_v21 = vmul.f32 %v2922_v11, %v5602_v4  ;;  %v2923_v49 = vsub.f32 0.0, %v2472_v17  ;;  %v2956_v1 = vmul.f32 %v2924_v34, %v5607_v14 }
 0x560   :  { %v2925_v31 = vsub.f32 0.0, %v2474_v12 }
 0x561   :  { %v2985_v45 = vadd.f32 %v2984_v56, %v2954_v21  ;;  %v2955_v23 = vmul.f32 %v2923_v49, %v5605_v44  ;;  %v5616_v49 = vld [vmem:[#allocation39_spill] sm:$0xff] }
 0x562   :  { %v3694_v39 = vpop.eup %3693  ;;  %v2957_v47 = vmul.f32 %v2925_v31, %v5610_v7 }
 0x563   :  { %v2404_v9 = vmul.f32 0.6931472, %v3694_v39  ;;  %v2986_v5 = vadd.f32 %v2985_v45, %v2955_v23 }
 0x564   :  { %v3696_v43 = vpop.eup %3695 }
 0x565   :  { %v2406_v25 = vmul.f32 0.6931472, %v3696_v43  ;;  %v2445_v62 = vadd.f32 %v2404_v9, %v5257_v20  ;;  %v2987_v48 = vadd.f32 %v2986_v5, %v2956_v1  ;;  %v5620_v1 = vld [vmem:[#allocation57_spill] sm:$0xff] }
 0x566   :  { %v3698_v28 = vpop.eup %3697 }
 0x567   :  { %v2400_v63 = vmul.f32 0.6931472, %v3698_v28  ;;  %v2348_v52 = vpop.xlane.xlu0 %2347  ;;  %v2446_v8 = vadd.f32 %v2406_v25, %v5608_v38  ;;  %v2477_v60 = vsub.f32 %v5609_v30, %v2445_v62  ;;  %v2988_v42 = vadd.f32 %v2987_v48, %v2957_v47  ;;  %v5618_v25 = vld [vmem:[#allocation56_spill] sm:$0xff] }
 0x568   :  { %v3700_v26 = vpop.eup %3699  ;;  %3701 = vlog2.f32 %v2348_v52  ;;  %v5619_v52 = vld [vmem:[#allocation58_spill] sm:$0xff]  ;;  %v5621_v38 = vld [vmem:[#allocation40_spill] sm:$0xff] }
 0x569   :  { %v2443_v55 = vadd.f32 %v2400_v63, %v5265_v46  ;;  %v2402_v50 = vmul.f32 0.6931472, %v3700_v26  ;;  %v2350_v32 = vpop.xlane.xlu1 %2349  ;;  %v2478_v0 = vsub.f32 %v5611_v37, %v2446_v8  ;;  %v2928_v35 = vsub.f32 0.0, %v2477_v60 }
 0x56a   :  { %3703 = vlog2.f32 %v2350_v32  ;;  %v5622_v32 = vld [vmem:[#allocation41_spill] sm:$0xff] }
 0x56b   :  { %v2475_v54 = vsub.f32 %v5133_v15, %v2443_v55  ;;  %v2444_v20 = vadd.f32 %v2402_v50, %v5269_v29  ;;  %v2344_v6 = vpop.xlane.xlu0 %2343  ;;  %v2929_v11 = vsub.f32 0.0, %v2478_v0  ;;  %v2960_v27 = vmul.f32 %v2928_v35, %v5615_v24  ;;  %v5629_v24 = vld [vmem:[#allocation71_spill] sm:$0xff] }
 0x56c   :  { %3705 = vlog2.f32 %v2344_v6 }
 0x56d   :  { %v2926_v16 = vsub.f32 0.0, %v2475_v54  ;;  %v2476_v3 = vsub.f32 %v5612_v19, %v2444_v20  ;;  %v2346_v46 = vpop.xlane.xlu1 %2345  ;;  %v2961_v22 = vmul.f32 %v2929_v11, %v5616_v49  ;;  %v5624_v19 = vld [vmem:[#allocation43_spill] sm:$0xff] }
 0x56e   :  { %3707 = vlog2.f32 %v2346_v46  ;;  %v5625_v46 = vmov 0.0  }
 0x56f   :  { %v2958_v41 = vmul.f32 %v2926_v16, %v5613_v40  ;;  %v2927_v57 = vsub.f32 0.0, %v2476_v3 }
 0x571   :  { %v2989_v15 = vadd.f32 %v2988_v42, %v2958_v41  ;;  %v2959_v29 = vmul.f32 %v2927_v57, %v5614_v33  ;;  %v5626_v42 = vld [vmem:[#allocation69_spill] sm:$0xff]  ;;  %v5627_v57 = vld [vmem:[#allocation74_spill] sm:$0xff] }
 0x572   :  { %v3702_v17 = vpop.eup %3701 }
 0x573   :  { %v2990_v58 = vadd.f32 %v2989_v15, %v2959_v29  ;;  %v2412_v4 = vmul.f32 0.6931472, %v3702_v17  ;;  %v5628_v29 = vld [vmem:[#allocation70_spill] sm:$0xff] }
 0x574   :  { %v3704_v21 = vpop.eup %3703 }
 0x575   :  { %v2991_v51 = vadd.f32 %v2990_v58, %v2960_v27  ;;  %v2414_v2 = vmul.f32 0.6931472, %v3704_v21  ;;  %v2449_v56 = vadd.f32 %v2412_v4, %v5273_v13  ;;  %v5630_v58 = vld [vmem:[#allocation59_spill] sm:$0xff]  ;;  %v5631_v21 = vld [vmem:[#allocation61_spill] sm:$0xff] }
 0x576   :  { %v3706_v61 = vpop.eup %3705 }
 0x577   :  { %v2992_v39 = vadd.f32 %v2991_v51, %v2961_v22  ;;  %v2408_v45 = vmul.f32 0.6931472, %v3706_v61  ;;  %v2356_v44 = vpop.xlane.xlu0 %2355  ;;  %v2450_v12 = vadd.f32 %v2414_v2, %v5617_v36  ;;  %v2481_v28 = vsub.f32 %v5618_v25, %v2449_v56  ;;  %v5632_v22 = vld [vmem:[#allocation72_spill] sm:$0xff]  ;;  %v5633_v2 = vld [vmem:[#allocation62_spill] sm:$0xff] }
 0x578   :  { %v3708_v23 = vpop.eup %3707  ;;  %3709 = vlog2.f32 %v2356_v44 }
 0x579   :  { %v2447_v9 = vadd.f32 %v2408_v45, %v5281_v18  ;;  %v2410_v43 = vmul.f32 0.6931472, %v3708_v23  ;;  %v2358_v34 = vpop.xlane.xlu1 %2357  ;;  %v2482_v31 = vsub.f32 %v5620_v1, %v2450_v12  ;;  %v2932_v18 = vsub.f32 0.0, %v2481_v28  ;;  %v5635_v23 = vld [vmem:[#allocation44_spill] sm:$0xff]  ;;  %v5637_v28 = vld [vmem:[#allocation73_spill] sm:$0xff] }
 0x57a   :  { %3711 = vlog2.f32 %v2358_v34  ;;  %v5636_v34 = vld [vmem:[#allocation45_spill] sm:$0xff] }
 0x57b   :  { %v2479_v5 = vsub.f32 %v5149_v53, %v2447_v9  ;;  %v2448_v62 = vadd.f32 %v2410_v43, %v5285_v10  ;;  %v2352_v63 = vpop.xlane.xlu0 %2351  ;;  %v2933_v60 = vsub.f32 0.0, %v2482_v31  ;;  %v5623_v10 = vld [vmem:[#allocation42_spill] sm:$0xff] }
 0x57c   :  { %3713 = vlog2.f32 %v2352_v63  ;;  %v2964_v54 = vmul.f32 %v2932_v18, %v5623_v10 }
 0x57d   :  { %v2930_v13 = vsub.f32 0.0, %v2479_v5  ;;  %v2480_v26 = vsub.f32 %v5619_v52, %v2448_v62  ;;  %v2354_v14 = vpop.xlane.xlu1 %2353  ;;  %v2965_v3 = vmul.f32 %v2933_v60, %v5624_v19 }
 0x57e   :  { %3715 = vlog2.f32 %v2354_v14 }
 0x57f   :  { %v2962_v8 = vmul.f32 %v2930_v13, %v5621_v38  ;;  %v2931_v55 = vsub.f32 0.0, %v2480_v26 }
 0x581   :  { %v2993_v50 = vadd.f32 %v2992_v39, %v2962_v8  ;;  %v2963_v48 = vmul.f32 %v2931_v55, %v5622_v32  ;;  %v2808_v30 = vpop.permute.xlu1 %2807  ;;  %v5634_v39 = vld [vmem:[#allocation60_spill] sm:$0xff] }
 0x582   :  { %v3710_v53 = vpop.eup %3709  ;;  %vm2840_vm3 = vcmp.eq.s32.totalorder %v2808_v30, 1 }
 0x583   :  { %v2994_v20 = vadd.f32 %v2993_v50, %v2963_v48  ;;  %v2420_v6 = vmul.f32 0.6931472, %v3710_v53  ;;  %v2616_v7 = vpop.permute.xlu0 %2615 }
 0x584   :  { %v3712_v47 = vpop.eup %3711  ;;  %vm2648_vm0 = vcmp.eq.s32.totalorder %v4778_v59, %v2616_v7 }
 0x585   :  { %v2995_v37 = vadd.f32 %v2994_v20, %v2964_v54  ;;  %v2422_v0 = vmul.f32 0.6931472, %v3712_v47  ;;  %vm2872_vm4 = vmand %vm2648_vm0, %vm2840_vm3  ;;  %v2453_v40 = vadd.f32 %v2420_v6, %v5626_v42 }
 0x586   :  { %v3714_v16 = vpop.eup %3713  ;;  %v2904_v35 = vsel %vm2872_vm4, 1.0, %v5625_v46 }
 0x587   :  { %v2416_v41 = vmul.f32 0.6931472, %v3714_v16  ;;  %v3034_v11 = vadd.f32 %v5627_v57, %v2904_v35  ;;  %v2996_v33 = vadd.f32 %v2995_v37, %v2965_v3  ;;  %v2454_v17 = vadd.f32 %v2422_v0, %v5628_v29 }
 0x588   :  { %v3716_v15 = vpop.eup %3715  ;;  %v2485_v4 = vsub.f32 %v5630_v58, %v2453_v40 }
 0x589   :  { %v2451_v27 = vadd.f32 %v2416_v41, %v5629_v24  ;;  %v2418_v59 = vmul.f32 0.6931472, %v3716_v15  ;;  %3070 = vadd.xlane.f32.xlu0 %v3034_v11  ;;  %v2486_v45 = vsub.f32 %v5634_v39, %v2454_v17 }
 0x58a   :  { %v2936_v44 = vsub.f32 0.0, %v2485_v4 }
 0x58b   :  { %v2483_v49 = vsub.f32 %v5631_v21, %v2451_v27  ;;  %v2452_v51 = vadd.f32 %v2418_v59, %v5632_v22  ;;  %v2937_v12 = vsub.f32 0.0, %v2486_v45 }
 0x58c   :  { %v2968_v5 = vmul.f32 %v2936_v44, %v5637_v28 }
 0x58d   :  { %v2934_v61 = vsub.f32 0.0, %v2483_v49  ;;  %v2484_v56 = vsub.f32 %v5633_v2, %v2452_v51  ;;  %v2969_v63 = vmul.f32 %v2937_v12, %v2904_v35 }
 0x58f   :  { %v2966_v9 = vmul.f32 %v2934_v61, %v5635_v23  ;;  %v2935_v43 = vsub.f32 0.0, %v2484_v56 }
 0x591   :  { %v2967_v36 = vmul.f32 %v2935_v43, %v5636_v34  ;;  %v2997_v25 = vadd.f32 %v2996_v33, %v2966_v9 }
 0x593   :  { %v2998_v62 = vadd.f32 %v2997_v25, %v2967_v36 }
 0x595   :  { %v2999_v13 = vadd.f32 %v2998_v62, %v2968_v5 }
 0x597   :  { %v3000_v52 = vadd.f32 %v2999_v13, %v2969_v63 }
 0x599   :  { %3060 = vadd.xlane.f32.xlu1 %v3000_v52 }
 0x5b0   :  { %v3048_v26 = vpop.xlane.xlu0 %3047 }
 0x5b1   :  { %v3049_v14 = vrot.slane %v3048_v26, 4 }
 0x5b3   :  { %v3050_v1 = vadd.f32 %v3049_v14, %v3048_v26 }
 0x5b5   :  { %v3051_v31 = vrot.slane %v3050_v1, 2 }
 0x5b7   :  { %v3052_v18 = vadd.f32 %v3051_v31, %v3050_v1 }
 0x5b9   :  { %v3053_v38 = vrot.slane %v3052_v18, 1 }
 0x5bb   :  { %v3054_v8 = vadd.f32 %v3053_v38, %v3052_v18 }
 0x5bd   :  { %3409 = vpush %v3054_v8 }
 0x5ee   :  { %s5415_s1 = spop %3409 }
 0x5ef   :  { %s3058_s22 = smul.f32 0.5, %s5415_s1 }
 0x5f1   :  { %3084 = sst [smem:[#allocation16]] %s3058_s22 }
 0x616   :  { %v3071_v55 = vpop.xlane.xlu0 %3070 }
 0x617   :  { %v3072_v50 = vrot.slane %v3071_v55, 4 }
 0x619   :  { %v3073_v32 = vadd.f32 %v3072_v50, %v3071_v55 }
 0x61b   :  { %v3074_v48 = vrot.slane %v3073_v32, 2 }
 0x626   :  { %v3061_v30 = vpop.xlane.xlu1 %3060 }
 0x627   :  { %v3062_v53 = vrot.slane %v3061_v30, 4 }
 0x628   :  { %3845 = shalt.err (!%p3842_p0)
}
 0x629   :  { %s3885_s29 = smov [#allocation16]   ;;  %v3063_v60 = vadd.f32 %v3062_v53, %v3061_v30  ;;  %v3075_v10 = vadd.f32 %v3074_v48, %v3073_v32  ;;  %s3846_s23 = scalar_lea.hbm %s5470_s12, 16 }
 0x62a   :  { %3107 = dma.smem_to_hbm %s3885_s29, 16, %s5469_s11, [#allocation17]  }
 0x62b   :  { %v3064_v54 = vrot.slane %v3063_v60, 2  ;;  %v3076_v6 = vrot.slane %v3075_v10, 1  ;;  %s3087_s11 = smul.f32 0.5, %s3058_s22  ;;  %p3847_p1 = scmp.ne.s32.totalorder %s5470_s12, %s3846_s23 }
 0x62c   :  { %p3850_p2 = scmp.lt.u32.totalorder %s3846_s23, %s5470_s12 }
 0x62d   :  { %v3065_v20 = vadd.f32 %v3064_v54, %v3063_v60  ;;  %v3077_v37 = vadd.f32 %v3076_v6, %v3075_v10 }
 0x62e   :  { %p3852_p3 = pnand %p3850_p2, %p3847_p1 }
 0x62f   :  { %v3066_v7 = vrot.slane %v3065_v20, 1 }
 0x631   :  { %v3067_v47 = vadd.f32 %v3066_v7, %v3065_v20 }
 0x633   :  { %3411 = vpush %v3067_v47 }
 0x634   :  { %3413 = vpush %v3077_v37 }
 0x664   :  { %s3412_s4 = spop %3411 }
 0x665   :  { %s3414_s18 = spop %3413 }
 0x666   :  { %v3079_v0 = vstv %s3414_s18 }
 0x667   :  { %3717 = vrcp.f32 %v3079_v0 }
 0x671   :  { %v3718_v16 = vpop.eup %3717 }
 0x672   :  { %3415 = vpush %v3718_v16 }
 0x6a3   :  { %s3416_s19 = spop %3415 }
 0x6a4   :  { %s3082_s7 = smul.f32 %s3416_s19, %s3412_s4 }
 0x6a6   :  { %3086 = sst [smem:[#allocation18]] %s3082_s7  ;;  %s3088_s24 = smul.f32 0.5, %s3082_s7 }
 0x6a7   :  { %3855 = shalt.err (!%p3852_p3)
}
 0x6a8   :  { %s3886_s9 = smov [#allocation18]   ;;  %s3089_s6 = sadd.f32 %s3088_s24, %s3087_s11 }
 0x6a9   :  { %3115 = dma.smem_to_hbm %s3886_s9, 16, %s5470_s12, [#allocation17]  }
 0x6aa   :  { %3091 = sst [smem:[#allocation15]] %s3089_s6  ;;  %s3856_s28 = scalar_lea.hbm %s5468_s10, 16 }
 0x6ab   :  { %p3857_p4 = scmp.ne.s32.totalorder %s5468_s10, %s3856_s28  ;;  %p3860_p5 = scmp.lt.u32.totalorder %s3856_s28, %s5468_s10 }
 0x6ad   :  { %p3862_p6 = pnand %p3860_p5, %p3857_p4 }
 0x6af   :  { %3865 = shalt.err (!%p3862_p6)
}
 0x6b0   :  { %s3887_s2 = smov [#allocation15]  }
 0x6b1   :  { %3099 = dma.smem_to_hbm %s3887_s2, 16, %s5468_s10, [#allocation8]  }
 0x6b2   :  { %3872 = dma.done.wait [#allocation8], 16  }
 0x6b3   :  { %3873 = vsyncadd [#allocation8], 4294967280 }
 0x6b4   :  { %3874 = dma.done.wait [#allocation17], 32  }
 0x6b5   :  { %3875 = vsyncadd [#allocation17], 4294967264 }
 0x6b6   :  { %3125 = sfence }
 0x6b7   :  { %3126 = vsyncpa [#allocation7], 1 }
 0x6b8   :  { %3127 = vsyncpa [#allocation10], 1 }
 0x6b9   :  { %3128 = vsyncpa [#allocation13], 1 }
 0x6ba   :  { %3129 = vsyncpa [#allocation8], 1 }
 0x6bb   :  { %3130 = vsyncpa [#allocation17], 1 }

</bundles_post_ra>
